<compile_context>
chip_gen: v6e
topology: v6e:2x2x1
jax: 0.10.0
libtpu: 0.0.40
codegen_flags: <defaults>
</compile_context>

<pallas_src>
import math

import jax
import jax.numpy as jnp
from jax import lax
from jax.experimental import pallas as pl
from jax.experimental.pallas import tpu as pltpu

# Make the pure-JAX reference use full f32 matmul precision for the check.
jax.config.update("jax_default_matmul_precision", "highest")

# ---------------- small, module-consistent config ----------------
IMG = 16          # img_size
PATCH = 8         # patch_embed(patch_size=8, stride=8, padding=0)
IN_CHANS = 4
EMBED_DIM = 32
DEPTH = 2
NUM_HEADS = 4
MLP_RATIO = 4.0
NUM_CLASSES = 10
EPS = 1e-6        # norm_layer = partial(nn.LayerNorm, eps=1e-6)

MLP_HIDDEN = int(EMBED_DIM * MLP_RATIO)
HEAD_DIM = EMBED_DIM // NUM_HEADS
SCALE = HEAD_DIM ** -0.5
NUM_PATCHES = (IMG // PATCH) ** 2
SEQ = NUM_PATCHES + 1            # + cls token
PATCH_DIM = IN_CHANS * PATCH * PATCH
OUT_LANES = 128                  # lane-dense output width (>= NUM_CLASSES)
NVEC = 3 + 6 * DEPTH + 2         # rows in the consolidated vector slab


# ---------------- in-kernel math helpers ----------------
def _layernorm(x, gamma, beta):
    mu = jnp.mean(x, axis=-1, keepdims=True)
    var = jnp.mean(jnp.square(x - mu), axis=-1, keepdims=True)
    return (x - mu) * lax.rsqrt(var + EPS) * gamma + beta


def _gelu_tanh(x):
    # tanh-approx GELU: one EUP tanh instead of a long VALU erf polynomial.
    c = math.sqrt(2.0 / math.pi)
    return 0.5 * x * (1.0 + jnp.tanh(c * (x + 0.044715 * x * x * x)))


# -------- fused per-sample kernel: patch-embed + DEPTH blocks + head --------
def tsr_vit_kernel(patches_ref, pe_w_ref, tok_add_ref, vecs_ref,
                   w_qkvb_ref, w_o_ref, w_fc1b_ref, w_fc2_ref, head_ref,
                   out_ref):
    f32 = jnp.float32
    C, H, D, S = EMBED_DIM, NUM_HEADS, HEAD_DIM, SEQ

    vecs = vecs_ref[...]                                    # (NVEC, C)

    # ---- patch embedding (conv-as-matmul + LayerNorm); cls slot row is 0 ----
    p = patches_ref[0]                                      # (S, PATCH_DIM)
    t = jnp.dot(p, pe_w_ref[...], preferred_element_type=f32) + vecs[0:1]
    t = _layernorm(t, vecs[1:2], vecs[2:3])
    row = lax.broadcasted_iota(jnp.int32, (S, C), 0)
    # zero the meaningless cls-slot row, then add (pos + cls-at-row-0)
    x = jnp.where(row == 0, 0.0, t) + tok_add_ref[...]      # (S, C)

    for d in range(DEPTH):                                  # static unroll
        vb = 3 + 6 * d
        ln1_g, ln1_b = vecs[vb:vb + 1], vecs[vb + 1:vb + 2]
        ln2_g, ln2_b = vecs[vb + 2:vb + 3], vecs[vb + 3:vb + 4]
        bo, b2 = vecs[vb + 4:vb + 5], vecs[vb + 5:vb + 6]

        # ---------------- attention branch (pre-norm) ----------------
        xn = _layernorm(x, ln1_g, ln1_b)                    # (S, C)
        wqkv = w_qkvb_ref[d]                                # (C+1, 3C), bias last row
        # ONE lane-dense QKV matmul; SCALE already folded into Wq / bq.
        qkv = jnp.dot(xn, wqkv[0:C], preferred_element_type=f32) + wqkv[C:C + 1]

        o_heads = []
        for h in range(H):                                  # tiny per-head attn
            q_h = qkv[:, h * D:(h + 1) * D]                 # (S, D)
            k_h = qkv[:, C + h * D:C + (h + 1) * D]
            v_h = qkv[:, 2 * C + h * D:2 * C + (h + 1) * D]
            s = jnp.einsum("rd,sd->rs", q_h, k_h,
                           preferred_element_type=f32)      # (S, S)
            s = s - jnp.max(s, axis=-1, keepdims=True)
            pr = jnp.exp(s)
            pr = pr * pl.reciprocal(jnp.sum(pr, axis=-1, keepdims=True),
                                    approx=True)
            o_heads.append(jnp.dot(pr, v_h, preferred_element_type=f32))
        o_cat = jnp.concatenate(o_heads, axis=-1)           # (S, C) concat-heads
        x = x + jnp.dot(o_cat, w_o_ref[d],
                        preferred_element_type=f32) + bo

        # ---------------- MLP branch (pre-norm) ----------------
        xn2 = _layernorm(x, ln2_g, ln2_b)
        w1b = w_fc1b_ref[d]                                 # (C+1, HID)
        h1 = jnp.dot(xn2, w1b[0:C], preferred_element_type=f32) + w1b[C:C + 1]
        h1 = _gelu_tanh(h1)
        x = x + jnp.dot(h1, w_fc2_ref[d],
                        preferred_element_type=f32) + b2

    # ---- final LayerNorm + head on the cls row only; lane-dense output ----
    nb = 3 + 6 * DEPTH
    xc = _layernorm(x[0:1], vecs[nb:nb + 1], vecs[nb + 1:nb + 2])   # (1, C)
    head = head_ref[...]                                            # (C+1, 128)
    logits = jnp.dot(xc, head[0:C], preferred_element_type=f32) + head[C:C + 1]
    out_ref[...] = jnp.broadcast_to(logits[None], (1, 8, OUT_LANES))


# ---------------- host-side glue ----------------
def _const_spec(shape):
    n = len(shape)
    return pl.BlockSpec(shape, lambda b, _n=n: (0,) * _n)


def extract_patches(x):
    # x: (B, C_in, H, W) NCHW -> (B, num_patches, C_in * PATCH * PATCH)
    B, Cin, Hh, Ww = x.shape
    ph, pw = Hh // PATCH, Ww // PATCH
    x = x.reshape(B, Cin, ph, PATCH, pw, PATCH)
    x = x.transpose(0, 2, 4, 1, 3, 5)          # B, ph, pw, Cin, kh, kw
    return x.reshape(B, ph * pw, Cin * PATCH * PATCH)


def forward(x, params):
    f32 = jnp.float32
    B = x.shape[0]

    # per-sample patch slab with a zero row at the cls-token slot (single DMA)
    patches = extract_patches(x).astype(f32)                           # (B, Np, P)
    patches_padded = jnp.zeros((B, SEQ, PATCH_DIM), f32).at[:, 1:, :].set(patches)

    out = pl.pallas_call(
        tsr_vit_kernel,
        out_shape=jax.ShapeDtypeStruct((B, 8, OUT_LANES), f32),
        grid=(B,),
        in_specs=[
            pl.BlockSpec((1, SEQ, PATCH_DIM), lambda b: (b, 0, 0)),
            _const_spec(params["pe_w"].shape),
            _const_spec(params["tok_add"].shape),
            _const_spec(params["vecs"].shape),
            _const_spec(params["w_qkvb"].shape),
            _const_spec(params["w_o"].shape),
            _const_spec(params["w_fc1b"].shape),
            _const_spec(params["w_fc2"].shape),
            _const_spec(params["head"].shape),
        ],
        out_specs=pl.BlockSpec((1, 8, OUT_LANES), lambda b: (b, 0, 0)),
        compiler_params=pltpu.CompilerParams(
            dimension_semantics=("parallel",)),   # v7x: 2 TCs split the batch
    )(patches_padded, params["pe_w"], params["tok_add"], params["vecs"],
      params["w_qkvb"], params["w_o"], params["w_fc1b"], params["w_fc2"],
      params["head"])

    return out[:, 0, :NUM_CLASSES]


# ---------------- parameters: natural (PyTorch-like) + packed (kernel) ------
def init_params(key):
    keys = iter(jax.random.split(key, 32))

    def nrm(shape, std=0.02):
        return (std * jax.random.normal(next(keys), shape)).astype(jnp.float32)

    C, HID = EMBED_DIM, MLP_HIDDEN
    p = {
        "pe_w": nrm((PATCH_DIM, C)),
        "pe_b": jnp.zeros((C,), jnp.float32),
        "pe_g": jnp.ones((C,), jnp.float32),
        "pe_beta": jnp.zeros((C,), jnp.float32),
        "cls": nrm((C,)),                 # trunc_normal_(std=0.02) analogue
        "pos": nrm((SEQ, C)),
        "norm_g": jnp.ones((C,), jnp.float32),
        "norm_b": jnp.zeros((C,), jnp.float32),
        "head_w": nrm((C, NUM_CLASSES)),
        "head_b": jnp.zeros((NUM_CLASSES,), jnp.float32),
        "blocks": [],
    }
    for _ in range(DEPTH):
        p["blocks"].append({
            "ln1_g": jnp.ones((C,), jnp.float32),
            "ln1_b": jnp.zeros((C,), jnp.float32),
            "wq": nrm((C, C)), "bq": jnp.zeros((C,), jnp.float32),
            "wk": nrm((C, C)), "bk": jnp.zeros((C,), jnp.float32),
            "wv": nrm((C, C)), "bv": jnp.zeros((C,), jnp.float32),
            "wo": nrm((C, C)), "bo": jnp.zeros((C,), jnp.float32),
            "ln2_g": jnp.ones((C,), jnp.float32),
            "ln2_b": jnp.zeros((C,), jnp.float32),
            "w1": nrm((C, HID)), "b1": jnp.zeros((HID,), jnp.float32),
            "w2": nrm((HID, C)), "b2": jnp.zeros((C,), jnp.float32),
        })
    return p


def pack_params(p):
    """Consolidate/reshape weights for the fused kernel (host-side, once)."""
    C = EMBED_DIM
    f32 = jnp.float32

    vec_rows = [p["pe_b"], p["pe_g"], p["pe_beta"]]
    w_qkvb, w_o, w_fc1b, w_fc2 = [], [], [], []
    for blk in p["blocks"]:
        vec_rows += [blk["ln1_g"], blk["ln1_b"], blk["ln2_g"], blk["ln2_b"],
                     blk["bo"], blk["b2"]]
        # fold the attention scale into Wq / bq (free at pack time)
        wq = blk["wq"] * SCALE
        bq = blk["bq"] * SCALE
        wqkv = jnp.concatenate([wq, blk["wk"], blk["wv"]], axis=1)       # (C, 3C)
        bqkv = jnp.concatenate([bq, blk["bk"], blk["bv"]])[None, :]      # (1, 3C)
        w_qkvb.append(jnp.concatenate([wqkv, bqkv], axis=0))             # (C+1, 3C)
        w_o.append(blk["wo"])                                            # (C, C)
        w_fc1b.append(jnp.concatenate([blk["w1"], blk["b1"][None, :]],
                                      axis=0))                           # (C+1, HID)
        w_fc2.append(blk["w2"])                                          # (HID, C)
    vec_rows += [p["norm_g"], p["norm_b"]]

    head_w_pad = jnp.zeros((C, OUT_LANES), f32).at[:, :NUM_CLASSES].set(p["head_w"])
    head_b_pad = jnp.zeros((1, OUT_LANES), f32).at[0, :NUM_CLASSES].set(p["head_b"])
    tok_add = p["pos"].at[0].add(p["cls"])        # pos with cls folded into row 0

    packed = {
        "pe_w": p["pe_w"],                                    # (PATCH_DIM, C)
        "tok_add": tok_add,                                   # (SEQ, C)
        "vecs": jnp.stack(vec_rows),                          # (NVEC, C)
        "w_qkvb": jnp.stack(w_qkvb),                          # (DEPTH, C+1, 3C)
        "w_o": jnp.stack(w_o),                                # (DEPTH, C, C)
        "w_fc1b": jnp.stack(w_fc1b),                          # (DEPTH, C+1, HID)
        "w_fc2": jnp.stack(w_fc2),                            # (DEPTH, HID, C)
        "head": jnp.concatenate([head_w_pad, head_b_pad], 0), # (C+1, 128)
    }
    assert packed["vecs"].shape == (NVEC, C)
    return packed


# ---------------- pure-JAX reference (numerical sanity check) ---------
def _ln_ref(x, g, b):
    mu = jnp.mean(x, axis=-1, keepdims=True)
    var = jnp.mean(jnp.square(x - mu), axis=-1, keepdims=True)
    return (x - mu) * lax.rsqrt(var + EPS) * g + b


def reference_forward(x, p):
    B = x.shape[0]
    patches = extract_patches(x)
    tok = _ln_ref(patches @ p["pe_w"] + p["pe_b"], p["pe_g"], p["pe_beta"])
    cls = jnp.broadcast_to(p["cls"][None, None, :], (B, 1, EMBED_DIM))
    h = jnp.concatenate([cls, tok], axis=1) + p["pos"][None]
    for blk in p["blocks"]:
        hn = _ln_ref(h, blk["ln1_g"], blk["ln1_b"])

        def heads(w, b):
            y = hn @ w + b
            return y.reshape(B, SEQ, NUM_HEADS, HEAD_DIM).transpose(0, 2, 1, 3)

        q, k, v = (heads(blk["wq"], blk["bq"]), heads(blk["wk"], blk["bk"]),
                   heads(blk["wv"], blk["bv"]))
        s = jnp.einsum("bhnd,bhmd->bhnm", q, k) * SCALE
        a = jax.nn.softmax(s, axis=-1)
        o = jnp.einsum("bhnm,bhmd->bhnd", a, v)
        o = o.transpose(0, 2, 1, 3).reshape(B, SEQ, EMBED_DIM)
        h = h + o @ blk["wo"] + blk["bo"]
        hn2 = _ln_ref(h, blk["ln2_g"], blk["ln2_b"])
        m = jax.nn.gelu(hn2 @ blk["w1"] + blk["b1"], approximate=False)
        h = h + m @ blk["w2"] + blk["b2"]
    hn = _ln_ref(h, p["norm_g"], p["norm_b"])
    return hn[:, 0, :] @ p["head_w"] + p["head_b"]


if __name__ == "__main__":
    key = jax.random.PRNGKey(0)
    kx, kp = jax.random.split(key)
    x = jax.random.normal(kx, (2, IN_CHANS, IMG, IMG), dtype=jnp.float32)

    natural = init_params(kp)
    packed = pack_params(natural)

    logits = jax.jit(forward)(x, packed)
    logits = jax.block_until_ready(logits)

    assert logits.shape == (2, NUM_CLASSES)
    assert bool(jnp.all(jnp.isfinite(logits)))

    ref = reference_forward(x, natural)
    max_diff = float(jnp.max(jnp.abs(logits - ref)))
    assert jnp.allclose(logits, ref, rtol=5e-2, atol=5e-2), f"max diff {max_diff}"

    print("KERNEL_OK")
</pallas_src>

<mosaic_0001>
module attributes {stable_mosaic.version = 11 : i64} {
  func.func @tsr_vit_kernel(%arg0: i32, %arg1: memref<1x5x256xf32, #tpu.memory_space<vmem>>, %arg2: memref<256x32xf32, #tpu.memory_space<vmem>>, %arg3: memref<5x32xf32, #tpu.memory_space<vmem>>, %arg4: memref<17x32xf32, #tpu.memory_space<vmem>>, %arg5: memref<2x33x96xf32, #tpu.memory_space<vmem>>, %arg6: memref<2x32x32xf32, #tpu.memory_space<vmem>>, %arg7: memref<2x33x128xf32, #tpu.memory_space<vmem>>, %arg8: memref<2x128x32xf32, #tpu.memory_space<vmem>>, %arg9: memref<33x128xf32, #tpu.memory_space<vmem>>, %arg10: memref<1x8x128xf32, #tpu.memory_space<vmem>>) attributes {dimension_semantics = [#tpu.dimension_semantics<parallel>], iteration_bounds = array<i64: 2>, scalar_prefetch = 0 : i64, scratch_operands = 0 : i64, tpu.core_type = #tpu.core_type<tc>, window_params = [{transform_indices = @transform_0, window_bounds = array<i64: 1, 5, 256>}, {pipeline_mode = #tpu.pipeline_mode<synchronous>, transform_indices = @transform_1, window_bounds = array<i64: 256, 32>}, {pipeline_mode = #tpu.pipeline_mode<synchronous>, transform_indices = @transform_2, window_bounds = array<i64: 5, 32>}, {pipeline_mode = #tpu.pipeline_mode<synchronous>, transform_indices = @transform_3, window_bounds = array<i64: 17, 32>}, {pipeline_mode = #tpu.pipeline_mode<synchronous>, transform_indices = @transform_4, window_bounds = array<i64: 2, 33, 96>}, {pipeline_mode = #tpu.pipeline_mode<synchronous>, transform_indices = @transform_5, window_bounds = array<i64: 2, 32, 32>}, {pipeline_mode = #tpu.pipeline_mode<synchronous>, transform_indices = @transform_6, window_bounds = array<i64: 2, 33, 128>}, {pipeline_mode = #tpu.pipeline_mode<synchronous>, transform_indices = @transform_7, window_bounds = array<i64: 2, 128, 32>}, {pipeline_mode = #tpu.pipeline_mode<synchronous>, transform_indices = @transform_8, window_bounds = array<i64: 33, 128>}, {transform_indices = @transform_9, window_bounds = array<i64: 1, 8, 128>}]} {
    %c0 = arith.constant 0 : index
    %c0_0 = arith.constant 0 : index
    %0 = vector.load %arg4[%c0, %c0_0] : memref<17x32xf32, #tpu.memory_space<vmem>>, vector<17x32xf32>
    %c0_1 = arith.constant 0 : index
    %c0_2 = arith.constant 0 : index
    %c0_3 = arith.constant 0 : index
    %1 = vector.load %arg1[%c0_1, %c0_2, %c0_3] : memref<1x5x256xf32, #tpu.memory_space<vmem>>, vector<1x5x256xf32>
    %2 = vector.shape_cast %1 : vector<1x5x256xf32> to vector<5x256xf32>
    %c0_4 = arith.constant 0 : index
    %c0_5 = arith.constant 0 : index
    %3 = vector.load %arg2[%c0_4, %c0_5] : memref<256x32xf32, #tpu.memory_space<vmem>>, vector<256x32xf32>
    %cst = arith.constant dense<0.000000e+00> : vector<5x32xf32>
    %4 = tpu.matmul %2, %3, %cst {dimension_numbers = #tpu.dot_dimension_numbers<[1], [0], [0], [1], [0, 0, 1, 1], [], []>, precision = #tpu.contract_precision<fp32>} : vector<5x256xf32>, vector<256x32xf32>, vector<5x32xf32> -> vector<5x32xf32>
    %5 = vector.extract_strided_slice %0 {offsets = [0, 0], sizes = [1, 32], strides = [1, 1]} : vector<17x32xf32> to vector<1x32xf32>
    %6 = vector.broadcast %5 : vector<1x32xf32> to vector<5x32xf32>
    %7 = arith.addf %4, %6 : vector<5x32xf32>
    %8 = vector.extract_strided_slice %0 {offsets = [1, 0], sizes = [1, 32], strides = [1, 1]} : vector<17x32xf32> to vector<1x32xf32>
    %9 = vector.extract_strided_slice %0 {offsets = [2, 0], sizes = [1, 32], strides = [1, 1]} : vector<17x32xf32> to vector<1x32xf32>
    %cst_6 = arith.constant dense<0.000000e+00> : vector<5xf32>
    %10 = vector.multi_reduction <add>, %7, %cst_6 [1] : vector<5x32xf32> to vector<5xf32>
    %11 = vector.shape_cast %10 : vector<5xf32> to vector<5x1xf32>
    %cst_7 = arith.constant 3.200000e+01 : f32
    %12 = vector.broadcast %cst_7 : f32 to vector<5x1xf32>
    %13 = arith.divf %11, %12 : vector<5x1xf32>
    %14 = vector.broadcast %13 : vector<5x1xf32> to vector<5x32xf32>
    %15 = arith.subf %7, %14 : vector<5x32xf32>
    %16 = arith.mulf %15, %15 : vector<5x32xf32>
    %cst_8 = arith.constant dense<0.000000e+00> : vector<5xf32>
    %17 = vector.multi_reduction <add>, %16, %cst_8 [1] : vector<5x32xf32> to vector<5xf32>
    %18 = vector.shape_cast %17 : vector<5xf32> to vector<5x1xf32>
    %cst_9 = arith.constant 3.200000e+01 : f32
    %19 = vector.broadcast %cst_9 : f32 to vector<5x1xf32>
    %20 = arith.divf %18, %19 : vector<5x1xf32>
    %21 = vector.broadcast %13 : vector<5x1xf32> to vector<5x32xf32>
    %22 = arith.subf %7, %21 : vector<5x32xf32>
    %cst_10 = arith.constant 9.99999997E-7 : f32
    %23 = vector.broadcast %cst_10 : f32 to vector<5x1xf32>
    %24 = arith.addf %20, %23 : vector<5x1xf32>
    %25 = math.rsqrt %24 : vector<5x1xf32>
    %26 = vector.broadcast %25 : vector<5x1xf32> to vector<5x32xf32>
    %27 = arith.mulf %22, %26 : vector<5x32xf32>
    %28 = vector.broadcast %8 : vector<1x32xf32> to vector<5x32xf32>
    %29 = arith.mulf %27, %28 : vector<5x32xf32>
    %30 = vector.broadcast %9 : vector<1x32xf32> to vector<5x32xf32>
    %31 = arith.addf %29, %30 : vector<5x32xf32>
    %32 = tpu.iota {dimensions = array<i32: 0>} : vector<5x32xi32>
    %c0_i32 = arith.constant 0 : i32
    %33 = vector.broadcast %c0_i32 : i32 to vector<5x32xi32>
    %34 = arith.cmpi eq, %32, %33 : vector<5x32xi32>
    %cst_11 = arith.constant 0.000000e+00 : f32
    %35 = vector.broadcast %cst_11 : f32 to vector<5x32xf32>
    %36 = arith.select %34, %35, %31 : vector<5x32xi1>, vector<5x32xf32>
    %c0_12 = arith.constant 0 : index
    %c0_13 = arith.constant 0 : index
    %37 = vector.load %arg3[%c0_12, %c0_13] : memref<5x32xf32, #tpu.memory_space<vmem>>, vector<5x32xf32>
    %38 = arith.addf %36, %37 : vector<5x32xf32>
    %39 = vector.extract_strided_slice %0 {offsets = [3, 0], sizes = [1, 32], strides = [1, 1]} : vector<17x32xf32> to vector<1x32xf32>
    %40 = vector.extract_strided_slice %0 {offsets = [4, 0], sizes = [1, 32], strides = [1, 1]} : vector<17x32xf32> to vector<1x32xf32>
    %41 = vector.extract_strided_slice %0 {offsets = [5, 0], sizes = [1, 32], strides = [1, 1]} : vector<17x32xf32> to vector<1x32xf32>
    %42 = vector.extract_strided_slice %0 {offsets = [6, 0], sizes = [1, 32], strides = [1, 1]} : vector<17x32xf32> to vector<1x32xf32>
    %43 = vector.extract_strided_slice %0 {offsets = [7, 0], sizes = [1, 32], strides = [1, 1]} : vector<17x32xf32> to vector<1x32xf32>
    %44 = vector.extract_strided_slice %0 {offsets = [8, 0], sizes = [1, 32], strides = [1, 1]} : vector<17x32xf32> to vector<1x32xf32>
    %cst_14 = arith.constant dense<0.000000e+00> : vector<5xf32>
    %45 = vector.multi_reduction <add>, %38, %cst_14 [1] : vector<5x32xf32> to vector<5xf32>
    %46 = vector.shape_cast %45 : vector<5xf32> to vector<5x1xf32>
    %cst_15 = arith.constant 3.200000e+01 : f32
    %47 = vector.broadcast %cst_15 : f32 to vector<5x1xf32>
    %48 = arith.divf %46, %47 : vector<5x1xf32>
    %49 = vector.broadcast %48 : vector<5x1xf32> to vector<5x32xf32>
    %50 = arith.subf %38, %49 : vector<5x32xf32>
    %51 = arith.mulf %50, %50 : vector<5x32xf32>
    %cst_16 = arith.constant dense<0.000000e+00> : vector<5xf32>
    %52 = vector.multi_reduction <add>, %51, %cst_16 [1] : vector<5x32xf32> to vector<5xf32>
    %53 = vector.shape_cast %52 : vector<5xf32> to vector<5x1xf32>
    %cst_17 = arith.constant 3.200000e+01 : f32
    %54 = vector.broadcast %cst_17 : f32 to vector<5x1xf32>
    %55 = arith.divf %53, %54 : vector<5x1xf32>
    %56 = vector.broadcast %48 : vector<5x1xf32> to vector<5x32xf32>
    %57 = arith.subf %38, %56 : vector<5x32xf32>
    %cst_18 = arith.constant 9.99999997E-7 : f32
    %58 = vector.broadcast %cst_18 : f32 to vector<5x1xf32>
    %59 = arith.addf %55, %58 : vector<5x1xf32>
    %60 = math.rsqrt %59 : vector<5x1xf32>
    %61 = vector.broadcast %60 : vector<5x1xf32> to vector<5x32xf32>
    %62 = arith.mulf %57, %61 : vector<5x32xf32>
    %63 = vector.broadcast %39 : vector<1x32xf32> to vector<5x32xf32>
    %64 = arith.mulf %62, %63 : vector<5x32xf32>
    %65 = vector.broadcast %40 : vector<1x32xf32> to vector<5x32xf32>
    %66 = arith.addf %64, %65 : vector<5x32xf32>
    %c0_19 = arith.constant 0 : index
    %c0_20 = arith.constant 0 : index
    %c0_21 = arith.constant 0 : index
    %67 = vector.load %arg5[%c0_19, %c0_20, %c0_21] : memref<2x33x96xf32, #tpu.memory_space<vmem>>, vector<1x33x96xf32>
    %68 = vector.shape_cast %67 : vector<1x33x96xf32> to vector<33x96xf32>
    %69 = vector.extract_strided_slice %68 {offsets = [0, 0], sizes = [32, 96], strides = [1, 1]} : vector<33x96xf32> to vector<32x96xf32>
    %cst_22 = arith.constant dense<0.000000e+00> : vector<5x96xf32>
    %70 = tpu.matmul %66, %69, %cst_22 {dimension_numbers = #tpu.dot_dimension_numbers<[1], [0], [0], [1], [0, 0, 1, 1], [], []>, precision = #tpu.contract_precision<fp32>} : vector<5x32xf32>, vector<32x96xf32>, vector<5x96xf32> -> vector<5x96xf32>
    %71 = vector.extract_strided_slice %68 {offsets = [32, 0], sizes = [1, 96], strides = [1, 1]} : vector<33x96xf32> to vector<1x96xf32>
    %72 = vector.broadcast %71 : vector<1x96xf32> to vector<5x96xf32>
    %73 = arith.addf %70, %72 : vector<5x96xf32>
    %74 = vector.extract_strided_slice %73 {offsets = [0, 0], sizes = [5, 8], strides = [1, 1]} : vector<5x96xf32> to vector<5x8xf32>
    %75 = vector.extract_strided_slice %73 {offsets = [0, 32], sizes = [5, 8], strides = [1, 1]} : vector<5x96xf32> to vector<5x8xf32>
    %76 = vector.extract_strided_slice %73 {offsets = [0, 64], sizes = [5, 8], strides = [1, 1]} : vector<5x96xf32> to vector<5x8xf32>
    "tpu.trace_start"() <{level = 10 : i32, message = "rd,sd->rs"}> : () -> ()
    %cst_23 = arith.constant dense<0.000000e+00> : vector<5x5xf32>
    %77 = tpu.matmul %74, %75, %cst_23 {dimension_numbers = #tpu.dot_dimension_numbers<[1], [1], [0], [0], [0, 0, 1, 0], [], []>, precision = #tpu.contract_precision<fp32>} : vector<5x8xf32>, vector<5x8xf32>, vector<5x5xf32> -> vector<5x5xf32>
    "tpu.trace_stop"() : () -> ()
    %cst_24 = arith.constant dense<0xFF800000> : vector<5xf32>
    %78 = vector.multi_reduction <maximumf>, %77, %cst_24 [1] : vector<5x5xf32> to vector<5xf32>
    %79 = vector.shape_cast %78 : vector<5xf32> to vector<5x1xf32>
    %80 = vector.broadcast %79 : vector<5x1xf32> to vector<5x5xf32>
    %81 = arith.subf %77, %80 : vector<5x5xf32>
    %82 = math.exp %81 : vector<5x5xf32>
    %cst_25 = arith.constant dense<0.000000e+00> : vector<5xf32>
    %83 = vector.multi_reduction <add>, %82, %cst_25 [1] : vector<5x5xf32> to vector<5xf32>
    %84 = vector.shape_cast %83 : vector<5xf32> to vector<5x1xf32>
    %85 = tpu.reciprocal %84 {approx = true} : vector<5x1xf32> -> vector<5x1xf32>
    %86 = vector.broadcast %85 : vector<5x1xf32> to vector<5x5xf32>
    %87 = arith.mulf %82, %86 : vector<5x5xf32>
    %cst_26 = arith.constant dense<0.000000e+00> : vector<5x8xf32>
    %88 = tpu.matmul %87, %76, %cst_26 {dimension_numbers = #tpu.dot_dimension_numbers<[1], [0], [0], [1], [0, 0, 1, 1], [], []>, precision = #tpu.contract_precision<fp32>} : vector<5x5xf32>, vector<5x8xf32>, vector<5x8xf32> -> vector<5x8xf32>
    %89 = vector.extract_strided_slice %73 {offsets = [0, 8], sizes = [5, 8], strides = [1, 1]} : vector<5x96xf32> to vector<5x8xf32>
    %90 = vector.extract_strided_slice %73 {offsets = [0, 40], sizes = [5, 8], strides = [1, 1]} : vector<5x96xf32> to vector<5x8xf32>
    %91 = vector.extract_strided_slice %73 {offsets = [0, 72], sizes = [5, 8], strides = [1, 1]} : vector<5x96xf32> to vector<5x8xf32>
    "tpu.trace_start"() <{level = 10 : i32, message = "rd,sd->rs"}> : () -> ()
    %cst_27 = arith.constant dense<0.000000e+00> : vector<5x5xf32>
    %92 = tpu.matmul %89, %90, %cst_27 {dimension_numbers = #tpu.dot_dimension_numbers<[1], [1], [0], [0], [0, 0, 1, 0], [], []>, precision = #tpu.contract_precision<fp32>} : vector<5x8xf32>, vector<5x8xf32>, vector<5x5xf32> -> vector<5x5xf32>
    "tpu.trace_stop"() : () -> ()
    %cst_28 = arith.constant dense<0xFF800000> : vector<5xf32>
    %93 = vector.multi_reduction <maximumf>, %92, %cst_28 [1] : vector<5x5xf32> to vector<5xf32>
    %94 = vector.shape_cast %93 : vector<5xf32> to vector<5x1xf32>
    %95 = vector.broadcast %94 : vector<5x1xf32> to vector<5x5xf32>
    %96 = arith.subf %92, %95 : vector<5x5xf32>
    %97 = math.exp %96 : vector<5x5xf32>
    %cst_29 = arith.constant dense<0.000000e+00> : vector<5xf32>
    %98 = vector.multi_reduction <add>, %97, %cst_29 [1] : vector<5x5xf32> to vector<5xf32>
    %99 = vector.shape_cast %98 : vector<5xf32> to vector<5x1xf32>
    %100 = tpu.reciprocal %99 {approx = true} : vector<5x1xf32> -> vector<5x1xf32>
    %101 = vector.broadcast %100 : vector<5x1xf32> to vector<5x5xf32>
    %102 = arith.mulf %97, %101 : vector<5x5xf32>
    %cst_30 = arith.constant dense<0.000000e+00> : vector<5x8xf32>
    %103 = tpu.matmul %102, %91, %cst_30 {dimension_numbers = #tpu.dot_dimension_numbers<[1], [0], [0], [1], [0, 0, 1, 1], [], []>, precision = #tpu.contract_precision<fp32>} : vector<5x5xf32>, vector<5x8xf32>, vector<5x8xf32> -> vector<5x8xf32>
    %104 = vector.extract_strided_slice %73 {offsets = [0, 16], sizes = [5, 8], strides = [1, 1]} : vector<5x96xf32> to vector<5x8xf32>
    %105 = vector.extract_strided_slice %73 {offsets = [0, 48], sizes = [5, 8], strides = [1, 1]} : vector<5x96xf32> to vector<5x8xf32>
    %106 = vector.extract_strided_slice %73 {offsets = [0, 80], sizes = [5, 8], strides = [1, 1]} : vector<5x96xf32> to vector<5x8xf32>
    "tpu.trace_start"() <{level = 10 : i32, message = "rd,sd->rs"}> : () -> ()
    %cst_31 = arith.constant dense<0.000000e+00> : vector<5x5xf32>
    %107 = tpu.matmul %104, %105, %cst_31 {dimension_numbers = #tpu.dot_dimension_numbers<[1], [1], [0], [0], [0, 0, 1, 0], [], []>, precision = #tpu.contract_precision<fp32>} : vector<5x8xf32>, vector<5x8xf32>, vector<5x5xf32> -> vector<5x5xf32>
    "tpu.trace_stop"() : () -> ()
    %cst_32 = arith.constant dense<0xFF800000> : vector<5xf32>
    %108 = vector.multi_reduction <maximumf>, %107, %cst_32 [1] : vector<5x5xf32> to vector<5xf32>
    %109 = vector.shape_cast %108 : vector<5xf32> to vector<5x1xf32>
    %110 = vector.broadcast %109 : vector<5x1xf32> to vector<5x5xf32>
    %111 = arith.subf %107, %110 : vector<5x5xf32>
    %112 = math.exp %111 : vector<5x5xf32>
    %cst_33 = arith.constant dense<0.000000e+00> : vector<5xf32>
    %113 = vector.multi_reduction <add>, %112, %cst_33 [1] : vector<5x5xf32> to vector<5xf32>
    %114 = vector.shape_cast %113 : vector<5xf32> to vector<5x1xf32>
    %115 = tpu.reciprocal %114 {approx = true} : vector<5x1xf32> -> vector<5x1xf32>
    %116 = vector.broadcast %115 : vector<5x1xf32> to vector<5x5xf32>
    %117 = arith.mulf %112, %116 : vector<5x5xf32>
    %cst_34 = arith.constant dense<0.000000e+00> : vector<5x8xf32>
    %118 = tpu.matmul %117, %106, %cst_34 {dimension_numbers = #tpu.dot_dimension_numbers<[1], [0], [0], [1], [0, 0, 1, 1], [], []>, precision = #tpu.contract_precision<fp32>} : vector<5x5xf32>, vector<5x8xf32>, vector<5x8xf32> -> vector<5x8xf32>
    %119 = vector.extract_strided_slice %73 {offsets = [0, 24], sizes = [5, 8], strides = [1, 1]} : vector<5x96xf32> to vector<5x8xf32>
    %120 = vector.extract_strided_slice %73 {offsets = [0, 56], sizes = [5, 8], strides = [1, 1]} : vector<5x96xf32> to vector<5x8xf32>
    %121 = vector.extract_strided_slice %73 {offsets = [0, 88], sizes = [5, 8], strides = [1, 1]} : vector<5x96xf32> to vector<5x8xf32>
    "tpu.trace_start"() <{level = 10 : i32, message = "rd,sd->rs"}> : () -> ()
    %cst_35 = arith.constant dense<0.000000e+00> : vector<5x5xf32>
    %122 = tpu.matmul %119, %120, %cst_35 {dimension_numbers = #tpu.dot_dimension_numbers<[1], [1], [0], [0], [0, 0, 1, 0], [], []>, precision = #tpu.contract_precision<fp32>} : vector<5x8xf32>, vector<5x8xf32>, vector<5x5xf32> -> vector<5x5xf32>
    "tpu.trace_stop"() : () -> ()
    %cst_36 = arith.constant dense<0xFF800000> : vector<5xf32>
    %123 = vector.multi_reduction <maximumf>, %122, %cst_36 [1] : vector<5x5xf32> to vector<5xf32>
    %124 = vector.shape_cast %123 : vector<5xf32> to vector<5x1xf32>
    %125 = vector.broadcast %124 : vector<5x1xf32> to vector<5x5xf32>
    %126 = arith.subf %122, %125 : vector<5x5xf32>
    %127 = math.exp %126 : vector<5x5xf32>
    %cst_37 = arith.constant dense<0.000000e+00> : vector<5xf32>
    %128 = vector.multi_reduction <add>, %127, %cst_37 [1] : vector<5x5xf32> to vector<5xf32>
    %129 = vector.shape_cast %128 : vector<5xf32> to vector<5x1xf32>
    %130 = tpu.reciprocal %129 {approx = true} : vector<5x1xf32> -> vector<5x1xf32>
    %131 = vector.broadcast %130 : vector<5x1xf32> to vector<5x5xf32>
    %132 = arith.mulf %127, %131 : vector<5x5xf32>
    %cst_38 = arith.constant dense<0.000000e+00> : vector<5x8xf32>
    %133 = tpu.matmul %132, %121, %cst_38 {dimension_numbers = #tpu.dot_dimension_numbers<[1], [0], [0], [1], [0, 0, 1, 1], [], []>, precision = #tpu.contract_precision<fp32>} : vector<5x5xf32>, vector<5x8xf32>, vector<5x8xf32> -> vector<5x8xf32>
    %134 = tpu.concatenate %88, %103, %118, %133 in 1 : vector<5x8xf32>, vector<5x8xf32>, vector<5x8xf32>, vector<5x8xf32> -> vector<5x32xf32>
    %c0_39 = arith.constant 0 : index
    %c0_40 = arith.constant 0 : index
    %c0_41 = arith.constant 0 : index
    %135 = vector.load %arg6[%c0_39, %c0_40, %c0_41] : memref<2x32x32xf32, #tpu.memory_space<vmem>>, vector<1x32x32xf32>
    %136 = vector.shape_cast %135 : vector<1x32x32xf32> to vector<32x32xf32>
    %cst_42 = arith.constant dense<0.000000e+00> : vector<5x32xf32>
    %137 = tpu.matmul %134, %136, %cst_42 {dimension_numbers = #tpu.dot_dimension_numbers<[1], [0], [0], [1], [0, 0, 1, 1], [], []>, precision = #tpu.contract_precision<fp32>} : vector<5x32xf32>, vector<32x32xf32>, vector<5x32xf32> -> vector<5x32xf32>
    %138 = arith.addf %38, %137 : vector<5x32xf32>
    %139 = vector.broadcast %43 : vector<1x32xf32> to vector<5x32xf32>
    %140 = arith.addf %138, %139 : vector<5x32xf32>
    %cst_43 = arith.constant dense<0.000000e+00> : vector<5xf32>
    %141 = vector.multi_reduction <add>, %140, %cst_43 [1] : vector<5x32xf32> to vector<5xf32>
    %142 = vector.shape_cast %141 : vector<5xf32> to vector<5x1xf32>
    %cst_44 = arith.constant 3.200000e+01 : f32
    %143 = vector.broadcast %cst_44 : f32 to vector<5x1xf32>
    %144 = arith.divf %142, %143 : vector<5x1xf32>
    %145 = vector.broadcast %144 : vector<5x1xf32> to vector<5x32xf32>
    %146 = arith.subf %140, %145 : vector<5x32xf32>
    %147 = arith.mulf %146, %146 : vector<5x32xf32>
    %cst_45 = arith.constant dense<0.000000e+00> : vector<5xf32>
    %148 = vector.multi_reduction <add>, %147, %cst_45 [1] : vector<5x32xf32> to vector<5xf32>
    %149 = vector.shape_cast %148 : vector<5xf32> to vector<5x1xf32>
    %cst_46 = arith.constant 3.200000e+01 : f32
    %150 = vector.broadcast %cst_46 : f32 to vector<5x1xf32>
    %151 = arith.divf %149, %150 : vector<5x1xf32>
    %152 = vector.broadcast %144 : vector<5x1xf32> to vector<5x32xf32>
    %153 = arith.subf %140, %152 : vector<5x32xf32>
    %cst_47 = arith.constant 9.99999997E-7 : f32
    %154 = vector.broadcast %cst_47 : f32 to vector<5x1xf32>
    %155 = arith.addf %151, %154 : vector<5x1xf32>
    %156 = math.rsqrt %155 : vector<5x1xf32>
    %157 = vector.broadcast %156 : vector<5x1xf32> to vector<5x32xf32>
    %158 = arith.mulf %153, %157 : vector<5x32xf32>
    %159 = vector.broadcast %41 : vector<1x32xf32> to vector<5x32xf32>
    %160 = arith.mulf %158, %159 : vector<5x32xf32>
    %161 = vector.broadcast %42 : vector<1x32xf32> to vector<5x32xf32>
    %162 = arith.addf %160, %161 : vector<5x32xf32>
    %c0_48 = arith.constant 0 : index
    %c0_49 = arith.constant 0 : index
    %c0_50 = arith.constant 0 : index
    %163 = vector.load %arg7[%c0_48, %c0_49, %c0_50] : memref<2x33x128xf32, #tpu.memory_space<vmem>>, vector<1x33x128xf32>
    %164 = vector.shape_cast %163 : vector<1x33x128xf32> to vector<33x128xf32>
    %165 = vector.extract_strided_slice %164 {offsets = [0, 0], sizes = [32, 128], strides = [1, 1]} : vector<33x128xf32> to vector<32x128xf32>
    %cst_51 = arith.constant dense<0.000000e+00> : vector<5x128xf32>
    %166 = tpu.matmul %162, %165, %cst_51 {dimension_numbers = #tpu.dot_dimension_numbers<[1], [0], [0], [1], [0, 0, 1, 1], [], []>, precision = #tpu.contract_precision<fp32>} : vector<5x32xf32>, vector<32x128xf32>, vector<5x128xf32> -> vector<5x128xf32>
    %167 = vector.extract_strided_slice %164 {offsets = [32, 0], sizes = [1, 128], strides = [1, 1]} : vector<33x128xf32> to vector<1x128xf32>
    %168 = vector.broadcast %167 : vector<1x128xf32> to vector<5x128xf32>
    %169 = arith.addf %166, %168 : vector<5x128xf32>
    %cst_52 = arith.constant 5.000000e-01 : f32
    %170 = vector.broadcast %cst_52 : f32 to vector<5x128xf32>
    %171 = arith.mulf %170, %169 : vector<5x128xf32>
    %cst_53 = arith.constant 4.471500e-02 : f32
    %172 = vector.broadcast %cst_53 : f32 to vector<5x128xf32>
    %173 = arith.mulf %172, %169 : vector<5x128xf32>
    %174 = arith.mulf %173, %169 : vector<5x128xf32>
    %175 = arith.mulf %174, %169 : vector<5x128xf32>
    %176 = arith.addf %169, %175 : vector<5x128xf32>
    %cst_54 = arith.constant 0.797884583 : f32
    %177 = vector.broadcast %cst_54 : f32 to vector<5x128xf32>
    %178 = arith.mulf %177, %176 : vector<5x128xf32>
    %179 = math.tanh %178 : vector<5x128xf32>
    %cst_55 = arith.constant 1.000000e+00 : f32
    %180 = vector.broadcast %cst_55 : f32 to vector<5x128xf32>
    %181 = arith.addf %180, %179 : vector<5x128xf32>
    %182 = arith.mulf %171, %181 : vector<5x128xf32>
    %c0_56 = arith.constant 0 : index
    %c0_57 = arith.constant 0 : index
    %c0_58 = arith.constant 0 : index
    %183 = vector.load %arg8[%c0_56, %c0_57, %c0_58] : memref<2x128x32xf32, #tpu.memory_space<vmem>>, vector<1x128x32xf32>
    %184 = vector.shape_cast %183 : vector<1x128x32xf32> to vector<128x32xf32>
    %cst_59 = arith.constant dense<0.000000e+00> : vector<5x32xf32>
    %185 = tpu.matmul %182, %184, %cst_59 {dimension_numbers = #tpu.dot_dimension_numbers<[1], [0], [0], [1], [0, 0, 1, 1], [], []>, precision = #tpu.contract_precision<fp32>} : vector<5x128xf32>, vector<128x32xf32>, vector<5x32xf32> -> vector<5x32xf32>
    %186 = arith.addf %140, %185 : vector<5x32xf32>
    %187 = vector.broadcast %44 : vector<1x32xf32> to vector<5x32xf32>
    %188 = arith.addf %186, %187 : vector<5x32xf32>
    %189 = vector.extract_strided_slice %0 {offsets = [9, 0], sizes = [1, 32], strides = [1, 1]} : vector<17x32xf32> to vector<1x32xf32>
    %190 = vector.extract_strided_slice %0 {offsets = [10, 0], sizes = [1, 32], strides = [1, 1]} : vector<17x32xf32> to vector<1x32xf32>
    %191 = vector.extract_strided_slice %0 {offsets = [11, 0], sizes = [1, 32], strides = [1, 1]} : vector<17x32xf32> to vector<1x32xf32>
    %192 = vector.extract_strided_slice %0 {offsets = [12, 0], sizes = [1, 32], strides = [1, 1]} : vector<17x32xf32> to vector<1x32xf32>
    %193 = vector.extract_strided_slice %0 {offsets = [13, 0], sizes = [1, 32], strides = [1, 1]} : vector<17x32xf32> to vector<1x32xf32>
    %194 = vector.extract_strided_slice %0 {offsets = [14, 0], sizes = [1, 32], strides = [1, 1]} : vector<17x32xf32> to vector<1x32xf32>
    %cst_60 = arith.constant dense<0.000000e+00> : vector<5xf32>
    %195 = vector.multi_reduction <add>, %188, %cst_60 [1] : vector<5x32xf32> to vector<5xf32>
    %196 = vector.shape_cast %195 : vector<5xf32> to vector<5x1xf32>
    %cst_61 = arith.constant 3.200000e+01 : f32
    %197 = vector.broadcast %cst_61 : f32 to vector<5x1xf32>
    %198 = arith.divf %196, %197 : vector<5x1xf32>
    %199 = vector.broadcast %198 : vector<5x1xf32> to vector<5x32xf32>
    %200 = arith.subf %188, %199 : vector<5x32xf32>
    %201 = arith.mulf %200, %200 : vector<5x32xf32>
    %cst_62 = arith.constant dense<0.000000e+00> : vector<5xf32>
    %202 = vector.multi_reduction <add>, %201, %cst_62 [1] : vector<5x32xf32> to vector<5xf32>
    %203 = vector.shape_cast %202 : vector<5xf32> to vector<5x1xf32>
    %cst_63 = arith.constant 3.200000e+01 : f32
    %204 = vector.broadcast %cst_63 : f32 to vector<5x1xf32>
    %205 = arith.divf %203, %204 : vector<5x1xf32>
    %206 = vector.broadcast %198 : vector<5x1xf32> to vector<5x32xf32>
    %207 = arith.subf %188, %206 : vector<5x32xf32>
    %cst_64 = arith.constant 9.99999997E-7 : f32
    %208 = vector.broadcast %cst_64 : f32 to vector<5x1xf32>
    %209 = arith.addf %205, %208 : vector<5x1xf32>
    %210 = math.rsqrt %209 : vector<5x1xf32>
    %211 = vector.broadcast %210 : vector<5x1xf32> to vector<5x32xf32>
    %212 = arith.mulf %207, %211 : vector<5x32xf32>
    %213 = vector.broadcast %189 : vector<1x32xf32> to vector<5x32xf32>
    %214 = arith.mulf %212, %213 : vector<5x32xf32>
    %215 = vector.broadcast %190 : vector<1x32xf32> to vector<5x32xf32>
    %216 = arith.addf %214, %215 : vector<5x32xf32>
    %c1 = arith.constant 1 : index
    %c0_65 = arith.constant 0 : index
    %c0_66 = arith.constant 0 : index
    %217 = vector.load %arg5[%c1, %c0_65, %c0_66] : memref<2x33x96xf32, #tpu.memory_space<vmem>>, vector<1x33x96xf32>
    %218 = vector.shape_cast %217 : vector<1x33x96xf32> to vector<33x96xf32>
    %219 = vector.extract_strided_slice %218 {offsets = [0, 0], sizes = [32, 96], strides = [1, 1]} : vector<33x96xf32> to vector<32x96xf32>
    %cst_67 = arith.constant dense<0.000000e+00> : vector<5x96xf32>
    %220 = tpu.matmul %216, %219, %cst_67 {dimension_numbers = #tpu.dot_dimension_numbers<[1], [0], [0], [1], [0, 0, 1, 1], [], []>, precision = #tpu.contract_precision<fp32>} : vector<5x32xf32>, vector<32x96xf32>, vector<5x96xf32> -> vector<5x96xf32>
    %221 = vector.extract_strided_slice %218 {offsets = [32, 0], sizes = [1, 96], strides = [1, 1]} : vector<33x96xf32> to vector<1x96xf32>
    %222 = vector.broadcast %221 : vector<1x96xf32> to vector<5x96xf32>
    %223 = arith.addf %220, %222 : vector<5x96xf32>
    %224 = vector.extract_strided_slice %223 {offsets = [0, 0], sizes = [5, 8], strides = [1, 1]} : vector<5x96xf32> to vector<5x8xf32>
    %225 = vector.extract_strided_slice %223 {offsets = [0, 32], sizes = [5, 8], strides = [1, 1]} : vector<5x96xf32> to vector<5x8xf32>
    %226 = vector.extract_strided_slice %223 {offsets = [0, 64], sizes = [5, 8], strides = [1, 1]} : vector<5x96xf32> to vector<5x8xf32>
    "tpu.trace_start"() <{level = 10 : i32, message = "rd,sd->rs"}> : () -> ()
    %cst_68 = arith.constant dense<0.000000e+00> : vector<5x5xf32>
    %227 = tpu.matmul %224, %225, %cst_68 {dimension_numbers = #tpu.dot_dimension_numbers<[1], [1], [0], [0], [0, 0, 1, 0], [], []>, precision = #tpu.contract_precision<fp32>} : vector<5x8xf32>, vector<5x8xf32>, vector<5x5xf32> -> vector<5x5xf32>
    "tpu.trace_stop"() : () -> ()
    %cst_69 = arith.constant dense<0xFF800000> : vector<5xf32>
    %228 = vector.multi_reduction <maximumf>, %227, %cst_69 [1] : vector<5x5xf32> to vector<5xf32>
    %229 = vector.shape_cast %228 : vector<5xf32> to vector<5x1xf32>
    %230 = vector.broadcast %229 : vector<5x1xf32> to vector<5x5xf32>
    %231 = arith.subf %227, %230 : vector<5x5xf32>
    %232 = math.exp %231 : vector<5x5xf32>
    %cst_70 = arith.constant dense<0.000000e+00> : vector<5xf32>
    %233 = vector.multi_reduction <add>, %232, %cst_70 [1] : vector<5x5xf32> to vector<5xf32>
    %234 = vector.shape_cast %233 : vector<5xf32> to vector<5x1xf32>
    %235 = tpu.reciprocal %234 {approx = true} : vector<5x1xf32> -> vector<5x1xf32>
    %236 = vector.broadcast %235 : vector<5x1xf32> to vector<5x5xf32>
    %237 = arith.mulf %232, %236 : vector<5x5xf32>
    %cst_71 = arith.constant dense<0.000000e+00> : vector<5x8xf32>
    %238 = tpu.matmul %237, %226, %cst_71 {dimension_numbers = #tpu.dot_dimension_numbers<[1], [0], [0], [1], [0, 0, 1, 1], [], []>, precision = #tpu.contract_precision<fp32>} : vector<5x5xf32>, vector<5x8xf32>, vector<5x8xf32> -> vector<5x8xf32>
    %239 = vector.extract_strided_slice %223 {offsets = [0, 8], sizes = [5, 8], strides = [1, 1]} : vector<5x96xf32> to vector<5x8xf32>
    %240 = vector.extract_strided_slice %223 {offsets = [0, 40], sizes = [5, 8], strides = [1, 1]} : vector<5x96xf32> to vector<5x8xf32>
    %241 = vector.extract_strided_slice %223 {offsets = [0, 72], sizes = [5, 8], strides = [1, 1]} : vector<5x96xf32> to vector<5x8xf32>
    "tpu.trace_start"() <{level = 10 : i32, message = "rd,sd->rs"}> : () -> ()
    %cst_72 = arith.constant dense<0.000000e+00> : vector<5x5xf32>
    %242 = tpu.matmul %239, %240, %cst_72 {dimension_numbers = #tpu.dot_dimension_numbers<[1], [1], [0], [0], [0, 0, 1, 0], [], []>, precision = #tpu.contract_precision<fp32>} : vector<5x8xf32>, vector<5x8xf32>, vector<5x5xf32> -> vector<5x5xf32>
    "tpu.trace_stop"() : () -> ()
    %cst_73 = arith.constant dense<0xFF800000> : vector<5xf32>
    %243 = vector.multi_reduction <maximumf>, %242, %cst_73 [1] : vector<5x5xf32> to vector<5xf32>
    %244 = vector.shape_cast %243 : vector<5xf32> to vector<5x1xf32>
    %245 = vector.broadcast %244 : vector<5x1xf32> to vector<5x5xf32>
    %246 = arith.subf %242, %245 : vector<5x5xf32>
    %247 = math.exp %246 : vector<5x5xf32>
    %cst_74 = arith.constant dense<0.000000e+00> : vector<5xf32>
    %248 = vector.multi_reduction <add>, %247, %cst_74 [1] : vector<5x5xf32> to vector<5xf32>
    %249 = vector.shape_cast %248 : vector<5xf32> to vector<5x1xf32>
    %250 = tpu.reciprocal %249 {approx = true} : vector<5x1xf32> -> vector<5x1xf32>
    %251 = vector.broadcast %250 : vector<5x1xf32> to vector<5x5xf32>
    %252 = arith.mulf %247, %251 : vector<5x5xf32>
    %cst_75 = arith.constant dense<0.000000e+00> : vector<5x8xf32>
    %253 = tpu.matmul %252, %241, %cst_75 {dimension_numbers = #tpu.dot_dimension_numbers<[1], [0], [0], [1], [0, 0, 1, 1], [], []>, precision = #tpu.contract_precision<fp32>} : vector<5x5xf32>, vector<5x8xf32>, vector<5x8xf32> -> vector<5x8xf32>
    %254 = vector.extract_strided_slice %223 {offsets = [0, 16], sizes = [5, 8], strides = [1, 1]} : vector<5x96xf32> to vector<5x8xf32>
    %255 = vector.extract_strided_slice %223 {offsets = [0, 48], sizes = [5, 8], strides = [1, 1]} : vector<5x96xf32> to vector<5x8xf32>
    %256 = vector.extract_strided_slice %223 {offsets = [0, 80], sizes = [5, 8], strides = [1, 1]} : vector<5x96xf32> to vector<5x8xf32>
    "tpu.trace_start"() <{level = 10 : i32, message = "rd,sd->rs"}> : () -> ()
    %cst_76 = arith.constant dense<0.000000e+00> : vector<5x5xf32>
    %257 = tpu.matmul %254, %255, %cst_76 {dimension_numbers = #tpu.dot_dimension_numbers<[1], [1], [0], [0], [0, 0, 1, 0], [], []>, precision = #tpu.contract_precision<fp32>} : vector<5x8xf32>, vector<5x8xf32>, vector<5x5xf32> -> vector<5x5xf32>
    "tpu.trace_stop"() : () -> ()
    %cst_77 = arith.constant dense<0xFF800000> : vector<5xf32>
    %258 = vector.multi_reduction <maximumf>, %257, %cst_77 [1] : vector<5x5xf32> to vector<5xf32>
    %259 = vector.shape_cast %258 : vector<5xf32> to vector<5x1xf32>
    %260 = vector.broadcast %259 : vector<5x1xf32> to vector<5x5xf32>
    %261 = arith.subf %257, %260 : vector<5x5xf32>
    %262 = math.exp %261 : vector<5x5xf32>
    %cst_78 = arith.constant dense<0.000000e+00> : vector<5xf32>
    %263 = vector.multi_reduction <add>, %262, %cst_78 [1] : vector<5x5xf32> to vector<5xf32>
    %264 = vector.shape_cast %263 : vector<5xf32> to vector<5x1xf32>
    %265 = tpu.reciprocal %264 {approx = true} : vector<5x1xf32> -> vector<5x1xf32>
    %266 = vector.broadcast %265 : vector<5x1xf32> to vector<5x5xf32>
    %267 = arith.mulf %262, %266 : vector<5x5xf32>
    %cst_79 = arith.constant dense<0.000000e+00> : vector<5x8xf32>
    %268 = tpu.matmul %267, %256, %cst_79 {dimension_numbers = #tpu.dot_dimension_numbers<[1], [0], [0], [1], [0, 0, 1, 1], [], []>, precision = #tpu.contract_precision<fp32>} : vector<5x5xf32>, vector<5x8xf32>, vector<5x8xf32> -> vector<5x8xf32>
    %269 = vector.extract_strided_slice %223 {offsets = [0, 24], sizes = [5, 8], strides = [1, 1]} : vector<5x96xf32> to vector<5x8xf32>
    %270 = vector.extract_strided_slice %223 {offsets = [0, 56], sizes = [5, 8], strides = [1, 1]} : vector<5x96xf32> to vector<5x8xf32>
    %271 = vector.extract_strided_slice %223 {offsets = [0, 88], sizes = [5, 8], strides = [1, 1]} : vector<5x96xf32> to vector<5x8xf32>
    "tpu.trace_start"() <{level = 10 : i32, message = "rd,sd->rs"}> : () -> ()
    %cst_80 = arith.constant dense<0.000000e+00> : vector<5x5xf32>
    %272 = tpu.matmul %269, %270, %cst_80 {dimension_numbers = #tpu.dot_dimension_numbers<[1], [1], [0], [0], [0, 0, 1, 0], [], []>, precision = #tpu.contract_precision<fp32>} : vector<5x8xf32>, vector<5x8xf32>, vector<5x5xf32> -> vector<5x5xf32>
    "tpu.trace_stop"() : () -> ()
    %cst_81 = arith.constant dense<0xFF800000> : vector<5xf32>
    %273 = vector.multi_reduction <maximumf>, %272, %cst_81 [1] : vector<5x5xf32> to vector<5xf32>
    %274 = vector.shape_cast %273 : vector<5xf32> to vector<5x1xf32>
    %275 = vector.broadcast %274 : vector<5x1xf32> to vector<5x5xf32>
    %276 = arith.subf %272, %275 : vector<5x5xf32>
    %277 = math.exp %276 : vector<5x5xf32>
    %cst_82 = arith.constant dense<0.000000e+00> : vector<5xf32>
    %278 = vector.multi_reduction <add>, %277, %cst_82 [1] : vector<5x5xf32> to vector<5xf32>
    %279 = vector.shape_cast %278 : vector<5xf32> to vector<5x1xf32>
    %280 = tpu.reciprocal %279 {approx = true} : vector<5x1xf32> -> vector<5x1xf32>
    %281 = vector.broadcast %280 : vector<5x1xf32> to vector<5x5xf32>
    %282 = arith.mulf %277, %281 : vector<5x5xf32>
    %cst_83 = arith.constant dense<0.000000e+00> : vector<5x8xf32>
    %283 = tpu.matmul %282, %271, %cst_83 {dimension_numbers = #tpu.dot_dimension_numbers<[1], [0], [0], [1], [0, 0, 1, 1], [], []>, precision = #tpu.contract_precision<fp32>} : vector<5x5xf32>, vector<5x8xf32>, vector<5x8xf32> -> vector<5x8xf32>
    %284 = tpu.concatenate %238, %253, %268, %283 in 1 : vector<5x8xf32>, vector<5x8xf32>, vector<5x8xf32>, vector<5x8xf32> -> vector<5x32xf32>
    %c1_84 = arith.constant 1 : index
    %c0_85 = arith.constant 0 : index
    %c0_86 = arith.constant 0 : index
    %285 = vector.load %arg6[%c1_84, %c0_85, %c0_86] : memref<2x32x32xf32, #tpu.memory_space<vmem>>, vector<1x32x32xf32>
    %286 = vector.shape_cast %285 : vector<1x32x32xf32> to vector<32x32xf32>
    %cst_87 = arith.constant dense<0.000000e+00> : vector<5x32xf32>
    %287 = tpu.matmul %284, %286, %cst_87 {dimension_numbers = #tpu.dot_dimension_numbers<[1], [0], [0], [1], [0, 0, 1, 1], [], []>, precision = #tpu.contract_precision<fp32>} : vector<5x32xf32>, vector<32x32xf32>, vector<5x32xf32> -> vector<5x32xf32>
    %288 = arith.addf %188, %287 : vector<5x32xf32>
    %289 = vector.broadcast %193 : vector<1x32xf32> to vector<5x32xf32>
    %290 = arith.addf %288, %289 : vector<5x32xf32>
    %cst_88 = arith.constant dense<0.000000e+00> : vector<5xf32>
    %291 = vector.multi_reduction <add>, %290, %cst_88 [1] : vector<5x32xf32> to vector<5xf32>
    %292 = vector.shape_cast %291 : vector<5xf32> to vector<5x1xf32>
    %cst_89 = arith.constant 3.200000e+01 : f32
    %293 = vector.broadcast %cst_89 : f32 to vector<5x1xf32>
    %294 = arith.divf %292, %293 : vector<5x1xf32>
    %295 = vector.broadcast %294 : vector<5x1xf32> to vector<5x32xf32>
    %296 = arith.subf %290, %295 : vector<5x32xf32>
    %297 = arith.mulf %296, %296 : vector<5x32xf32>
    %cst_90 = arith.constant dense<0.000000e+00> : vector<5xf32>
    %298 = vector.multi_reduction <add>, %297, %cst_90 [1] : vector<5x32xf32> to vector<5xf32>
    %299 = vector.shape_cast %298 : vector<5xf32> to vector<5x1xf32>
    %cst_91 = arith.constant 3.200000e+01 : f32
    %300 = vector.broadcast %cst_91 : f32 to vector<5x1xf32>
    %301 = arith.divf %299, %300 : vector<5x1xf32>
    %302 = vector.broadcast %294 : vector<5x1xf32> to vector<5x32xf32>
    %303 = arith.subf %290, %302 : vector<5x32xf32>
    %cst_92 = arith.constant 9.99999997E-7 : f32
    %304 = vector.broadcast %cst_92 : f32 to vector<5x1xf32>
    %305 = arith.addf %301, %304 : vector<5x1xf32>
    %306 = math.rsqrt %305 : vector<5x1xf32>
    %307 = vector.broadcast %306 : vector<5x1xf32> to vector<5x32xf32>
    %308 = arith.mulf %303, %307 : vector<5x32xf32>
    %309 = vector.broadcast %191 : vector<1x32xf32> to vector<5x32xf32>
    %310 = arith.mulf %308, %309 : vector<5x32xf32>
    %311 = vector.broadcast %192 : vector<1x32xf32> to vector<5x32xf32>
    %312 = arith.addf %310, %311 : vector<5x32xf32>
    %c1_93 = arith.constant 1 : index
    %c0_94 = arith.constant 0 : index
    %c0_95 = arith.constant 0 : index
    %313 = vector.load %arg7[%c1_93, %c0_94, %c0_95] : memref<2x33x128xf32, #tpu.memory_space<vmem>>, vector<1x33x128xf32>
    %314 = vector.shape_cast %313 : vector<1x33x128xf32> to vector<33x128xf32>
    %315 = vector.extract_strided_slice %314 {offsets = [0, 0], sizes = [32, 128], strides = [1, 1]} : vector<33x128xf32> to vector<32x128xf32>
    %cst_96 = arith.constant dense<0.000000e+00> : vector<5x128xf32>
    %316 = tpu.matmul %312, %315, %cst_96 {dimension_numbers = #tpu.dot_dimension_numbers<[1], [0], [0], [1], [0, 0, 1, 1], [], []>, precision = #tpu.contract_precision<fp32>} : vector<5x32xf32>, vector<32x128xf32>, vector<5x128xf32> -> vector<5x128xf32>
    %317 = vector.extract_strided_slice %314 {offsets = [32, 0], sizes = [1, 128], strides = [1, 1]} : vector<33x128xf32> to vector<1x128xf32>
    %318 = vector.broadcast %317 : vector<1x128xf32> to vector<5x128xf32>
    %319 = arith.addf %316, %318 : vector<5x128xf32>
    %cst_97 = arith.constant 5.000000e-01 : f32
    %320 = vector.broadcast %cst_97 : f32 to vector<5x128xf32>
    %321 = arith.mulf %320, %319 : vector<5x128xf32>
    %cst_98 = arith.constant 4.471500e-02 : f32
    %322 = vector.broadcast %cst_98 : f32 to vector<5x128xf32>
    %323 = arith.mulf %322, %319 : vector<5x128xf32>
    %324 = arith.mulf %323, %319 : vector<5x128xf32>
    %325 = arith.mulf %324, %319 : vector<5x128xf32>
    %326 = arith.addf %319, %325 : vector<5x128xf32>
    %cst_99 = arith.constant 0.797884583 : f32
    %327 = vector.broadcast %cst_99 : f32 to vector<5x128xf32>
    %328 = arith.mulf %327, %326 : vector<5x128xf32>
    %329 = math.tanh %328 : vector<5x128xf32>
    %cst_100 = arith.constant 1.000000e+00 : f32
    %330 = vector.broadcast %cst_100 : f32 to vector<5x128xf32>
    %331 = arith.addf %330, %329 : vector<5x128xf32>
    %332 = arith.mulf %321, %331 : vector<5x128xf32>
    %c1_101 = arith.constant 1 : index
    %c0_102 = arith.constant 0 : index
    %c0_103 = arith.constant 0 : index
    %333 = vector.load %arg8[%c1_101, %c0_102, %c0_103] : memref<2x128x32xf32, #tpu.memory_space<vmem>>, vector<1x128x32xf32>
    %334 = vector.shape_cast %333 : vector<1x128x32xf32> to vector<128x32xf32>
    %cst_104 = arith.constant dense<0.000000e+00> : vector<5x32xf32>
    %335 = tpu.matmul %332, %334, %cst_104 {dimension_numbers = #tpu.dot_dimension_numbers<[1], [0], [0], [1], [0, 0, 1, 1], [], []>, precision = #tpu.contract_precision<fp32>} : vector<5x128xf32>, vector<128x32xf32>, vector<5x32xf32> -> vector<5x32xf32>
    %336 = arith.addf %290, %335 : vector<5x32xf32>
    %337 = vector.broadcast %194 : vector<1x32xf32> to vector<5x32xf32>
    %338 = arith.addf %336, %337 : vector<5x32xf32>
    %339 = vector.extract_strided_slice %338 {offsets = [0, 0], sizes = [1, 32], strides = [1, 1]} : vector<5x32xf32> to vector<1x32xf32>
    %340 = vector.extract_strided_slice %0 {offsets = [15, 0], sizes = [1, 32], strides = [1, 1]} : vector<17x32xf32> to vector<1x32xf32>
    %341 = vector.extract_strided_slice %0 {offsets = [16, 0], sizes = [1, 32], strides = [1, 1]} : vector<17x32xf32> to vector<1x32xf32>
    %cst_105 = arith.constant dense<0.000000e+00> : vector<1xf32>
    %342 = vector.multi_reduction <add>, %339, %cst_105 [1] : vector<1x32xf32> to vector<1xf32>
    %343 = vector.shape_cast %342 : vector<1xf32> to vector<1x1xf32>
    %cst_106 = arith.constant 3.200000e+01 : f32
    %344 = vector.broadcast %cst_106 : f32 to vector<1x1xf32>
    %345 = arith.divf %343, %344 : vector<1x1xf32>
    %346 = vector.broadcast %345 : vector<1x1xf32> to vector<1x32xf32>
    %347 = arith.subf %339, %346 : vector<1x32xf32>
    %348 = arith.mulf %347, %347 : vector<1x32xf32>
    %cst_107 = arith.constant dense<0.000000e+00> : vector<1xf32>
    %349 = vector.multi_reduction <add>, %348, %cst_107 [1] : vector<1x32xf32> to vector<1xf32>
    %350 = vector.shape_cast %349 : vector<1xf32> to vector<1x1xf32>
    %cst_108 = arith.constant 3.200000e+01 : f32
    %351 = vector.broadcast %cst_108 : f32 to vector<1x1xf32>
    %352 = arith.divf %350, %351 : vector<1x1xf32>
    %353 = vector.broadcast %345 : vector<1x1xf32> to vector<1x32xf32>
    %354 = arith.subf %339, %353 : vector<1x32xf32>
    %cst_109 = arith.constant 9.99999997E-7 : f32
    %355 = vector.broadcast %cst_109 : f32 to vector<1x1xf32>
    %356 = arith.addf %352, %355 : vector<1x1xf32>
    %357 = math.rsqrt %356 : vector<1x1xf32>
    %358 = vector.broadcast %357 : vector<1x1xf32> to vector<1x32xf32>
    %359 = arith.mulf %354, %358 : vector<1x32xf32>
    %360 = arith.mulf %359, %340 : vector<1x32xf32>
    %361 = arith.addf %360, %341 : vector<1x32xf32>
    %c0_110 = arith.constant 0 : index
    %c0_111 = arith.constant 0 : index
    %362 = vector.load %arg9[%c0_110, %c0_111] : memref<33x128xf32, #tpu.memory_space<vmem>>, vector<33x128xf32>
    %363 = vector.extract_strided_slice %362 {offsets = [0, 0], sizes = [32, 128], strides = [1, 1]} : vector<33x128xf32> to vector<32x128xf32>
    %cst_112 = arith.constant dense<0.000000e+00> : vector<1x128xf32>
    %364 = tpu.matmul %361, %363, %cst_112 {dimension_numbers = #tpu.dot_dimension_numbers<[1], [0], [0], [1], [0, 0, 1, 1], [], []>, precision = #tpu.contract_precision<fp32>} : vector<1x32xf32>, vector<32x128xf32>, vector<1x128xf32> -> vector<1x128xf32>
    %365 = vector.extract_strided_slice %362 {offsets = [32, 0], sizes = [1, 128], strides = [1, 1]} : vector<33x128xf32> to vector<1x128xf32>
    %366 = arith.addf %364, %365 : vector<1x128xf32>
    %367 = vector.shape_cast %366 : vector<1x128xf32> to vector<1x1x128xf32>
    %368 = vector.shape_cast %367 : vector<1x1x128xf32> to vector<1x1x128xf32>
    %369 = vector.broadcast %368 : vector<1x1x128xf32> to vector<1x8x128xf32>
    %c0_113 = arith.constant 0 : index
    %c0_114 = arith.constant 0 : index
    %c0_115 = arith.constant 0 : index
    %370 = vector.load %arg10[%c0_113, %c0_114, %c0_115] : memref<1x8x128xf32, #tpu.memory_space<vmem>>, vector<1x8x128xf32>
    tpu.vector_store %arg10[%c0_113, %c0_114, %c0_115], %369 {strides = array<i32>} : memref<1x8x128xf32, #tpu.memory_space<vmem>>, vector<1x8x128xf32>,
    return
  }
  func.func @transform_0(%arg0: i32) -> (i32, i32, i32) {
    %c0_i32 = arith.constant 0 : i32
    %c0_i32_0 = arith.constant 0 : i32
    %c0_i32_1 = arith.constant 0 : i32
    return %arg0, %c0_i32, %c0_i32_0 : i32, i32, i32
  }
  func.func @transform_1(%arg0: i32) -> (i32, i32) {
    %c0_i32 = arith.constant 0 : i32
    %c0_i32_0 = arith.constant 0 : i32
    %c0_i32_1 = arith.constant 0 : i32
    return %c0_i32, %c0_i32_0 : i32, i32
  }
  func.func @transform_2(%arg0: i32) -> (i32, i32) {
    %c0_i32 = arith.constant 0 : i32
    %c0_i32_0 = arith.constant 0 : i32
    %c0_i32_1 = arith.constant 0 : i32
    return %c0_i32, %c0_i32_0 : i32, i32
  }
  func.func @transform_3(%arg0: i32) -> (i32, i32) {
    %c0_i32 = arith.constant 0 : i32
    %c0_i32_0 = arith.constant 0 : i32
    %c0_i32_1 = arith.constant 0 : i32
    return %c0_i32, %c0_i32_0 : i32, i32
  }
  func.func @transform_4(%arg0: i32) -> (i32, i32, i32) {
    %c0_i32 = arith.constant 0 : i32
    %c0_i32_0 = arith.constant 0 : i32
    %c0_i32_1 = arith.constant 0 : i32
    %c0_i32_2 = arith.constant 0 : i32
    return %c0_i32, %c0_i32_0, %c0_i32_1 : i32, i32, i32
  }
  func.func @transform_5(%arg0: i32) -> (i32, i32, i32) {
    %c0_i32 = arith.constant 0 : i32
    %c0_i32_0 = arith.constant 0 : i32
    %c0_i32_1 = arith.constant 0 : i32
    %c0_i32_2 = arith.constant 0 : i32
    return %c0_i32, %c0_i32_0, %c0_i32_1 : i32, i32, i32
  }
  func.func @transform_6(%arg0: i32) -> (i32, i32, i32) {
    %c0_i32 = arith.constant 0 : i32
    %c0_i32_0 = arith.constant 0 : i32
    %c0_i32_1 = arith.constant 0 : i32
    %c0_i32_2 = arith.constant 0 : i32
    return %c0_i32, %c0_i32_0, %c0_i32_1 : i32, i32, i32
  }
  func.func @transform_7(%arg0: i32) -> (i32, i32, i32) {
    %c0_i32 = arith.constant 0 : i32
    %c0_i32_0 = arith.constant 0 : i32
    %c0_i32_1 = arith.constant 0 : i32
    %c0_i32_2 = arith.constant 0 : i32
    return %c0_i32, %c0_i32_0, %c0_i32_1 : i32, i32, i32
  }
  func.func @transform_8(%arg0: i32) -> (i32, i32) {
    %c0_i32 = arith.constant 0 : i32
    %c0_i32_0 = arith.constant 0 : i32
    %c0_i32_1 = arith.constant 0 : i32
    return %c0_i32, %c0_i32_0 : i32, i32
  }
  func.func @transform_9(%arg0: i32) -> (i32, i32, i32) {
    %c0_i32 = arith.constant 0 : i32
    %c0_i32_0 = arith.constant 0 : i32
    %c0_i32_1 = arith.constant 0 : i32
    return %arg0, %c0_i32, %c0_i32_0 : i32, i32, i32
  }
}

</mosaic_0001>

<bundles_post_ra>
// kernel: forward.1
= control target key start
LH: loop header
LB: loop body
LE: loop exit
PB: predicated region body
PF: predicated region fallthrough
CT: control target
= control target key end

     0   :  { %s16010_s30 = smov 0   ;;  %s18850_s0 = inlined_call_operand.vmem [shape: f32[2,5,256], index: 0, kind: input, shape index: {}]   ;;  %s18851_s1 = inlined_call_operand.vmem [shape: f32[256,32], index: 1, kind: input, shape index: {}]   ;;  %s18852_s2 = inlined_call_operand.vmem [shape: f32[5,32], index: 2, kind: input, shape index: {}]   ;;  %s18853_s3 = inlined_call_operand.vmem [shape: f32[17,32], index: 3, kind: input, shape index: {}]   ;;  %s18854_s4 = inlined_call_operand.vmem [shape: f32[2,33,96], index: 4, kind: input, shape index: {}]   ;;  %s18855_s5 = inlined_call_operand.vmem [shape: f32[2,32,32], index: 5, kind: input, shape index: {}]   ;;  %s18856_s6 = inlined_call_operand.vmem [shape: f32[2,33,128], index: 6, kind: input, shape index: {}]   ;;  %s18857_s7 = inlined_call_operand.vmem [shape: f32[2,128,32], index: 7, kind: input, shape index: {}]   ;;  %s18858_s8 = inlined_call_operand.vmem [shape: f32[33,128], index: 8, kind: input, shape index: {}]   ;;  %s18859_s9 = inlined_call_operand.vmem [shape: f32[2,8,128], index: 9, kind: output, shape index: {}]  }
   0x1 LB: > { %s13638_s10 = sadd.s32 4294967295, %s15942_s30   ;;  %p13642_p0 = scmp.ge.s32.totalorder %s15942_s30, 1  ;;  %s15942_s30 = sphi %s16010_s30, %s19_s30  }
   0x2   : > { %p287_p1 = scmp.lt.s32.totalorder %s15942_s30, 3 }
   0x4   : > { %p288_p2 = pnand %p13642_p0, %p287_p1 }
   0x6   : > { %291 = sbr.rel (%p288_p2) target bundleno = 9574 (0x2566), region = 56 }
   0xb   : > { %v367_v0 = vld [vmem:[%s18851_s1 + $0xf8] sm:$0xff]  ;;  %v366_v2 = vld [vmem:[%s18851_s1 + $0xf0] sm:$0xff]  ;;  %v365_v7 = vld [vmem:[%s18851_s1 + $0xe8] sm:$0xff]  ;;  %p16240_p3 = scmp.lt.s32.totalorder %s13638_s10, 1  ;;  %vm1234_vm0 = vcmask 258048   ;;  %vm15945_vm2 = vmmov 0  }
   0xc   : > { %v351_v1 = vld [vmem:[%s18851_s1 + $0x78] sm:$0xff]  ;;  %v16027_v3 = vand.u32 4294901760, %v367_v0  ;;  %v16031_v5 = vand.u32 4294901760, %v366_v2  ;;  %v350_v6 = vld [vmem:[%s18851_s1 + $0x70] sm:$0xff]  ;;  %v349_v8 = vld [vmem:[%s18851_s1 + $0x68] sm:$0xff]  ;;  %v16044_v10 = vand.u32 4294901760, %v365_v7 }
   0xd   : > { %v16029_v4 = vand.u32 4294901760, %v351_v1  ;;  %v16042_v9 = vand.u32 4294901760, %v350_v6  ;;  %v16046_v11 = vand.u32 4294901760, %v349_v8  ;;  %v364_v12 = vld [vmem:[%s18851_s1 + $0xe0] sm:$0xff]  ;;  %v363_v14 = vld [vmem:[%s18851_s1 + $0xd8] sm:$0xff]  ;;  %v16075_v20 = vld [vmem:[%s18851_s1 + $0xd0] sm:$0xff] }
   0xe   : > { %v348_v13 = vld [vmem:[%s18851_s1 + $0x60] sm:$0xff]  ;;  %13683 = vmatprep.subr.mxu0 %v16027_v3  ;;  %v16058_v15 = vand.u32 4294901760, %v364_v12  ;;  %v16062_v17 = vand.u32 4294901760, %v363_v14  ;;  %v16065_v18 = vsub.f32 %v367_v0, %v16027_v3  ;;  %v16070_v19 = vld [vmem:[%s18851_s1 + $0x58] sm:$0xff]  ;;  %v16080_v21 = vld [vmem:[%s18851_s1 + $0x50] sm:$0xff]  ;;  %v16090_v24 = vand.u32 4294901760, %v16075_v20 }
   0xf   : > { %v16060_v16 = vand.u32 4294901760, %v348_v13  ;;  %13684 = vmatpush3.msra.mxu0 %v16029_v4  ;;  %v16084_v22 = vand.u32 4294901760, %v16070_v19  ;;  %v16087_v23 = vsub.f32 %v351_v1, %v16029_v4  ;;  %v16093_v25 = vsub.f32 %v366_v2, %v16031_v5  ;;  %v16098_v26 = vld [vmem:[%s18851_s1 + $0xc8] sm:$0xff]  ;;  %v16108_v28 = vld [vmem:[%s18851_s1 + $0xc0] sm:$0xff]  ;;  %v16160_v46 = vld [vmem:[%s18851_s1 + $0xb8] sm:$0xff]  ;;  %s19092_s10 = smov (!%p16240_p3, %s13638_s10), 1 }
  0x10   : > { %18963 = vst [vmem:[#allocation2_spill] sm:$0xff] %v16090_v24  ;;  %v16103_v27 = vld [vmem:[%s18851_s1 + $0x48] sm:$0xff]  ;;  %13685 = vmatprep.subr.mxu0 %v16031_v5  ;;  %v18873_v29 = vand.u32 4294901760, %v16065_v18  ;;  %v16113_v30 = vand.u32 4294901760, %v16080_v21  ;;  %v16116_v31 = vsub.f32 %v350_v6, %v16042_v9  ;;  %v16119_v32 = vand.u32 4294901760, %v16098_v26  ;;  %v16133_v37 = vld [vmem:[%s18851_s1 + $0x40] sm:$0xff] }
  0x11   : > { %13686 = vmatpush3.msra.mxu0 %v16042_v9  ;;  %v18872_v33 = vand.u32 4294901760, %v16087_v23  ;;  %v18870_v34 = vand.u32 4294901760, %v16093_v25  ;;  %v16125_v35 = vsub.f32 %v365_v7, %v16044_v10  ;;  %v16128_v36 = vand.u32 4294901760, %v16103_v27  ;;  %v16173_v51 = vld [vmem:[%s18851_s1 + $0x38] sm:$0xff]  ;;  %v16183_v56 = vld [vmem:[%s18851_s1 + $0xb0] sm:$0xff]  ;;  %v16213_v2 = vld [vmem:[%s18851_s1 + $0xa8] sm:$0xff] }
  0x12   : > { %18964 = vst [vmem:[#allocation3_spill] sm:$0xff] %v16113_v30  ;;  %18965 = vst [vmem:[#allocation4_spill] sm:$0xff] %v16119_v32  ;;  %13687 = vmatprep.subr.mxu0 %v16044_v10  ;;  %v600_v38 = vsub.f32 %v16065_v18, %v18873_v29  ;;  %v18869_v39 = vand.u32 4294901760, %v16116_v31  ;;  %v16141_v40 = vsub.f32 %v349_v8, %v16046_v11  ;;  %v16144_v41 = vand.u32 4294901760, %v16108_v28  ;;  %v16198_v61 = vld [vmem:[%s18851_s1 + $0x30] sm:$0xff]  ;;  %s13682_s13 = sshll.u32 %s19092_s10, 4 }
  0x13   : > { %18966 = vst [vmem:[#allocation5_spill] sm:$0xff] %v16128_v36  ;;  %13688 = vmatpush3.msra.mxu0 %v16046_v11  ;;  %v488_v42 = vsub.f32 %v16087_v23, %v18872_v33  ;;  %v607_v43 = vsub.f32 %v16093_v25, %v18870_v34  ;;  %v18867_v44 = vand.u32 4294901760, %v16125_v35  ;;  %v16155_v45 = vsub.f32 %v364_v12, %v16058_v15  ;;  %v16361_v33 = vld [vmem:[%s18851_s1 + $0x88] sm:$0xff]  ;;  %s326_s20 = scalar_lea.vmem %s18850_s0, %s13682_s13  ;;  %s15946_s18 = smov 96  }
  0x14   : > { %18967 = vst [vmem:[#allocation6_spill] sm:$0xff] %v16144_v41  ;;  %13689 = vmatprep.subr.mxu0 %v16058_v15  ;;  %v601_v47 = vand.u32 4294901760, %v600_v38  ;;  %v495_v48 = vsub.f32 %v16116_v31, %v18869_v39  ;;  %v18865_v49 = vand.u32 4294901760, %v16141_v40  ;;  %v16168_v50 = vand.u32 4294901760, %v16133_v37  ;;  %s15947_s19 = smov 88   ;;  %s15949_s21 = smov 120  }
  0x15   : > { %13690 = vmatpush3.msra.mxu0 %v16060_v16  ;;  %v489_v52 = vand.u32 4294901760, %v488_v42  ;;  %v608_v53 = vand.u32 4294901760, %v607_v43  ;;  %v614_v54 = vsub.f32 %v16125_v35, %v18867_v44  ;;  %v18864_v55 = vand.u32 4294901760, %v16155_v45  ;;  %v16334_v44 = vld [vmem:[%s18851_s1 + $0x90] sm:$0xff]  ;;  %s15950_s22 = smov 56   ;;  %s15951_s23 = smov 112  }
  0x16   : > { %18968 = vst [vmem:[#allocation7_spill] sm:$0xff] %v16168_v50  ;;  %13691 = vmatprep.subr.mxu0 %v16062_v17  ;;  %13718 = vmatprep.subr.mxu1 %v601_v47  ;;  %v496_v57 = vand.u32 4294901760, %v495_v48  ;;  %v502_v58 = vsub.f32 %v16141_v40, %v18865_v49  ;;  %v16190_v59 = vsub.f32 %v348_v13, %v16060_v16  ;;  %v16193_v60 = vand.u32 4294901760, %v16160_v46  ;;  %v16227_v13 = vld [vmem:[%s18851_s1 + $0x28] sm:$0xff]  ;;  %v16318_v49 = vld [vmem:[%s18851_s1 + $0x18] sm:$0xff]  ;;  %s15952_s24 = smov 80  }
  0x17   : > { %13692 = vmatpush3.msra.mxu0 %v16084_v22  ;;  %13719 = vmatpush3.msra.mxu1 %v489_v52  ;;  %v615_v62 = vand.u32 4294901760, %v614_v54  ;;  %v621_v63 = vsub.f32 %v16155_v45, %v18864_v55  ;;  %v16205_v0 = vsub.f32 %v363_v14, %v16062_v17  ;;  %v16208_v1 = vand.u32 4294901760, %v16173_v51  ;;  %v16259_v52 = vld [vmem:[%s18851_s1 + $0xa0] sm:$0xff]  ;;  %s15953_s25 = smov 72   ;;  %s15954_s26 = smov 104  }
  0x18   : > { %18969 = vst [vmem:[#allocation8_spill] sm:$0xff] %v16193_v60  ;;  %13693 = vmatprep.subr.mxu0 %v16090_v24  ;;  %13720 = vmatprep.subr.mxu1 %v608_v53  ;;  %v503_v6 = vand.u32 4294901760, %v502_v58  ;;  %v18863_v7 = vand.u32 4294901760, %v16190_v59  ;;  %v16219_v8 = vsub.f32 %v16070_v19, %v16084_v22  ;;  %v16222_v12 = vand.u32 4294901760, %v16183_v56  ;;  %s15955_s27 = smov 48   ;;  %s15956_s28 = smov 40  }
  0x19   : > { %18970 = vst [vmem:[#allocation9_spill] sm:$0xff] %v16208_v1  ;;  %13694 = vmatpush3.msra.mxu0 %v16113_v30  ;;  %13721 = vmatpush3.msra.mxu1 %v496_v57  ;;  %v622_v14 = vand.u32 4294901760, %v621_v63  ;;  %v18860_v38 = vand.u32 4294901760, %v16205_v0  ;;  %v16233_v42 = vsub.f32 %v16075_v20, %v16090_v24  ;;  %v16236_v19 = vand.u32 4294901760, %v16198_v61  ;;  %s18931_s29 = smov 16   ;;  %s18930_s11 = smov 8  }
  0x1a   : > { %18971 = vst [vmem:[#allocation10_spill] sm:$0xff] %v16222_v12  ;;  %13695 = vmatprep.subr.mxu0 %v16119_v32  ;;  %13722 = vmatprep.subr.mxu1 %v615_v62  ;;  %v509_v43 = vsub.f32 %v16190_v59, %v18863_v7  ;;  %v18861_v47 = vand.u32 4294901760, %v16219_v8  ;;  %v16251_v20 = vsub.f32 %v16080_v21, %v16113_v30  ;;  %v16254_v48 = vand.u32 4294901760, %v16213_v2  ;;  %s18929_s14 = smov 24   ;;  %s13645_s16 = sshll.u32 %s19092_s10, 3 }
  0x1b   : > { %18972 = vst [vmem:[#allocation11_spill] sm:$0xff] %v16236_v19  ;;  %13696 = vmatpush3.msra.mxu0 %v16128_v36  ;;  %13723 = vmatpush3.msra.mxu1 %v503_v6  ;;  %v628_v53 = vsub.f32 %v16205_v0, %v18860_v38  ;;  %v18862_v54 = vand.u32 4294901760, %v16233_v42  ;;  %v16268_v21 = vsub.f32 %v16098_v26, %v16119_v32  ;;  %v16271_v57 = vand.u32 4294901760, %v16227_v13  ;;  %v16285_v26 = vld [vmem:[%s18851_s1 + $0x20] sm:$0xff] }
  0x1c   : > { %18974 = vst [vmem:[#allocation12_spill] sm:$0xff] %v16254_v48  ;;  %13697 = vmatprep.subr.mxu0 %v16144_v41  ;;  %13724 = vmatprep.subr.mxu1 %v622_v14  ;;  %v510_v58 = vand.u32 4294901760, %v509_v43  ;;  %v516_v62 = vsub.f32 %v16219_v8, %v18861_v47  ;;  %v18866_v63 = vand.u32 4294901760, %v16251_v20  ;;  %v16280_v6 = vsub.f32 %v16103_v27, %v16128_v36  ;;  %v16298_v27 = vld [vmem:[%s18851_s1 + $0x98] sm:$0xff] }
  0x1d   : > { %18975 = vst [vmem:[#allocation13_spill] sm:$0xff] %v16271_v57  ;;  %13698 = vmatpush3.msra.mxu0 %v16168_v50  ;;  %v629_v38 = vand.u32 4294901760, %v628_v53  ;;  %v635_v14 = vsub.f32 %v16233_v42, %v18862_v54  ;;  %v18868_v43 = vand.u32 4294901760, %v16268_v21  ;;  %v16293_v47 = vand.u32 4294901760, %v16259_v52 }
  0x1e   : > { %13725 = vmatpush3.msra.mxu1 %v510_v58  ;;  %13699 = vmatprep.subr.mxu0 %v16193_v60  ;;  %v517_v53 = vand.u32 4294901760, %v516_v62  ;;  %v523_v54 = vsub.f32 %v16251_v20, %v18866_v63  ;;  %v18871_v7 = vand.u32 4294901760, %v16280_v6  ;;  %v16313_v55 = vsub.f32 %v16108_v28, %v16144_v41 }
  0x1f   : > { %18976 = vst [vmem:[#allocation14_spill] sm:$0xff] %v16293_v47  ;;  %13726 = vmatprep.subr.mxu1 %v629_v38  ;;  %13700 = vmatpush3.msra.mxu0 %v16208_v1  ;;  %v636_v58 = vand.u32 4294901760, %v635_v14  ;;  %v642_v62 = vsub.f32 %v16268_v21, %v18868_v43  ;;  %v16325_v63 = vand.u32 4294901760, %v16285_v26  ;;  %v16329_v28 = vsub.f32 %v16133_v37, %v16168_v50  ;;  %v16347_v37 = vld [vmem:[%s18851_s1 + $0x10] sm:$0xff] }
  0x20   : > { %13727 = vmatpush3.msra.mxu1 %v517_v53  ;;  %13701 = vmatprep.subr.mxu0 %v16222_v12  ;;  %v524_v38 = vand.u32 4294901760, %v523_v54  ;;  %v530_v14 = vsub.f32 %v16280_v6, %v18871_v7  ;;  %v18876_v43 = vand.u32 4294901760, %v16313_v55  ;;  %v16342_v39 = vand.u32 4294901760, %v16298_v27 }
  0x21   : > { %18977 = vst [vmem:[#allocation15_spill] sm:$0xff] %v16325_v63  ;;  %13728 = vmatprep.subr.mxu1 %v636_v58  ;;  %13702 = vmatpush3.msra.mxu0 %v16236_v19  ;;  %v643_v53 = vand.u32 4294901760, %v642_v62  ;;  %v18877_v54 = vand.u32 4294901760, %v16329_v28  ;;  %v16353_v34 = vsub.f32 %v16160_v46, %v16193_v60  ;;  %v16356_v7 = vand.u32 4294901760, %v16318_v49 }
  0x22   : > { %13729 = vmatpush3.msra.mxu1 %v524_v38  ;;  %13703 = vmatprep.subr.mxu0 %v16254_v48  ;;  %v531_v58 = vand.u32 4294901760, %v530_v14  ;;  %v649_v62 = vsub.f32 %v16313_v55, %v18876_v43  ;;  %v16370_v46 = vsub.f32 %v16173_v51, %v16208_v1  ;;  %v16373_v29 = vand.u32 4294901760, %v16334_v44  ;;  %v16390_v51 = vld [vmem:[%s18851_s1 + $0x8] sm:$0xff] }
  0x23   : > { %18978 = vst [vmem:[#allocation16_spill] sm:$0xff] %v16356_v7  ;;  %13730 = vmatprep.subr.mxu1 %v643_v53  ;;  %13704 = vmatpush3.msra.mxu0 %v16271_v57  ;;  %v537_v38 = vsub.f32 %v16329_v28, %v18877_v54  ;;  %v16382_v60 = vsub.f32 %v16183_v56, %v16222_v12  ;;  %v16385_v43 = vand.u32 4294901760, %v16347_v37  ;;  %v16399_v56 = vand.u32 4294901760, %v16361_v33  ;;  %v16404_v12 = vld [vmem:[%s18851_s1 + $0x80] sm:$0xff] }
  0x24   : > { %18979 = vst [vmem:[#allocation17_spill] sm:$0xff] %v16373_v29  ;;  %13731 = vmatpush3.msra.mxu1 %v531_v58  ;;  %13705 = vmatprep.subr.mxu0 %v16293_v47  ;;  %v650_v53 = vand.u32 4294901760, %v649_v62  ;;  %v16396_v14 = vsub.f32 %v16198_v61, %v16236_v19  ;;  %v18982_v62 = vand.u32 4294901760, %v16353_v34  ;;  %v16416_v19 = vsub.f32 %v16213_v2, %v16254_v48  ;;  %v16433_v2 = vld [vmem:[%s18851_s1] sm:$0xff] }
  0x25   : > { %18980 = vst [vmem:[#allocation18_spill] sm:$0xff] %v16385_v43  ;;  %18981 = vst [vmem:[#allocation19_spill] sm:$0xff] %v16399_v56  ;;  %13706 = vmatpush3.msra.mxu0 %v16325_v63  ;;  %v538_v58 = vand.u32 4294901760, %v537_v38  ;;  %v18896_v54 = vand.u32 4294901760, %v16382_v60  ;;  %v18984_v1 = vand.u32 4294901760, %v16370_v46  ;;  %v16424_v38 = vand.u32 4294901760, %v16390_v51 }
  0x26   : > { %v656_v61 = vsub.f32 %v16353_v34, %v18982_v62  ;;  %18983 = vst [vmem:[#allocation20_spill] sm:$0xff] %v16416_v19  ;;  %13732 = vmatprep.subr.mxu1 %v650_v53  ;;  %13707 = vmatprep.subr.mxu0 %v16342_v39  ;;  %v16428_v62 = vsub.f32 %v16227_v13, %v16271_v57  ;;  %v16441_v48 = vand.u32 4294901760, %v16404_v12  ;;  %v335_v13 = vld [vmem:[%s326_s20 + $0x8] sm:$0x1f]  ;;  %v18985_v36 = vand.u32 4294901760, %v16396_v14 }
  0x27   : > { %v544_v50 = vsub.f32 %v16370_v46, %v18984_v1  ;;  %13733 = vmatpush3.msra.mxu1 %v538_v58  ;;  %13708 = vmatpush3.msra.mxu0 %v16356_v7  ;;  %v663_v1 = vsub.f32 %v16382_v60, %v18896_v54  ;;  %v16450_v32 = vsub.f32 %v16259_v52, %v16293_v47  ;;  %v334_v54 = vld [vmem:[%s326_s20] sm:$0x1f]  ;;  %v18986_v30 = vand.u32 4294901760, %v16416_v19  ;;  %s15948_s20 = smov 64  }
  0x28   : > { %v657_v53 = vand.u32 4294901760, %v656_v61  ;;  %13709 = vmatprep.subr.mxu0 %v16373_v29  ;;  %v551_v58 = vsub.f32 %v16396_v14, %v18985_v36  ;;  %v16457_v24 = vand.u32 4294901760, %v16433_v2  ;;  %v16461_v36 = vsub.f32 %v16285_v26, %v16325_v63 }
  0x29   : > { %v545_v57 = vand.u32 4294901760, %v544_v50  ;;  %v664_v41 = vand.u32 4294901760, %v663_v1  ;;  %13710 = vmatpush3.msra.mxu0 %v16385_v43  ;;  %v670_v50 = vsub.f32 %v16416_v19, %v18986_v30  ;;  %v18987_v52 = vand.u32 4294901760, %v16428_v62 }
  0x2a   : > { %13734 = vmatprep.subr.mxu1 %v657_v53  ;;  %v552_v61 = vand.u32 4294901760, %v551_v58  ;;  %13711 = vmatprep.subr.mxu0 %v16399_v56  ;;  %v18905_v1 = vand.u32 4294901760, %v16450_v32  ;;  %v16468_v47 = vand.u32 4294901760, %v335_v13  ;;  %v18906_v19 = vand.u32 4294901760, %v16461_v36 }
  0x2b   : > { %13735 = vmatpush3.msra.mxu1 %v545_v57  ;;  %v558_v53 = vsub.f32 %v16428_v62, %v18987_v52  ;;  %v671_v30 = vand.u32 4294901760, %v670_v50  ;;  %13712 = vmatpush3.msra.mxu0 %v16424_v38  ;;  %v16472_v26 = vand.u32 4294901760, %v334_v54  ;;  %v16476_v57 = vsub.f32 %v16298_v27, %v16342_v39 }
  0x2c   : > { %18988 = vst [vmem:[#allocation21_spill] sm:$0xff] %v16468_v47  ;;  %13736 = vmatprep.subr.mxu1 %v664_v41  ;;  %13713 = vmatprep.subr.mxu0 %v16441_v48  ;;  %v677_v52 = vsub.f32 %v16450_v32, %v18905_v1  ;;  %v16483_v41 = vsub.f32 %v335_v13, %v16468_v47  ;;  %vm1297_vm3 = vcmask 261120   ;;  %vm1789_vm4 = vcmask 64512  }
  0x2d   : > { %18989 = vst [vmem:[#allocation22_spill] sm:$0xff] %v16472_v26  ;;  %13737 = vmatpush3.msra.mxu1 %v552_v61  ;;  %v559_v58 = vand.u32 4294901760, %v558_v53  ;;  %v16487_v50 = vsub.f32 %v16318_v49, %v16356_v7  ;;  %13714 = vmatpush3.msra.mxu0 %v16457_v24  ;;  %v565_v27 = vsub.f32 %v16461_v36, %v18906_v19  ;;  %vm2240_vm5 = vcmask 36864  }
  0x2e   : > { %13738 = vmatprep.subr.mxu1 %v671_v30  ;;  %v16495_v53 = vsub.f32 %v334_v54, %v16472_v26  ;;  %v16499_v13 = vsub.f32 %v16334_v44, %v16373_v29  ;;  %v678_v1 = vand.u32 4294901760, %v677_v52  ;;  %v18911_v49 = vand.u32 4294901760, %v16483_v41  ;;  %13753 = vmatprep.subr.mxu0 %v16065_v18 }
  0x2f   : > { %13739 = vmatpush3.msra.mxu1 %v559_v58  ;;  %v18914_v30 = vand.u32 4294901760, %v16487_v50  ;;  %v16506_v19 = vsub.f32 %v16347_v37, %v16385_v43  ;;  %v566_v61 = vand.u32 4294901760, %v565_v27  ;;  %v18990_v54 = vand.u32 4294901760, %v16476_v57  ;;  %709 = vmatprep.mubr.f32.mxu1 %v16468_v47 }
  0x30   : > { %13740 = vmatprep.subr.mxu1 %v678_v1  ;;  %v471_v52 = vsub.f32 %v16483_v41, %v18911_v49  ;;  %v18991_v58 = vand.u32 4294901760, %v16495_v53  ;;  %v18992_v47 = vand.u32 4294901760, %v16499_v13  ;;  %v16533_v43 = vsub.f32 %v16390_v51, %v16424_v38 }
  0x31   : > { %v684_v7 = vsub.f32 %v16476_v57, %v18990_v54  ;;  %v572_v37 = vsub.f32 %v16487_v50, %v18914_v30  ;;  %v16523_v54 = vsub.f32 %v16361_v33, %v16399_v56  ;;  %13741 = vmatpush3.msra.mxu1 %v566_v61  ;;  %v18994_v29 = vand.u32 4294901760, %v16506_v19 }
  0x32   : > { %v477_v1 = vsub.f32 %v16495_v53, %v18991_v58  ;;  %v691_v49 = vsub.f32 %v16499_v13, %v18992_v47  ;;  %18993 = vst [vmem:[#allocation23_spill] sm:$0xff] %v16533_v43  ;;  %v472_v30 = vand.u32 4294901760, %v471_v52  ;;  %v18921_v58 = vand.u32 4294901760, %v16533_v43 }
  0x33   : > { %v685_v44 = vand.u32 4294901760, %v684_v7  ;;  %v573_v27 = vand.u32 4294901760, %v572_v37  ;;  %v579_v33 = vsub.f32 %v16506_v19, %v18994_v29  ;;  %v18922_v7 = vand.u32 4294901760, %v16523_v54 }
  0x34   : > { %v478_v61 = vand.u32 4294901760, %v477_v1  ;;  %v692_v56 = vand.u32 4294901760, %v691_v49  ;;  %v16542_v47 = vsub.f32 %v16404_v12, %v16441_v48  ;;  %473 = vmatprep.mubr.f32.mxu0 %v472_v30  ;;  %v16549_v29 = vsub.f32 %v16433_v2, %v16457_v24 }
  0x35   : > { %13742 = vmatprep.subr.mxu1 %v685_v44  ;;  %v580_v51 = vand.u32 4294901760, %v579_v33  ;;  %v698_v52 = vsub.f32 %v16523_v54, %v18922_v7  ;;  %v586_v49 = vsub.f32 %v16533_v43, %v18921_v58  ;;  %v18997_v33 = vld [vmem:[#allocation2_spill] sm:$0xff]  ;;  %v19011_v7 = vand.u32 4294901760, %v16065_v18 }
  0x36   : > { %18995 = vst [vmem:[#allocation24_spill] sm:$0xff] %v16542_v47  ;;  %13743 = vmatpush3.msra.mxu1 %v573_v27  ;;  %18996 = vst [vmem:[#allocation25_spill] sm:$0xff] %v16549_v29  ;;  %479 = vmatmul.mubr.f32.vlgmr.msra.gmra.mxu0 %v478_v61  ;;  %v18920_v12 = vand.u32 4294901760, %v16542_v47  ;;  %v18919_v44 = vand.u32 4294901760, %v16549_v29  ;;  %v18998_v61 = vld [vmem:[#allocation3_spill] sm:$0xff]  ;;  %v19010_v58 = vld [vmem:[#allocation14_spill] sm:$0xff] }
  0x37   : > { %13744 = vmatprep.subr.mxu1 %v692_v56  ;;  %13754 = vmatpush3.msra.mxu0 %v16087_v23  ;;  %v699_v30 = vand.u32 4294901760, %v698_v52  ;;  %v587_v37 = vand.u32 4294901760, %v586_v49  ;;  %v19000_v52 = vld [vmem:[#allocation4_spill] sm:$0xff]  ;;  %v19001_v49 = vld [vmem:[#allocation5_spill] sm:$0xff]  ;;  %v19019_v18 = vand.u32 4294901760, %v16125_v35  ;;  %vm2258_vm6 = vcmask 1044480  }
  0x38   : > { %13745 = vmatpush3.msra.mxu1 %v580_v51  ;;  %13755 = vmatprep.subr.mxu0 %v16093_v25  ;;  %v705_v2 = vsub.f32 %v16542_v47, %v18920_v12  ;;  %v593_v56 = vsub.f32 %v16549_v29, %v18919_v44  ;;  %v18999_v51 = vld [vmem:[#allocation20_spill] sm:$0xff]  ;;  %v19009_v12 = vld [vmem:[#allocation13_spill] sm:$0xff]  ;;  %vm2254_vm7 = vcmask 39936   ;;  %vm5474_vm8 = vcmask 130048  }
  0x39   : > { %846 = vmatprep.mubr.f32.mxu0 %v16483_v41  ;;  %13756 = vmatpush3.msra.mxu0 %v16116_v31  ;;  %v19008_v44 = vld [vmem:[#allocation12_spill] sm:$0xff]  ;;  %vm5476_vm9 = vcmask 195584   ;;  %vm13068_vm10 = vcmask 253952  }
  0x3a   : > { %13746 = vmatprep.subr.mxu1 %v699_v30  ;;  %13757 = vmatprep.subr.mxu0 %v16125_v35  ;;  %v706_v27 = vand.u32 4294901760, %v705_v2  ;;  %v594_v1 = vand.u32 4294901760, %v593_v56  ;;  %v19002_v30 = vld [vmem:[#allocation6_spill] sm:$0xff]  ;;  %v19004_v2 = vld [vmem:[#allocation8_spill] sm:$0xff]  ;;  %v19005_v56 = vld [vmem:[#allocation9_spill] sm:$0xff]  ;;  %v19024_v35 = vand.u32 4294901760, %v16495_v53 }
  0x3b   : > { %13747 = vmatpush3.msra.mxu1 %v587_v37  ;;  %13758 = vmatpush3.msra.mxu0 %v16141_v40  ;;  %v19003_v37 = vld [vmem:[#allocation7_spill] sm:$0xff] }
  0x3c   : > { %13748 = vmatprep.subr.mxu1 %v706_v27  ;;  %13759 = vmatprep.subr.mxu0 %v16155_v45  ;;  %v19006_v27 = vld [vmem:[#allocation10_spill] sm:$0xff] }
  0x3d   : > { %13749 = vmatpush3.msra.mxu1 %v594_v1  ;;  %13760 = vmatpush3.msra.mxu0 %v16190_v59  ;;  %v19007_v1 = vld [vmem:[#allocation11_spill] sm:$0xff] }
  0x3e   : > { %711 = vmatmul.mubr.f32.vlgmr.msra.gmra.mxu1 %v16472_v26  ;;  %13761 = vmatprep.subr.mxu0 %v16205_v0  ;;  %v19012_v26 = vld [vmem:[#allocation16_spill] sm:$0xff] }
  0x3f   : > { %13788 = vmatprep.subr.mxu1 %v16027_v3  ;;  %13762 = vmatpush3.msra.mxu0 %v16219_v8 }
  0x40   : > { %13789 = vmatpush3.msra.mxu1 %v16029_v4  ;;  %13763 = vmatprep.subr.mxu0 %v16233_v42 }
  0x41   : > { %13790 = vmatprep.subr.mxu1 %v16031_v5  ;;  %13764 = vmatpush3.msra.mxu0 %v16251_v20 }
  0x42   : > { %13791 = vmatpush3.msra.mxu1 %v16042_v9  ;;  %13765 = vmatprep.subr.mxu0 %v16268_v21 }
  0x43   : > { %13792 = vmatprep.subr.mxu1 %v16044_v10  ;;  %13766 = vmatpush3.msra.mxu0 %v16280_v6 }
  0x44   : > { %13793 = vmatpush3.msra.mxu1 %v16046_v11  ;;  %13767 = vmatprep.subr.mxu0 %v16313_v55 }
  0x45   : > { %13794 = vmatprep.subr.mxu1 %v16058_v15  ;;  %13768 = vmatpush3.msra.mxu0 %v16329_v28 }
  0x46   : > { %13795 = vmatpush3.msra.mxu1 %v16060_v16  ;;  %13769 = vmatprep.subr.mxu0 %v16353_v34 }
  0x47   : > { %13796 = vmatprep.subr.mxu1 %v16062_v17  ;;  %13770 = vmatpush3.msra.mxu0 %v16370_v46 }
  0x48   : > { %13797 = vmatpush3.msra.mxu1 %v16084_v22  ;;  %13771 = vmatprep.subr.mxu0 %v16382_v60 }
  0x49   : > { %13798 = vmatprep.subr.mxu1 %v18997_v33  ;;  %13772 = vmatpush3.msra.mxu0 %v16396_v14 }
  0x4a   : > { %13799 = vmatpush3.msra.mxu1 %v18998_v61  ;;  %13773 = vmatprep.subr.mxu0 %v18999_v51 }
  0x4b   : > { %13800 = vmatprep.subr.mxu1 %v19000_v52  ;;  %13774 = vmatpush3.msra.mxu0 %v16428_v62 }
  0x4c   : > { %13801 = vmatpush3.msra.mxu1 %v19001_v49  ;;  %13775 = vmatprep.subr.mxu0 %v16450_v32 }
  0x4d   : > { %13802 = vmatprep.subr.mxu1 %v19002_v30  ;;  %13776 = vmatpush3.msra.mxu0 %v16461_v36 }
  0x4e   : > { %13803 = vmatpush3.msra.mxu1 %v19003_v37  ;;  %13777 = vmatprep.subr.mxu0 %v16476_v57 }
  0x4f   : > { %13804 = vmatprep.subr.mxu1 %v19004_v2  ;;  %13778 = vmatpush3.msra.mxu0 %v16487_v50 }
  0x50   : > { %13805 = vmatpush3.msra.mxu1 %v19005_v56  ;;  %13779 = vmatprep.subr.mxu0 %v16499_v13 }
  0x51   : > { %13806 = vmatprep.subr.mxu1 %v19006_v27  ;;  %13780 = vmatpush3.msra.mxu0 %v16506_v19 }
  0x52   : > { %13807 = vmatpush3.msra.mxu1 %v19007_v1  ;;  %13781 = vmatprep.subr.mxu0 %v16523_v54 }
  0x53   : > { %13808 = vmatprep.subr.mxu1 %v19008_v44  ;;  %13782 = vmatpush3.msra.mxu0 %v16533_v43  ;;  %v19013_v43 = vand.u32 4294901760, %v16087_v23  ;;  %v19020_v23 = vand.u32 4294901760, %v16141_v40  ;;  %v19026_v40 = vand.u32 4294901760, %v16219_v8  ;;  %v19044_v8 = vand.u32 4294901760, %v16506_v19 }
  0x54   : > { %13809 = vmatpush3.msra.mxu1 %v19009_v12  ;;  %13783 = vmatprep.subr.mxu0 %v16542_v47  ;;  %v19014_v12 = vld [vmem:[#allocation17_spill] sm:$0xff]  ;;  %v19018_v47 = vld [vmem:[#allocation19_spill] sm:$0xff] }
  0x55   : > { %13810 = vmatprep.subr.mxu1 %v19010_v58  ;;  %13784 = vmatpush3.msra.mxu0 %v16549_v29  ;;  %v19015_v58 = vand.u32 4294901760, %v16093_v25  ;;  %v19016_v29 = vld [vmem:[#allocation18_spill] sm:$0xff]  ;;  %v19021_v25 = vand.u32 4294901760, %v16155_v45  ;;  %v19027_v45 = vand.u32 4294901760, %v16233_v42  ;;  %v19045_v42 = vand.u32 4294901760, %v16523_v54 }
  0x56   : > { %13811 = vmatpush3.msra.mxu1 %v16325_v63  ;;  %849 = vmatmul.mubr.f32.vlgmr.msra.gmra.mxu0 %v16495_v53  ;;  %v19017_v63 = vand.u32 4294901760, %v16116_v31  ;;  %v19022_v31 = vand.u32 4294901760, %v16483_v41  ;;  %v19056_v41 = vld [vmem:[#allocation22_spill] sm:$0xff] }
  0x57   : > { %13812 = vmatprep.subr.mxu1 %v16342_v39  ;;  %13823 = vmatprep.subr.mxu0 %v19011_v7  ;;  %v16740_v7 = vld [vmem:[%s18853_s3] sm:$0xff] }
  0x58   : > { %13813 = vmatpush3.msra.mxu1 %v19012_v26  ;;  %13824 = vmatpush3.msra.mxu0 %v19013_v43  ;;  %v19025_v43 = vand.u32 4294901760, %v16205_v0  ;;  %v19029_v0 = vand.u32 4294901760, %v16268_v21 }
  0x59   : > { %13814 = vmatprep.subr.mxu1 %v19014_v12  ;;  %13825 = vmatprep.subr.mxu0 %v19015_v58 }
  0x5a   : > { %13815 = vmatpush3.msra.mxu1 %v19016_v29  ;;  %13826 = vmatpush3.msra.mxu0 %v19017_v63  ;;  %v19023_v63 = vand.u32 4294901760, %v16190_v59  ;;  %v19028_v59 = vand.u32 4294901760, %v16251_v20  ;;  %v19046_v20 = vld [vmem:[#allocation23_spill] sm:$0xff] }
  0x5b   : > { %13816 = vmatprep.subr.mxu1 %v19018_v47  ;;  %13827 = vmatprep.subr.mxu0 %v19019_v18  ;;  %v19047_v21 = vand.u32 4294901760, %v19046_v20 }
  0x5c   : > { %13817 = vmatpush3.msra.mxu1 %v16424_v38  ;;  %13828 = vmatpush3.msra.mxu0 %v19020_v23 }
  0x5d   : > { %13818 = vmatprep.subr.mxu1 %v16441_v48  ;;  %13829 = vmatprep.subr.mxu0 %v19021_v25 }
  0x5e   : > { %13819 = vmatpush3.msra.mxu1 %v16457_v24  ;;  %953 = vmatprep.mubr.f32.mxu1 %v19022_v31 }
  0x5f   : > { %13830 = vmatpush3.msra.mxu0 %v19023_v63  ;;  %957 = vmatmul.mubr.f32.vlgmr.msra.gmra.mxu1 %v19024_v35 }
  0x60   : > { %13831 = vmatprep.subr.mxu0 %v19025_v43  ;;  %13858 = vmatprep.subr.mxu1 %v16027_v3  ;;  %v19030_v3 = vand.u32 4294901760, %v16280_v6  ;;  %v19048_v6 = vld [vmem:[#allocation13_spill] sm:$0xff] }
  0x61   : > { %13832 = vmatpush3.msra.mxu0 %v19026_v40  ;;  %13859 = vmatpush3.msra.mxu1 %v16029_v4  ;;  %v19031_v4 = vand.u32 4294901760, %v16313_v55  ;;  %v19041_v55 = vand.u32 4294901760, %v16476_v57  ;;  %v19055_v57 = vld [vmem:[#allocation15_spill] sm:$0xff] }
  0x62   : > { %13833 = vmatprep.subr.mxu0 %v19027_v45  ;;  %13860 = vmatprep.subr.mxu1 %v16031_v5  ;;  %v19032_v5 = vand.u32 4294901760, %v16329_v28  ;;  %v19049_v28 = vld [vmem:[#allocation24_spill] sm:$0xff] }
  0x63   : > { %13834 = vmatpush3.msra.mxu0 %v19028_v59  ;;  %13861 = vmatpush3.msra.mxu1 %v16042_v9  ;;  %v19033_v9 = vand.u32 4294901760, %v16353_v34  ;;  %v19040_v34 = vand.u32 4294901760, %v16461_v36  ;;  %v19054_v36 = vld [vmem:[#allocation21_spill] sm:$0xff] }
  0x64   : > { %13835 = vmatprep.subr.mxu0 %v19029_v0  ;;  %13862 = vmatprep.subr.mxu1 %v16044_v10  ;;  %v19034_v10 = vand.u32 4294901760, %v16370_v46  ;;  %v19050_v46 = vand.u32 4294901760, %v19049_v28  ;;  %v1290_v28 = vld [vmem:[%s18854_s4 + $0x10] sm:$0xff] }
  0x65   : > { %13836 = vmatpush3.msra.mxu0 %v19030_v3  ;;  %13863 = vmatpush3.msra.mxu1 %v16046_v11  ;;  %v19035_v11 = vand.u32 4294901760, %v16382_v60  ;;  %v19042_v60 = vand.u32 4294901760, %v16487_v50  ;;  %v368_v50 = vlaneseq }
  0x66   : > { %13837 = vmatprep.subr.mxu0 %v19031_v4  ;;  %13864 = vmatprep.subr.mxu1 %v16058_v15  ;;  %v19036_v15 = vand.u32 4294901760, %v16396_v14  ;;  %v19051_v14 = vld [vmem:[#allocation14_spill] sm:$0xff] }
  0x67   : > { %13838 = vmatpush3.msra.mxu0 %v19032_v5  ;;  %13865 = vmatpush3.msra.mxu1 %v16060_v16  ;;  %v19037_v16 = vand.u32 4294901760, %v18999_v51  ;;  %v16732_v53 = vshrl.u32 %v368_v50, 7 }
  0x68   : > { %13839 = vmatprep.subr.mxu0 %v19033_v9  ;;  %13866 = vmatprep.subr.mxu1 %v16062_v17  ;;  %v19038_v17 = vand.u32 4294901760, %v16428_v62  ;;  %v19052_v62 = vld [vmem:[#allocation25_spill] sm:$0xff] }
  0x69   : > { %13840 = vmatpush3.msra.mxu0 %v19034_v10  ;;  %13867 = vmatpush3.msra.mxu1 %v16084_v22  ;;  %v19039_v22 = vand.u32 4294901760, %v16450_v32  ;;  %v19043_v32 = vand.u32 4294901760, %v16499_v13  ;;  %v19053_v19 = vand.u32 4294901760, %v19052_v62  ;;  %v16735_v54 = vsub.s32 0, %v16732_v53 }
  0x6a   : > { %13841 = vmatprep.subr.mxu0 %v19035_v11  ;;  %13868 = vmatprep.subr.mxu1 %v18997_v33  ;;  %v18937_v4 = vsub.s32 1, %v16732_v53  ;;  %v18936_v5 = vsub.s32 2, %v16732_v53  ;;  %vm1261_vm1 = vcmp.eq.s32.totalorder %v16732_v53, 0 }
  0x6b   : > { %13842 = vmatpush3.msra.mxu0 %v19036_v15  ;;  %13869 = vmatpush3.msra.mxu1 %v18998_v61 }
  0x6c   : > { %13843 = vmatprep.subr.mxu0 %v19037_v16  ;;  %13870 = vmatprep.subr.mxu1 %v19000_v52  ;;  %v1252_v9 = vrot.slane %v16740_v7, %v18937_v4  ;;  %v1257_v15 = vrot.slane %v16740_v7, %v18936_v5  ;;  %v13647_v5 = vld [vmem:[%s18856_s6 + $0x20] ss:$0 sm:$0xff] }
  0x6d   : > { %13844 = vmatpush3.msra.mxu0 %v19038_v17  ;;  %13871 = vmatpush3.msra.mxu1 %v19001_v49 }
  0x6e   : > { %13845 = vmatprep.subr.mxu0 %v19039_v22  ;;  %13872 = vmatprep.subr.mxu1 %v19002_v30  ;;  %v1263_v22 = vld [vmem:[%s18852_s2] sm:$0x1f] }
  0x6f   : > { %13846 = vmatpush3.msra.mxu0 %v19040_v34  ;;  %13873 = vmatpush3.msra.mxu1 %v19003_v37 }
  0x70   : > { %13847 = vmatprep.subr.mxu0 %v19041_v55  ;;  %13874 = vmatprep.subr.mxu1 %v19004_v2 }
  0x71   : > { %13848 = vmatpush3.msra.mxu0 %v19042_v60  ;;  %13875 = vmatpush3.msra.mxu1 %v19005_v56 }
  0x72   : > { %13849 = vmatprep.subr.mxu0 %v19043_v32  ;;  %13876 = vmatprep.subr.mxu1 %v19006_v27 }
  0x73   : > { %13850 = vmatpush3.msra.mxu0 %v19044_v8  ;;  %13877 = vmatpush3.msra.mxu1 %v19007_v1 }
  0x74   : > { %13851 = vmatprep.subr.mxu0 %v19045_v42  ;;  %13878 = vmatprep.subr.mxu1 %v19008_v44 }
  0x75   : > { %13852 = vmatpush3.msra.mxu0 %v19047_v21  ;;  %13879 = vmatpush3.msra.mxu1 %v19048_v6  ;;  %v1291_v6 = vld [vmem:[%s18854_s4 + $0x18] sm:$0xff] }
  0x76   : > { %13853 = vmatprep.subr.mxu0 %v19050_v46  ;;  %13880 = vmatprep.subr.mxu1 %v19051_v14  ;;  %v1289_v46 = vld [vmem:[%s18854_s4 + $0x8] sm:$0xff]  ;;  %v15944_v14 = vmov 0.0   ;;  %v16774_v62 = vand.u32 4294901760, %v1291_v6 }
  0x77   : > { %13854 = vmatpush3.msra.mxu0 %v19053_v19  ;;  %1123 = vmatprep.mubr.f32.mxu0 %v19054_v36  ;;  %v16776_v19 = vand.u32 4294901760, %v1290_v28 }
  0x78   : > { %13881 = vmatpush3.msra.mxu1 %v19055_v57  ;;  %1125 = vmatmul.mubr.f32.vlgmr.msra.gmra.mxu0 %v19056_v41  ;;  %v1288_v57 = vld [vmem:[%s18854_s4] sm:$0xff]  ;;  %v16791_v50 = vsub.f32 %v1291_v6, %v16774_v62 }
  0x79   : > { %13882 = vmatprep.subr.mxu1 %v16342_v39  ;;  %1227 = vmatprep.mubr.f32.mxu1 %v19054_v36  ;;  %v16778_v36 = vand.u32 4294901760, %v1289_v46 }
  0x7a   : > { %13883 = vmatpush3.msra.mxu1 %v19012_v26  ;;  %14499 = vmatprep.subr.mxu0 %v15944_v14 }
  0x7b   : > { %13884 = vmatprep.subr.mxu1 %v19014_v12  ;;  %14507 = vmatprep.mubr.msk.f32.mxu0 %vm15945_vm2, %v15944_v14 }
  0x7c   : > { %13885 = vmatpush3.msra.mxu1 %v19016_v29  ;;  %14500 = vmatpush3.msra.mxu0 %v16774_v62 }
  0x7d   : > { %13886 = vmatprep.subr.mxu1 %v19018_v47  ;;  %14501 = vmatprep.subr.mxu0 %v15944_v14 }
  0x7e   : > { %13887 = vmatpush3.msra.mxu1 %v16424_v38  ;;  %14502 = vmatpush3.msra.mxu0 %v16776_v19 }
  0x7f   : > { %13888 = vmatprep.subr.mxu1 %v16441_v48  ;;  %14503 = vmatprep.subr.mxu0 %v15944_v14 }
  0x80   : > { %13889 = vmatpush3.msra.mxu1 %v16457_v24  ;;  %v371_v24 = vrot.slane %v16740_v7, %v16735_v54  ;;  %14504 = vmatpush3.msra.mxu0 %v16778_v36 }
  0x81   : > { %1229 = vmatmul.mubr.f32.vlgmr.msra.gmra.mxu1 %v19056_v41  ;;  %14510 = vmatprep.subr.mxu1 %v15944_v14  ;;  %v16784_v41 = vand.u32 4294901760, %v1288_v57 }
  0x82   : > { %14518 = vmatprep.mubr.msk.f32.mxu1 %vm15945_vm2, %v15944_v14  ;;  %14505 = vmatprep.subr.mxu0 %v15944_v14 }
  0x83   : > { %14506 = vmatpush3.msra.mxu0 %v16784_v41 }
  0x84   : > { %14521 = vmatprep.subr.mxu0 %v15944_v14 }
  0xf6   : > { %v13715_v39 = vpop.f32.mrf.mxu0 }
  0xf8   : > { %v13716_v13 = vpop.f32.mrf.mxu0 }
  0xf9   : > { %v13717_v58 = vadd.f32 %v13716_v13, %v13715_v39  ;;  %v16794_v39 = vsub.f32 %v1290_v28, %v16776_v19  ;;  %v16797_v13 = vsub.f32 %v1289_v46, %v16778_v36 }
  0xfb   : > { %v481_v44 = vadd.f32 %v13717_v58, %v371_v24  ;;  %v1421_v24 = vand.u32 4294901760, %v16797_v13 }
  0xfe   : > { %v13750_v26 = vpop.f32.mrf.mxu1 }
 0x100   : > { %v13751_v48 = vpop.f32.mrf.mxu1 }
 0x101   : > { %v13752_v33 = vadd.f32 %v13751_v48, %v13750_v26  ;;  %v16801_v26 = vsub.f32 %v1288_v57, %v16784_v41  ;;  %v1414_v48 = vand.u32 4294901760, %v16794_v39 }
 0x103   : > { %v713_v49 = vadd.f32 %v13752_v33, %v481_v44  ;;  %v1428_v58 = vand.u32 4294901760, %v16801_v26 }
 0x116   : > { %v13785_v38 = vpop.f32.mrf.mxu0 }
 0x118   : > { %v13786_v47 = vpop.f32.mrf.mxu0 }
 0x119   : > { %v13787_v51 = vadd.f32 %v13786_v47, %v13785_v38  ;;  %v1407_v38 = vand.u32 4294901760, %v16791_v50 }
 0x11b   : > { %v851_v37 = vadd.f32 %v13787_v51, %v713_v49  ;;  %v1408_v47 = vsub.f32 %v16791_v50, %v1407_v38 }
 0x11d   : > { %v1409_v44 = vand.u32 4294901760, %v1408_v47 }
 0x11f   : > { %v13820_v29 = vpop.f32.mrf.mxu1  ;;  %14511 = vmatpush3.msra.mxu1 %v1409_v44 }
 0x120   : > { %14512 = vmatprep.subr.mxu1 %v15944_v14 }
 0x121   : > { %v13821_v61 = vpop.f32.mrf.mxu1 }
 0x122   : > { %v13822_v30 = vadd.f32 %v13821_v61, %v13820_v29  ;;  %v1415_v29 = vsub.f32 %v16794_v39, %v1414_v48  ;;  %v1429_v61 = vsub.f32 %v16801_v26, %v1428_v58 }
 0x124   : > { %v959_v27 = vadd.f32 %v13822_v30, %v851_v37  ;;  %v1416_v33 = vand.u32 4294901760, %v1415_v29 }
 0x126   : > { %14513 = vmatpush3.msra.mxu1 %v1416_v33 }
 0x127   : > { %14514 = vmatprep.subr.mxu1 %v15944_v14 }
 0x138   : > { %v13855_v12 = vpop.f32.mrf.mxu0 }
 0x13a   : > { %v13856_v52 = vpop.f32.mrf.mxu0 }
 0x13b   : > { %v13857_v2 = vadd.f32 %v13856_v52, %v13855_v12  ;;  %v1422_v12 = vsub.f32 %v16797_v13, %v1421_v24  ;;  %v1430_v52 = vand.u32 4294901760, %v1429_v61 }
 0x13d   : > { %v1127_v23 = vadd.f32 %v13857_v2, %v959_v27  ;;  %v1423_v51 = vand.u32 4294901760, %v1422_v12  ;;  %v18934_v2 = vsub.s32 3, %v16732_v53 }
 0x13f   : > { %14515 = vmatpush3.msra.mxu1 %v1423_v51  ;;  %v1281_v27 = vrot.slane %v16740_v7, %v18934_v2 }
 0x140   : > { %14516 = vmatprep.subr.mxu1 %v15944_v14 }
 0x141   : > { %v13890_v56 = vpop.f32.mrf.mxu1  ;;  %14517 = vmatpush3.msra.mxu1 %v1430_v52 }
 0x142   : > { %14532 = vmatprep.subr.mxu1 %v15944_v14 }
 0x143   : > { %v13891_v1 = vpop.f32.mrf.mxu1 }
 0x144   : > { %v13892_v18 = vadd.f32 %v13891_v1, %v13890_v56  ;;  %v18933_v56 = vsub.s32 4, %v16732_v53 }
 0x146   : > { %v1231_v25 = vadd.f32 %v13892_v18, %v1127_v23  ;;  %v1286_v23 = vrot.slane %v16740_v7, %v18933_v56 }
 0x148   : > { %v1235_v31 = vsel %vm1234_vm0, %v1231_v25, 0.0 }
 0x149   : > { %1236 = vadd.xlane.f32.xlu0 %v1235_v31 }
 0x1d2   : > { %v1237_v63 = vpop.xlane.xlu0 %1236 }
 0x1d3   : > { %v1239_v35 = vmul.f32 0.03125, %v1237_v63 }
 0x1d5   : > { %v1240_v43 = vsub.f32 %v1231_v25, %v1239_v35 }
 0x1d7   : > { %v1241_v40 = vmul.f32 %v1240_v43, %v1240_v43 }
 0x1d9   : > { %v1242_v45 = vsel %vm1234_vm0, %v1241_v40, 0.0 }
 0x1da   : > { %1243 = vadd.xlane.f32.xlu0 %v1242_v45 }
 0x263   : > { %v1244_v59 = vpop.xlane.xlu0 %1243 }
 0x264   : > { %v1245_v0 = vmul.f32 0.03125, %v1244_v59 }
 0x266   : > { %v1246_v3 = vadd.f32 1e-06, %v1245_v0 }
 0x268   : > { %15885 = vrsqrt.f32 %v1246_v3 }
 0x275   : > { %v15886_v10 = vpop.eup %15885 }
 0x276   : > { %v1248_v11 = vmul.f32 %v15886_v10, %v1240_v43 }
 0x278   : > { %v1253_v16 = vmul.f32 %v1252_v9, %v1248_v11 }
 0x27a   : > { %v1258_v17 = vadd.f32 %v1257_v15, %v1253_v16  ;;  %v13646_v15 = vld [vmem:[%s18854_s4 + $0x20] ss:$0 sm:$0xff] }
 0x27c   : > { %v1262_v34 = vsel %vm1261_vm1, 0.0, %v1258_v17 }
 0x27d   : > { %v16758_v55 = vadd.f32 %v1263_v22, %v1262_v34 }
 0x27f   : > { %v1265_v60 = vsel %vm1234_vm0, %v16758_v55, 0.0 }
 0x280   : > { %1266 = vadd.xlane.f32.xlu1 %v1265_v60 }
 0x309   : > { %v1267_v32 = vpop.xlane.xlu1 %1266 }
 0x30a   : > { %v1268_v8 = vmul.f32 0.03125, %v1267_v32 }
 0x30c   : > { %v1269_v42 = vsub.f32 %v16758_v55, %v1268_v8 }
 0x30e   : > { %v1270_v20 = vmul.f32 %v1269_v42, %v1269_v42 }
 0x310   : > { %v1271_v21 = vsel %vm1234_vm0, %v1270_v20, 0.0 }
 0x311   : > { %1272 = vadd.xlane.f32.xlu1 %v1271_v21 }
 0x39a   : > { %v1273_v49 = vpop.xlane.xlu1 %1272 }
 0x39b   : > { %v1274_v30 = vmul.f32 0.03125, %v1273_v49 }
 0x39d   : > { %v1275_v37 = vadd.f32 1e-06, %v1274_v30 }
 0x39f   : > { %15887 = vrsqrt.f32 %v1275_v37 }
 0x3ac   : > { %v15888_v1 = vpop.eup %15887 }
 0x3ad   : > { %v1277_v18 = vmul.f32 %v15888_v1, %v1269_v42 }
 0x3af   : > { %v1282_v25 = vmul.f32 %v1281_v27, %v1277_v18 }
 0x3b1   : > { %v1287_v31 = vadd.f32 %v1286_v23, %v1282_v25 }
 0x3b3   : > { %v1299_v63 = vsel %vm1297_vm3, %v1287_v31, 0 }
 0x3b4   : > { %v1370_v35 = vand.u32 4294901760, %v1299_v63 }
 0x3b6   : > { %v1371_v43 = vsub.f32 %v1299_v63, %v1370_v35  ;;  %14519 = vmatmul.mubr.f32.vlgmr.msra.gmra.mxu1 %v1370_v35 }
 0x3b7   : > { %14533 = vmatpush3.msra.mxu1 %v16774_v62  ;;  %14540 = vmatprep.mubr.msk.f32.mxu1 %vm15945_vm2, %v15944_v14 }
 0x3b8   : > { %14534 = vmatprep.subr.mxu1 %v15944_v14  ;;  %v1372_v40 = vand.u32 4294901760, %v1371_v43 }
 0x3b9   : > { %14535 = vmatpush3.msra.mxu1 %v16776_v19 }
 0x3ba   : > { %14536 = vmatprep.subr.mxu1 %v15944_v14  ;;  %v1373_v7 = vsub.f32 %v1371_v43, %v1372_v40 }
 0x3bb   : > { %14537 = vmatpush3.msra.mxu1 %v16778_v36 }
 0x3bc   : > { %14538 = vmatprep.subr.mxu1 %v15944_v14  ;;  %v1374_v45 = vand.u32 4294901760, %v1373_v7 }
 0x3bd   : > { %14539 = vmatpush3.msra.mxu1 %v16784_v41 }
 0x3be   : > { %14541 = vmatmul.mubr.f32.vlgmr.msra.gmra.mxu1 %v1372_v40  ;;  %14554 = vmatprep.subr.mxu1 %v15944_v14 }
 0x3bf   : > { %14508 = vmatmul.mubr.f32.vlgmr.msra.gmra.mxu0 %v1374_v45  ;;  %14555 = vmatpush3.msra.mxu1 %v16774_v62 }
 0x3c0   : > { %14522 = vmatpush3.msra.mxu0 %v16791_v50  ;;  %14556 = vmatprep.subr.mxu1 %v15944_v14 }
 0x3c1   : > { %14523 = vmatprep.subr.mxu0 %v15944_v14  ;;  %14557 = vmatpush3.msra.mxu1 %v16776_v19 }
 0x3c2   : > { %14524 = vmatpush3.msra.mxu0 %v16794_v39  ;;  %14558 = vmatprep.subr.mxu1 %v15944_v14 }
 0x3c3   : > { %14525 = vmatprep.subr.mxu0 %v15944_v14  ;;  %14559 = vmatpush3.msra.mxu1 %v16778_v36 }
 0x3c4   : > { %14526 = vmatpush3.msra.mxu0 %v16797_v13  ;;  %14560 = vmatprep.subr.mxu1 %v15944_v14 }
 0x3c5   : > { %14527 = vmatprep.subr.mxu0 %v15944_v14  ;;  %14529 = vmatprep.mubr.msk.f32.mxu0 %vm15945_vm2, %v15944_v14 }
 0x3c6   : > { %14528 = vmatpush3.msra.mxu0 %v16801_v26  ;;  %14561 = vmatpush3.msra.mxu1 %v16784_v41 }
 0x3c7   : > { %14562 = vmatprep.mubr.msk.f32.mxu1 %vm15945_vm2, %v15944_v14  ;;  %14530 = vmatmul.mubr.f32.vlgmr.msra.gmra.mxu0 %v1371_v43 }
 0x3c8   : > { %14543 = vmatprep.subr.mxu0 %v15944_v14  ;;  %14563 = vmatmul.mubr.f32.vlgmr.msra.gmra.mxu1 %v1370_v35 }
 0x3c9   : > { %14544 = vmatpush3.msra.mxu0 %v1407_v38  ;;  %14551 = vmatprep.mubr.msk.f32.mxu0 %vm15945_vm2, %v15944_v14 }
 0x3ca   : > { %14545 = vmatprep.subr.mxu0 %v15944_v14  ;;  %14570 = vmatprep.subr.mxu1 %v15944_v14 }
 0x3cb   : > { %14546 = vmatpush3.msra.mxu0 %v1414_v48  ;;  %14572 = vmatprep.mubr.msk.f32.mxu1 %vm15945_vm2, %v15944_v14 }
 0x3cc   : > { %14547 = vmatprep.subr.mxu0 %v15944_v14 }
 0x3cd   : > { %14548 = vmatpush3.msra.mxu0 %v1421_v24 }
 0x3ce   : > { %14549 = vmatprep.subr.mxu0 %v15944_v14 }
 0x3cf   : > { %14550 = vmatpush3.msra.mxu0 %v1428_v58 }
 0x3d0   : > { %14552 = vmatmul.mubr.f32.vlgmr.msra.gmra.mxu0 %v1370_v35  ;;  %14565 = vmatprep.subr.mxu0 %v15944_v14 }
 0x3d1   : > { %14567 = vmatprep.mubr.msk.f32.mxu0 %vm15945_vm2, %v15944_v14 }
 0x476   : > { %v1467_v59 = vpop.f32.mrf.mxu1 }
 0x478   : > { %v14520_v0 = vpop.f32.mrf.mxu1 }
 0x47e   : > { %v1624_v3 = vpop.f32.mrf.mxu1 }
 0x47f   : > { %v1376_v9 = vpop.f32.mrf.mxu0 }
 0x480   : > { %v14542_v10 = vpop.f32.mrf.mxu1  ;;  %v1377_v16 = vadd.f32 %v13646_v15, %v1376_v9 }
 0x481   : > { %v14509_v11 = vpop.f32.mrf.mxu0 }
 0x482   : > { %v1468_v34 = vadd.f32 %v1467_v59, %v1377_v16 }
 0x487   : > { %v1547_v17 = vpop.f32.mrf.mxu0 }
 0x488   : > { %v1782_v22 = vpop.f32.mrf.mxu1  ;;  %v1548_v8 = vadd.f32 %v1547_v17, %v1468_v34 }
 0x489   : > { %v14531_v60 = vpop.f32.mrf.mxu0 }
 0x48a   : > { %v14564_v32 = vpop.f32.mrf.mxu1  ;;  %v1625_v42 = vadd.f32 %v1624_v3, %v1548_v8 }
 0x490   : > { %v1707_v20 = vpop.f32.mrf.mxu0 }
 0x491   : > { %v1708_v21 = vadd.f32 %v1707_v20, %v1625_v42 }
 0x492   : > { %v14553_v6 = vpop.f32.mrf.mxu0 }
 0x493   : > { %v16890_v28 = vadd.f32 %v1782_v22, %v1708_v21 }
 0x495   : > { %1787 = vrot.lane.b32.xlu0 %v16890_v28, %s15946_s18  ;;  %v1790_v46 = vsel %vm1789_vm4, %v16890_v28, 0 }
 0x496   : > { %v1860_v62 = vand.u32 4294901760, %v1790_v46 }
 0x498   : > { %v1861_v19 = vsub.f32 %v1790_v46, %v1860_v62 }
 0x499   : > { %2709 = vrot.lane.b32.xlu0 %v16890_v28, %s15947_s19 }
 0x49a   : > { %v1862_v36 = vand.u32 4294901760, %v1861_v19 }
 0x49c   : > { %v1863_v50 = vsub.f32 %v1861_v19, %v1862_v36 }
 0x49e   : > { %v1864_v26 = vand.u32 4294901760, %v1863_v50 }
 0x507   : > { %v1788_v57 = vpop.permute.xlu0 %1787 }
 0x508   : > { %v1792_v41 = vsel %vm1789_vm4, %v1788_v57, 0 }
 0x509   : > { %v1825_v39 = vand.u32 4294901760, %v1792_v41 }
 0x50b   : > { %v1902_v13 = vsub.f32 %v1792_v41, %v1825_v39  ;;  %14566 = vmatpush3.xpose.msra.mxu0 %v1825_v39  ;;  %v2710_v0 = vpop.permute.xlu0 %2709 }
 0x50c   : > { %14575 = vmatprep.subr.mxu0 %v15944_v14  ;;  %v2713_v10 = vsel %vm1789_vm4, %v2710_v0, 0 }
 0x50d   : > { %v1903_v38 = vand.u32 4294901760, %v1902_v13  ;;  %v2746_v16 = vand.u32 4294901760, %v2713_v10 }
 0x50e   : > { %14568 = vmatmul.mubr.f32.vlgmr.msra.gmra.mxu0 %v1864_v26 }
 0x50f   : > { %v1904_v48 = vsub.f32 %v1902_v13, %v1903_v38  ;;  %14576 = vmatpush3.xpose.msra.mxu0 %v1902_v13  ;;  %14577 = vmatprep.mubr.msk.f32.mxu0 %vm15945_vm2, %v15944_v14  ;;  %v2823_v60 = vsub.f32 %v2713_v10, %v2746_v16 }
 0x510   : > { %14585 = vmatprep.subr.mxu0 %v15944_v14 }
 0x511   : > { %v1905_v24 = vand.u32 4294901760, %v1904_v48  ;;  %v2824_v21 = vand.u32 4294901760, %v2823_v60 }
 0x512   : > { %14578 = vmatmul.mubr.f32.vlgmr.msra.gmra.mxu0 %v1861_v19 }
 0x513   : > { %14571 = vmatpush3.xpose.msra.mxu1 %v1905_v24  ;;  %14586 = vmatpush3.xpose.msra.mxu0 %v1903_v38 }
 0x514   : > { %14587 = vmatprep.mubr.msk.f32.mxu0 %vm15945_vm2, %v15944_v14  ;;  %14580 = vmatprep.subr.mxu1 %v15944_v14 }
 0x515   : > { %14595 = vmatprep.subr.mxu0 %v15944_v14 }
 0x516   : > { %14573 = vmatmul.mubr.f32.vlgmr.msra.gmra.mxu1 %v1860_v62  ;;  %14588 = vmatmul.mubr.f32.vlgmr.msra.gmra.mxu0 %v1860_v62 }
 0x517   : > { %14581 = vmatpush3.xpose.msra.mxu1 %v1825_v39  ;;  %14582 = vmatprep.mubr.msk.f32.mxu1 %vm15945_vm2, %v15944_v14 }
 0x518   : > { %14590 = vmatprep.subr.mxu1 %v15944_v14  ;;  %14597 = vmatprep.mubr.msk.f32.mxu0 %vm15945_vm2, %v15944_v14 }
 0x51a   : > { %14583 = vmatmul.mubr.f32.vlgmr.msra.gmra.mxu1 %v1862_v36  ;;  %v2825_v36 = vsub.f32 %v2823_v60, %v2824_v21 }
 0x51b   : > { %14591 = vmatpush3.xpose.msra.mxu1 %v1825_v39  ;;  %14592 = vmatprep.mubr.msk.f32.mxu1 %vm15945_vm2, %v15944_v14 }
 0x51c   : > { %14600 = vmatprep.subr.mxu1 %v15944_v14  ;;  %v2826_v39 = vand.u32 4294901760, %v2825_v36 }
 0x51e   : > { %14593 = vmatmul.mubr.f32.vlgmr.msra.gmra.mxu1 %v1860_v62 }
 0x51f   : > { %14602 = vmatprep.mubr.msk.f32.mxu1 %vm15945_vm2, %v15944_v14 }
 0x5ce   : > { %v1866_v58 = vpop.f32.mrf.mxu0 }
 0x5d0   : > { %v14569_v47 = vpop.f32.mrf.mxu0 }
 0x5d2   : > { %v2016_v29 = vpop.f32.mrf.mxu0 }
 0x5d4   : > { %v14579_v12 = vpop.f32.mrf.mxu0 }
 0x5d6   : > { %v1942_v44 = vpop.f32.mrf.mxu1  ;;  %v2164_v33 = vpop.f32.mrf.mxu0 }
 0x5d7   : > { %v1943_v61 = vadd.f32 %v1942_v44, %v1866_v58 }
 0x5d8   : > { %v14574_v51 = vpop.f32.mrf.mxu1  ;;  %v14589_v52 = vpop.f32.mrf.mxu0 }
 0x5d9   : > { %v2017_v49 = vadd.f32 %v2016_v29, %v1943_v61 }
 0x5da   : > { %v2090_v30 = vpop.f32.mrf.mxu1 }
 0x5db   : > { %v2091_v37 = vadd.f32 %v2090_v30, %v2017_v49 }
 0x5dc   : > { %v14584_v27 = vpop.f32.mrf.mxu1 }
 0x5dd   : > { %v2165_v1 = vadd.f32 %v2164_v33, %v2091_v37 }
 0x5de   : > { %v2236_v18 = vpop.f32.mrf.mxu1 }
 0x5df   : > { %v2237_v23 = vadd.f32 %v2236_v18, %v2165_v1 }
 0x5e0   : > { %v14594_v25 = vpop.f32.mrf.mxu1 }
 0x5e1   : > { %v2241_v31 = vsel %vm2240_vm5, %v2237_v23, -inf }
 0x5e2   : > { %2242 = vmax.xlane.f32.xlu1 %v2241_v31 }
 0x66b   : > { %v2243_v63 = vpop.xlane.xlu1 %2242 }
 0x66c   : > { %v2244_v35 = vsub.f32 %v2237_v23, %v2243_v63 }
 0x66e   : > { %v2245_v43 = vmul.f32 1.442695, %v2244_v35 }
 0x670   : > { %15889 = vpow2.f32 %v2245_v43 }
 0x67d   : > { %v15890_v40 = vpop.eup %15889 }
 0x67e   : > { %v2247_v7 = vsel %vm2240_vm5, %v15890_v40, 0.0 }
 0x67f   : > { %2248 = vadd.xlane.f32.xlu1 %v2247_v7 }
 0x690   : > { %2252 = vrot.lane.b32.xlu1 %v16890_v28, %s15948_s20 }
 0x694   : > { %2707 = vrot.lane.b32.xlu1 %v16890_v28, %s15949_s21 }
 0x708   : > { %v2249_v45 = vpop.xlane.xlu1 %2248 }
 0x709   : > { %15891 = vrcp.f32 %v2249_v45 }
 0x70c   : > { %v2253_v59 = vpop.permute.xlu1 %2252 }
 0x70d   : > { %v2259_v3 = vsel %vm2258_vm6, %v2253_v59, 0 }
 0x70e   : > { %v2292_v9 = vand.u32 4294901760, %v2259_v3 }
 0x710   : > { %v2369_v11 = vsub.f32 %v2259_v3, %v2292_v9  ;;  %14596 = vmatpush3.msra.mxu0 %v2292_v9  ;;  %v2708_v8 = vpop.permute.xlu1 %2707 }
 0x711   : > { %14605 = vmatprep.subr.mxu0 %v15944_v14  ;;  %v2711_v6 = vsel %vm1789_vm4, %v2708_v8, 0 }
 0x712   : > { %v2370_v15 = vand.u32 4294901760, %v2369_v11  ;;  %v2781_v62 = vand.u32 4294901760, %v2711_v6 }
 0x714   : > { %v2371_v17 = vsub.f32 %v2369_v11, %v2370_v15  ;;  %v2782_v41 = vsub.f32 %v2711_v6, %v2781_v62 }
 0x716   : > { %v15892_v22 = vpop.eup %15891  ;;  %v2372_v34 = vand.u32 4294901760, %v2371_v17  ;;  %v2783_v13 = vand.u32 4294901760, %v2782_v41 }
 0x717   : > { %v2251_v32 = vmul.f32 %v15892_v22, %v15890_v40 }
 0x718   : > { %14601 = vmatpush3.msra.mxu1 %v2372_v34  ;;  %v2784_v26 = vsub.f32 %v2782_v41, %v2783_v13 }
 0x719   : > { %14610 = vmatprep.subr.mxu1 %v15944_v14  ;;  %v2256_v42 = vsel %vm2254_vm7, %v2251_v32, 0 }
 0x71a   : > { %v2327_v20 = vand.u32 4294901760, %v2256_v42  ;;  %v2785_v38 = vand.u32 4294901760, %v2784_v26 }
 0x71c   : > { %v2328_v46 = vsub.f32 %v2256_v42, %v2327_v20  ;;  %14603 = vmatmul.mubr.f32.vlgmr.msra.gmra.mxu1 %v2327_v20 }
 0x71d   : > { %14611 = vmatpush3.msra.mxu1 %v2292_v9  ;;  %14612 = vmatprep.mubr.msk.f32.mxu1 %vm15945_vm2, %v15944_v14 }
 0x71e   : > { %14620 = vmatprep.subr.mxu1 %v15944_v14  ;;  %v2329_v19 = vand.u32 4294901760, %v2328_v46 }
 0x720   : > { %14613 = vmatmul.mubr.f32.vlgmr.msra.gmra.mxu1 %v2329_v19  ;;  %v2330_v57 = vsub.f32 %v2328_v46, %v2329_v19 }
 0x721   : > { %14621 = vmatpush3.msra.mxu1 %v2292_v9  ;;  %14622 = vmatprep.mubr.msk.f32.mxu1 %vm15945_vm2, %v15944_v14 }
 0x722   : > { %14630 = vmatprep.subr.mxu1 %v15944_v14  ;;  %v2331_v50 = vand.u32 4294901760, %v2330_v57 }
 0x724   : > { %14598 = vmatmul.mubr.f32.vlgmr.msra.gmra.mxu0 %v2331_v50  ;;  %14623 = vmatmul.mubr.f32.vlgmr.msra.gmra.mxu1 %v2327_v20 }
 0x725   : > { %14606 = vmatpush3.msra.mxu0 %v2369_v11  ;;  %14631 = vmatpush3.xpose.msra.mxu1 %v2826_v39 }
 0x726   : > { %14607 = vmatprep.mubr.msk.f32.mxu0 %vm15945_vm2, %v15944_v14  ;;  %14615 = vmatprep.subr.mxu0 %v15944_v14 }
 0x727   : > { %14632 = vmatprep.mubr.msk.f32.mxu1 %vm15945_vm2, %v15944_v14  ;;  %14640 = vmatprep.subr.mxu1 %v15944_v14 }
 0x728   : > { %14608 = vmatmul.mubr.f32.vlgmr.msra.gmra.mxu0 %v2328_v46  ;;  %14633 = vmatmul.mubr.f32.vlgmr.msra.gmra.mxu1 %v2781_v62 }
 0x729   : > { %14616 = vmatpush3.msra.mxu0 %v2370_v15  ;;  %14641 = vmatpush3.xpose.msra.mxu1 %v2746_v16 }
 0x72a   : > { %14617 = vmatprep.mubr.msk.f32.mxu0 %vm15945_vm2, %v15944_v14  ;;  %14625 = vmatprep.subr.mxu0 %v15944_v14 }
 0x72b   : > { %14642 = vmatprep.mubr.msk.f32.mxu1 %vm15945_vm2, %v15944_v14  ;;  %14650 = vmatprep.subr.mxu1 %v15944_v14 }
 0x72c   : > { %14618 = vmatmul.mubr.f32.vlgmr.msra.gmra.mxu0 %v2327_v20  ;;  %14643 = vmatmul.mubr.f32.vlgmr.msra.gmra.mxu1 %v2783_v13 }
 0x72d   : > { %14626 = vmatpush3.xpose.msra.mxu0 %v2746_v16  ;;  %14651 = vmatpush3.xpose.msra.mxu1 %v2746_v16 }
 0x72e   : > { %14627 = vmatprep.mubr.msk.f32.mxu0 %vm15945_vm2, %v15944_v14  ;;  %14635 = vmatprep.subr.mxu0 %v15944_v14 }
 0x72f   : > { %14652 = vmatprep.mubr.msk.f32.mxu1 %vm15945_vm2, %v15944_v14  ;;  %14660 = vmatprep.subr.mxu1 %v15944_v14 }
 0x730   : > { %14628 = vmatmul.mubr.f32.vlgmr.msra.gmra.mxu0 %v2785_v38  ;;  %14653 = vmatmul.mubr.f32.vlgmr.msra.gmra.mxu1 %v2781_v62 }
 0x731   : > { %14636 = vmatpush3.xpose.msra.mxu0 %v2823_v60  ;;  %14637 = vmatprep.mubr.msk.f32.mxu0 %vm15945_vm2, %v15944_v14 }
 0x732   : > { %14645 = vmatprep.subr.mxu0 %v15944_v14  ;;  %14662 = vmatprep.mubr.msk.f32.mxu1 %vm15945_vm2, %v15944_v14 }
 0x734   : > { %14638 = vmatmul.mubr.f32.vlgmr.msra.gmra.mxu0 %v2782_v41 }
 0x735   : > { %14646 = vmatpush3.xpose.msra.mxu0 %v2824_v21  ;;  %14647 = vmatprep.mubr.msk.f32.mxu0 %vm15945_vm2, %v15944_v14 }
 0x736   : > { %14655 = vmatprep.subr.mxu0 %v15944_v14 }
 0x738   : > { %14648 = vmatmul.mubr.f32.vlgmr.msra.gmra.mxu0 %v2781_v62 }
 0x739   : > { %14657 = vmatprep.mubr.msk.f32.mxu0 %vm15945_vm2, %v15944_v14 }
 0x7dc   : > { %v2409_v48 = vpop.f32.mrf.mxu1 }
 0x7de   : > { %v14604_v24 = vpop.f32.mrf.mxu1 }
 0x7e0   : > { %v2557_v58 = vpop.f32.mrf.mxu1 }
 0x7e2   : > { %v14614_v47 = vpop.f32.mrf.mxu1 }
 0x7e4   : > { %v2333_v29 = vpop.f32.mrf.mxu0  ;;  %v2703_v12 = vpop.f32.mrf.mxu1 }
 0x7e5   : > { %v2410_v44 = vadd.f32 %v2409_v48, %v2333_v29 }
 0x7e6   : > { %v14599_v33 = vpop.f32.mrf.mxu0  ;;  %v14624_v61 = vpop.f32.mrf.mxu1 }
 0x7e8   : > { %v2483_v51 = vpop.f32.mrf.mxu0  ;;  %v2863_v52 = vpop.f32.mrf.mxu1 }
 0x7e9   : > { %v2484_v49 = vadd.f32 %v2483_v51, %v2410_v44 }
 0x7ea   : > { %v14609_v30 = vpop.f32.mrf.mxu0  ;;  %v14634_v37 = vpop.f32.mrf.mxu1 }
 0x7eb   : > { %v2558_v27 = vadd.f32 %v2557_v58, %v2484_v49 }
 0x7ec   : > { %v2631_v1 = vpop.f32.mrf.mxu0  ;;  %v3011_v18 = vpop.f32.mrf.mxu1 }
 0x7ed   : > { %v2632_v23 = vadd.f32 %v2631_v1, %v2558_v27 }
 0x7ee   : > { %v14619_v25 = vpop.f32.mrf.mxu0  ;;  %v14644_v31 = vpop.f32.mrf.mxu1 }
 0x7ef   : > { %v16963_v63 = vadd.f32 %v2703_v12, %v2632_v23 }
 0x7f0   : > { %v2787_v35 = vpop.f32.mrf.mxu0  ;;  %v3157_v43 = vpop.f32.mrf.mxu1 }
 0x7f1   : > { %v2864_v45 = vadd.f32 %v2863_v52, %v2787_v35 }
 0x7f2   : > { %v14629_v40 = vpop.f32.mrf.mxu0  ;;  %v14654_v7 = vpop.f32.mrf.mxu1 }
 0x7f4   : > { %v2937_v59 = vpop.f32.mrf.mxu0 }
 0x7f5   : > { %v2938_v0 = vadd.f32 %v2937_v59, %v2864_v45 }
 0x7f6   : > { %v14639_v3 = vpop.f32.mrf.mxu0 }
 0x7f7   : > { %v3012_v9 = vadd.f32 %v3011_v18, %v2938_v0 }
 0x7f8   : > { %v3085_v10 = vpop.f32.mrf.mxu0 }
 0x7f9   : > { %v3086_v11 = vadd.f32 %v3085_v10, %v3012_v9 }
 0x7fa   : > { %v14649_v15 = vpop.f32.mrf.mxu0 }
 0x7fb   : > { %v3158_v16 = vadd.f32 %v3157_v43, %v3086_v11 }
 0x7fd   : > { %v3161_v17 = vsel %vm2240_vm5, %v3158_v16, -inf }
 0x7fe   : > { %3162 = vmax.xlane.f32.xlu0 %v3161_v17 }
 0x814   : > { %3172 = vrot.lane.b32.xlu0 %v16890_v28, %s15950_s22 }
 0x818   : > { %3625 = vrot.lane.b32.xlu0 %v16890_v28, %s15951_s23 }
 0x887   : > { %v3163_v22 = vpop.xlane.xlu0 %3162 }
 0x888   : > { %v3164_v34 = vsub.f32 %v3158_v16, %v3163_v22 }
 0x88a   : > { %v3165_v60 = vmul.f32 1.442695, %v3164_v34 }
 0x88b   : > { %v3173_v32 = vpop.permute.xlu0 %3172 }
 0x88c   : > { %15893 = vpow2.f32 %v3165_v60  ;;  %v3177_v8 = vsel %vm2258_vm6, %v3173_v32, 0 }
 0x88d   : > { %v3210_v42 = vand.u32 4294901760, %v3177_v8 }
 0x88f   : > { %v3287_v20 = vsub.f32 %v3177_v8, %v3210_v42  ;;  %14656 = vmatpush3.msra.mxu0 %v3210_v42  ;;  %v3626_v38 = vpop.permute.xlu0 %3625 }
 0x890   : > { %14665 = vmatprep.subr.mxu0 %v15944_v14  ;;  %v3629_v58 = vsel %vm1789_vm4, %v3626_v38, 0 }
 0x891   : > { %v3288_v21 = vand.u32 4294901760, %v3287_v20  ;;  %v3699_v12 = vand.u32 4294901760, %v3629_v58 }
 0x893   : > { %v3289_v6 = vsub.f32 %v3287_v20, %v3288_v21  ;;  %v3700_v51 = vsub.f32 %v3629_v58, %v3699_v12 }
 0x895   : > { %v3290_v46 = vand.u32 4294901760, %v3289_v6  ;;  %v3701_v30 = vand.u32 4294901760, %v3700_v51 }
 0x897   : > { %14661 = vmatpush3.msra.mxu1 %v3290_v46  ;;  %v3702_v37 = vsub.f32 %v3700_v51, %v3701_v30 }
 0x898   : > { %14670 = vmatprep.subr.mxu1 %v15944_v14 }
 0x899   : > { %v15894_v62 = vpop.eup %15893  ;;  %v3703_v27 = vand.u32 4294901760, %v3702_v37 }
 0x89a   : > { %v3167_v19 = vsel %vm2240_vm5, %v15894_v62, 0.0 }
 0x89b   : > { %3168 = vadd.xlane.f32.xlu1 %v3167_v19 }
 0x8ac   : > { %3627 = vrot.lane.b32.xlu1 %v16890_v28, %s15952_s24 }
 0x924   : > { %v3169_v36 = vpop.xlane.xlu1 %3168 }
 0x925   : > { %15895 = vrcp.f32 %v3169_v36 }
 0x928   : > { %v3628_v57 = vpop.permute.xlu1 %3627 }
 0x929   : > { %v3631_v41 = vsel %vm1789_vm4, %v3628_v57, 0 }
 0x92a   : > { %v3664_v50 = vand.u32 4294901760, %v3631_v41 }
 0x92c   : > { %v3741_v13 = vsub.f32 %v3631_v41, %v3664_v50 }
 0x92e   : > { %v3742_v47 = vand.u32 4294901760, %v3741_v13 }
 0x930   : > { %v3743_v33 = vsub.f32 %v3741_v13, %v3742_v47 }
 0x932   : > { %v15896_v39 = vpop.eup %15895  ;;  %v3744_v49 = vand.u32 4294901760, %v3743_v33 }
 0x933   : > { %v3171_v26 = vmul.f32 %v15896_v39, %v15894_v62 }
 0x935   : > { %v3175_v48 = vsel %vm2254_vm7, %v3171_v26, 0 }
 0x936   : > { %v3245_v24 = vand.u32 4294901760, %v3175_v48 }
 0x938   : > { %v3246_v29 = vsub.f32 %v3175_v48, %v3245_v24  ;;  %14663 = vmatmul.mubr.f32.vlgmr.msra.gmra.mxu1 %v3245_v24 }
 0x939   : > { %14671 = vmatpush3.msra.mxu1 %v3210_v42  ;;  %14672 = vmatprep.mubr.msk.f32.mxu1 %vm15945_vm2, %v15944_v14 }
 0x93a   : > { %14680 = vmatprep.subr.mxu1 %v15944_v14  ;;  %v3247_v44 = vand.u32 4294901760, %v3246_v29 }
 0x93c   : > { %14673 = vmatmul.mubr.f32.vlgmr.msra.gmra.mxu1 %v3247_v44  ;;  %v3248_v61 = vsub.f32 %v3246_v29, %v3247_v44 }
 0x93d   : > { %14681 = vmatpush3.msra.mxu1 %v3210_v42  ;;  %14682 = vmatprep.mubr.msk.f32.mxu1 %vm15945_vm2, %v15944_v14 }
 0x93e   : > { %14690 = vmatprep.subr.mxu1 %v15944_v14  ;;  %v3249_v52 = vand.u32 4294901760, %v3248_v61 }
 0x940   : > { %14658 = vmatmul.mubr.f32.vlgmr.msra.gmra.mxu0 %v3249_v52  ;;  %14683 = vmatmul.mubr.f32.vlgmr.msra.gmra.mxu1 %v3245_v24 }
 0x941   : > { %14666 = vmatpush3.msra.mxu0 %v3287_v20  ;;  %14691 = vmatpush3.xpose.msra.mxu1 %v3744_v49 }
 0x942   : > { %14667 = vmatprep.mubr.msk.f32.mxu0 %vm15945_vm2, %v15944_v14  ;;  %14675 = vmatprep.subr.mxu0 %v15944_v14 }
 0x943   : > { %14692 = vmatprep.mubr.msk.f32.mxu1 %vm15945_vm2, %v15944_v14  ;;  %14700 = vmatprep.subr.mxu1 %v15944_v14 }
 0x944   : > { %14668 = vmatmul.mubr.f32.vlgmr.msra.gmra.mxu0 %v3246_v29  ;;  %14693 = vmatmul.mubr.f32.vlgmr.msra.gmra.mxu1 %v3699_v12 }
 0x945   : > { %14676 = vmatpush3.msra.mxu0 %v3288_v21  ;;  %14701 = vmatpush3.xpose.msra.mxu1 %v3664_v50 }
 0x946   : > { %14677 = vmatprep.mubr.msk.f32.mxu0 %vm15945_vm2, %v15944_v14  ;;  %14685 = vmatprep.subr.mxu0 %v15944_v14 }
 0x947   : > { %14702 = vmatprep.mubr.msk.f32.mxu1 %vm15945_vm2, %v15944_v14  ;;  %14710 = vmatprep.subr.mxu1 %v15944_v14 }
 0x948   : > { %14678 = vmatmul.mubr.f32.vlgmr.msra.gmra.mxu0 %v3245_v24  ;;  %14703 = vmatmul.mubr.f32.vlgmr.msra.gmra.mxu1 %v3701_v30 }
 0x949   : > { %14686 = vmatpush3.xpose.msra.mxu0 %v3664_v50  ;;  %14711 = vmatpush3.xpose.msra.mxu1 %v3664_v50 }
 0x94a   : > { %14687 = vmatprep.mubr.msk.f32.mxu0 %vm15945_vm2, %v15944_v14  ;;  %14695 = vmatprep.subr.mxu0 %v15944_v14 }
 0x94b   : > { %14712 = vmatprep.mubr.msk.f32.mxu1 %vm15945_vm2, %v15944_v14  ;;  %14720 = vmatprep.subr.mxu1 %v15944_v14 }
 0x94c   : > { %14688 = vmatmul.mubr.f32.vlgmr.msra.gmra.mxu0 %v3703_v27  ;;  %14713 = vmatmul.mubr.f32.vlgmr.msra.gmra.mxu1 %v3699_v12 }
 0x94d   : > { %14696 = vmatpush3.xpose.msra.mxu0 %v3741_v13  ;;  %14697 = vmatprep.mubr.msk.f32.mxu0 %vm15945_vm2, %v15944_v14 }
 0x94e   : > { %14705 = vmatprep.subr.mxu0 %v15944_v14  ;;  %14722 = vmatprep.mubr.msk.f32.mxu1 %vm15945_vm2, %v15944_v14 }
 0x950   : > { %14698 = vmatmul.mubr.f32.vlgmr.msra.gmra.mxu0 %v3700_v51 }
 0x951   : > { %14706 = vmatpush3.xpose.msra.mxu0 %v3742_v47  ;;  %14707 = vmatprep.mubr.msk.f32.mxu0 %vm15945_vm2, %v15944_v14 }
 0x952   : > { %14715 = vmatprep.subr.mxu0 %v15944_v14 }
 0x954   : > { %14708 = vmatmul.mubr.f32.vlgmr.msra.gmra.mxu0 %v3699_v12 }
 0x955   : > { %14717 = vmatprep.mubr.msk.f32.mxu0 %vm15945_vm2, %v15944_v14 }
 0x9f8   : > { %v3327_v1 = vpop.f32.mrf.mxu1 }
 0x9fa   : > { %v14664_v18 = vpop.f32.mrf.mxu1 }
 0x9fc   : > { %v3475_v23 = vpop.f32.mrf.mxu1 }
 0x9fe   : > { %v14674_v25 = vpop.f32.mrf.mxu1 }
 0xa00   : > { %v3251_v31 = vpop.f32.mrf.mxu0  ;;  %v3621_v35 = vpop.f32.mrf.mxu1 }
 0xa01   : > { %v3328_v43 = vadd.f32 %v3327_v1, %v3251_v31 }
 0xa02   : > { %v14659_v40 = vpop.f32.mrf.mxu0  ;;  %v14684_v7 = vpop.f32.mrf.mxu1 }
 0xa04   : > { %v3401_v45 = vpop.f32.mrf.mxu0  ;;  %v3781_v59 = vpop.f32.mrf.mxu1 }
 0xa05   : > { %v3402_v0 = vadd.f32 %v3401_v45, %v3328_v43 }
 0xa06   : > { %v14669_v3 = vpop.f32.mrf.mxu0  ;;  %v14694_v9 = vpop.f32.mrf.mxu1 }
 0xa07   : > { %v3476_v10 = vadd.f32 %v3475_v23, %v3402_v0 }
 0xa08   : > { %v3549_v11 = vpop.f32.mrf.mxu0  ;;  %v3929_v15 = vpop.f32.mrf.mxu1 }
 0xa09   : > { %v3550_v16 = vadd.f32 %v3549_v11, %v3476_v10 }
 0xa0a   : > { %v14679_v17 = vpop.f32.mrf.mxu0  ;;  %v14704_v22 = vpop.f32.mrf.mxu1 }
 0xa0b   : > { %v17013_v34 = vadd.f32 %v3621_v35, %v3550_v16 }
 0xa0c   : > { %v3705_v60 = vpop.f32.mrf.mxu0  ;;  %v4075_v32 = vpop.f32.mrf.mxu1 }
 0xa0d   : > { %v3782_v20 = vadd.f32 %v3781_v59, %v3705_v60 }
 0xa0e   : > { %v14689_v8 = vpop.f32.mrf.mxu0  ;;  %v14714_v42 = vpop.f32.mrf.mxu1 }
 0xa10   : > { %v3855_v21 = vpop.f32.mrf.mxu0 }
 0xa11   : > { %v3856_v6 = vadd.f32 %v3855_v21, %v3782_v20 }
 0xa12   : > { %v14699_v46 = vpop.f32.mrf.mxu0 }
 0xa13   : > { %v3930_v62 = vadd.f32 %v3929_v15, %v3856_v6 }
 0xa14   : > { %v4003_v19 = vpop.f32.mrf.mxu0 }
 0xa15   : > { %v4004_v36 = vadd.f32 %v4003_v19, %v3930_v62 }
 0xa16   : > { %v14709_v57 = vpop.f32.mrf.mxu0 }
 0xa17   : > { %v4076_v41 = vadd.f32 %v4075_v32, %v4004_v36 }
 0xa19   : > { %v4079_v50 = vsel %vm2240_vm5, %v4076_v41, -inf }
 0xa1a   : > { %4080 = vmax.xlane.f32.xlu1 %v4079_v50 }
 0xa2b   : > { %4545 = vrot.lane.b32.xlu1 %v16890_v28, %s15953_s25 }
 0xa2f   : > { %4543 = vrot.lane.b32.xlu1 %v16890_v28, %s15954_s26 }
 0xaa3   : > { %v4081_v39 = vpop.xlane.xlu1 %4080 }
 0xaa4   : > { %v4082_v13 = vsub.f32 %v4076_v41, %v4081_v39 }
 0xaa6   : > { %v4083_v26 = vmul.f32 1.442695, %v4082_v13 }
 0xaa7   : > { %v4546_v47 = vpop.permute.xlu1 %4545 }
 0xaa8   : > { %15897 = vpow2.f32 %v4083_v26  ;;  %v4549_v44 = vsel %vm1789_vm4, %v4546_v47, 0 }
 0xaa9   : > { %v4582_v51 = vand.u32 4294901760, %v4549_v44 }
 0xaab   : > { %v4659_v37 = vsub.f32 %v4549_v44, %v4582_v51  ;;  %v4544_v1 = vpop.permute.xlu1 %4543 }
 0xaac   : > { %v4547_v31 = vsel %vm1789_vm4, %v4544_v1, 0 }
 0xaad   : > { %v4660_v25 = vand.u32 4294901760, %v4659_v37  ;;  %v4617_v43 = vand.u32 4294901760, %v4547_v31 }
 0xaaf   : > { %v4661_v7 = vsub.f32 %v4659_v37, %v4660_v25  ;;  %v4618_v59 = vsub.f32 %v4547_v31, %v4617_v43 }
 0xab1   : > { %v4662_v3 = vand.u32 4294901760, %v4661_v7  ;;  %v4619_v9 = vand.u32 4294901760, %v4618_v59 }
 0xab3   : > { %v4620_v10 = vsub.f32 %v4618_v59, %v4619_v9 }
 0xab5   : > { %v15898_v38 = vpop.eup %15897  ;;  %v4621_v11 = vand.u32 4294901760, %v4620_v10 }
 0xab6   : > { %v4085_v48 = vsel %vm2240_vm5, %v15898_v38, 0.0 }
 0xab7   : > { %4086 = vadd.xlane.f32.xlu0 %v4085_v48 }
 0xacd   : > { %4090 = vrot.lane.b32.xlu0 %v16890_v28, %s15955_s27 }
 0xb40   : > { %v4087_v24 = vpop.xlane.xlu0 %4086 }
 0xb41   : > { %15899 = vrcp.f32 %v4087_v24 }
 0xb44   : > { %v4091_v58 = vpop.permute.xlu0 %4090 }
 0xb45   : > { %v4095_v29 = vsel %vm2258_vm6, %v4091_v58, 0 }
 0xb46   : > { %v4128_v12 = vand.u32 4294901760, %v4095_v29 }
 0xb48   : > { %v4205_v33 = vsub.f32 %v4095_v29, %v4128_v12  ;;  %14716 = vmatpush3.msra.mxu0 %v4128_v12 }
 0xb49   : > { %14725 = vmatprep.subr.mxu0 %v15944_v14 }
 0xb4a   : > { %v4206_v61 = vand.u32 4294901760, %v4205_v33 }
 0xb4c   : > { %v4207_v52 = vsub.f32 %v4205_v33, %v4206_v61 }
 0xb4e   : > { %v15900_v49 = vpop.eup %15899  ;;  %v4208_v30 = vand.u32 4294901760, %v4207_v52 }
 0xb4f   : > { %v4089_v27 = vmul.f32 %v15900_v49, %v15898_v38 }
 0xb50   : > { %14721 = vmatpush3.msra.mxu1 %v4208_v30 }
 0xb51   : > { %14730 = vmatprep.subr.mxu1 %v15944_v14  ;;  %v4093_v18 = vsel %vm2254_vm7, %v4089_v27, 0 }
 0xb52   : > { %v4163_v23 = vand.u32 4294901760, %v4093_v18 }
 0xb54   : > { %v4164_v35 = vsub.f32 %v4093_v18, %v4163_v23  ;;  %14723 = vmatmul.mubr.f32.vlgmr.msra.gmra.mxu1 %v4163_v23 }
 0xb55   : > { %14731 = vmatpush3.msra.mxu1 %v4128_v12  ;;  %14732 = vmatprep.mubr.msk.f32.mxu1 %vm15945_vm2, %v15944_v14 }
 0xb56   : > { %14740 = vmatprep.subr.mxu1 %v15944_v14  ;;  %v4165_v40 = vand.u32 4294901760, %v4164_v35 }
 0xb58   : > { %14733 = vmatmul.mubr.f32.vlgmr.msra.gmra.mxu1 %v4165_v40  ;;  %v4166_v45 = vsub.f32 %v4164_v35, %v4165_v40 }
 0xb59   : > { %14741 = vmatpush3.msra.mxu1 %v4128_v12  ;;  %14742 = vmatprep.mubr.msk.f32.mxu1 %vm15945_vm2, %v15944_v14 }
 0xb5a   : > { %14750 = vmatprep.subr.mxu1 %v15944_v14  ;;  %v4167_v0 = vand.u32 4294901760, %v4166_v45 }
 0xb5c   : > { %14718 = vmatmul.mubr.f32.vlgmr.msra.gmra.mxu0 %v4167_v0  ;;  %14743 = vmatmul.mubr.f32.vlgmr.msra.gmra.mxu1 %v4163_v23 }
 0xb5d   : > { %14726 = vmatpush3.msra.mxu0 %v4205_v33  ;;  %14751 = vmatpush3.xpose.msra.mxu1 %v4662_v3 }
 0xb5e   : > { %14727 = vmatprep.mubr.msk.f32.mxu0 %vm15945_vm2, %v15944_v14  ;;  %14735 = vmatprep.subr.mxu0 %v15944_v14 }
 0xb5f   : > { %14752 = vmatprep.mubr.msk.f32.mxu1 %vm15945_vm2, %v15944_v14  ;;  %14760 = vmatprep.subr.mxu1 %v15944_v14 }
 0xb60   : > { %14728 = vmatmul.mubr.f32.vlgmr.msra.gmra.mxu0 %v4164_v35  ;;  %14753 = vmatmul.mubr.f32.vlgmr.msra.gmra.mxu1 %v4617_v43 }
 0xb61   : > { %14736 = vmatpush3.msra.mxu0 %v4206_v61  ;;  %14761 = vmatpush3.xpose.msra.mxu1 %v4582_v51 }
 0xb62   : > { %14737 = vmatprep.mubr.msk.f32.mxu0 %vm15945_vm2, %v15944_v14  ;;  %14745 = vmatprep.subr.mxu0 %v15944_v14 }
 0xb63   : > { %14762 = vmatprep.mubr.msk.f32.mxu1 %vm15945_vm2, %v15944_v14  ;;  %14770 = vmatprep.subr.mxu1 %v15944_v14 }
 0xb64   : > { %14738 = vmatmul.mubr.f32.vlgmr.msra.gmra.mxu0 %v4163_v23  ;;  %14763 = vmatmul.mubr.f32.vlgmr.msra.gmra.mxu1 %v4619_v9 }
 0xb65   : > { %14746 = vmatpush3.xpose.msra.mxu0 %v4582_v51  ;;  %14771 = vmatpush3.xpose.msra.mxu1 %v4582_v51 }
 0xb66   : > { %14747 = vmatprep.mubr.msk.f32.mxu0 %vm15945_vm2, %v15944_v14  ;;  %14755 = vmatprep.subr.mxu0 %v15944_v14 }
 0xb67   : > { %14772 = vmatprep.mubr.msk.f32.mxu1 %vm15945_vm2, %v15944_v14  ;;  %14780 = vmatprep.subr.mxu1 %v15944_v14 }
 0xb68   : > { %14748 = vmatmul.mubr.f32.vlgmr.msra.gmra.mxu0 %v4621_v11  ;;  %14773 = vmatmul.mubr.f32.vlgmr.msra.gmra.mxu1 %v4617_v43 }
 0xb69   : > { %14756 = vmatpush3.xpose.msra.mxu0 %v4659_v37  ;;  %14757 = vmatprep.mubr.msk.f32.mxu0 %vm15945_vm2, %v15944_v14 }
 0xb6a   : > { %14765 = vmatprep.subr.mxu0 %v15944_v14  ;;  %14782 = vmatprep.mubr.msk.f32.mxu1 %vm15945_vm2, %v15944_v14 }
 0xb6c   : > { %14758 = vmatmul.mubr.f32.vlgmr.msra.gmra.mxu0 %v4618_v59 }
 0xb6d   : > { %14766 = vmatpush3.xpose.msra.mxu0 %v4660_v25  ;;  %14767 = vmatprep.mubr.msk.f32.mxu0 %vm15945_vm2, %v15944_v14 }
 0xb6e   : > { %14775 = vmatprep.subr.mxu0 %v15944_v14 }
 0xb70   : > { %14768 = vmatmul.mubr.f32.vlgmr.msra.gmra.mxu0 %v4617_v43 }
 0xb71   : > { %14777 = vmatprep.mubr.msk.f32.mxu0 %vm15945_vm2, %v15944_v14 }
 0xc14   : > { %v4245_v15 = vpop.f32.mrf.mxu1 }
 0xc16   : > { %v14724_v16 = vpop.f32.mrf.mxu1 }
 0xc17   : > { %v5481_v16 = vld [vmem:[%s18855_s5 + $0x18] sm:$0xff] }
 0xc18   : > { %v4393_v17 = vpop.f32.mrf.mxu1 }
 0xc1a   : > { %v14734_v22 = vpop.f32.mrf.mxu1 }
 0xc1b   : > { %v17096_v22 = vand.u32 4294901760, %v5481_v16 }
 0xc1c   : > { %v4169_v60 = vpop.f32.mrf.mxu0  ;;  %v4539_v32 = vpop.f32.mrf.mxu1 }
 0xc1d   : > { %v4246_v61 = vadd.f32 %v4245_v15, %v4169_v60 }
 0xc1e   : > { %v14719_v8 = vpop.f32.mrf.mxu0  ;;  %v14744_v42 = vpop.f32.mrf.mxu1 }
 0xc20   : > { %v4319_v20 = vpop.f32.mrf.mxu0  ;;  %v4699_v21 = vpop.f32.mrf.mxu1 }
 0xc21   : > { %v4320_v51 = vadd.f32 %v4319_v20, %v4246_v61 }
 0xc22   : > { %v14729_v6 = vpop.f32.mrf.mxu0  ;;  %v14754_v46 = vpop.f32.mrf.mxu1 }
 0xc23   : > { %v4394_v52 = vadd.f32 %v4393_v17, %v4320_v51  ;;  %v5480_v17 = vld [vmem:[%s18855_s5 + $0x10] sm:$0xff] }
 0xc24   : > { %v4467_v62 = vpop.f32.mrf.mxu0  ;;  %v4847_v19 = vpop.f32.mrf.mxu1  ;;  %v17098_v60 = vand.u32 4294901760, %v5480_v17 }
 0xc25   : > { %v4468_v49 = vadd.f32 %v4467_v62, %v4394_v52 }
 0xc26   : > { %v14739_v36 = vpop.f32.mrf.mxu0  ;;  %v14764_v57 = vpop.f32.mrf.mxu1  ;;  %v17104_v8 = vsub.f32 %v5480_v17, %v17098_v60 }
 0xc27   : > { %v4540_v30 = vadd.f32 %v4539_v32, %v4468_v49  ;;  %v17101_v32 = vsub.f32 %v5481_v16, %v17096_v22 }
 0xc28   : > { %v4623_v41 = vpop.f32.mrf.mxu0  ;;  %v4993_v50 = vpop.f32.mrf.mxu1  ;;  %v5598_v20 = vand.u32 4294901760, %v17104_v8 }
 0xc29   : > { %v4700_v26 = vadd.f32 %v4699_v21, %v4623_v41  ;;  %v5591_v42 = vand.u32 4294901760, %v17101_v32  ;;  %v5478_v41 = vld [vmem:[%s18855_s5] sm:$0xff] }
 0xc2a   : > { %v14749_v39 = vpop.f32.mrf.mxu0  ;;  %v14774_v13 = vpop.f32.mrf.mxu1  ;;  %v5599_v6 = vsub.f32 %v17104_v8, %v5598_v20 }
 0xc2b   : > { %v5592_v21 = vsub.f32 %v17101_v32, %v5591_v42  ;;  %v17131_v39 = vand.u32 4294901760, %v5478_v41 }
 0xc2c   : > { %v4773_v38 = vpop.f32.mrf.mxu0  ;;  %v5600_v62 = vand.u32 4294901760, %v5599_v6 }
 0xc2d   : > { %v4774_v48 = vadd.f32 %v4773_v38, %v4700_v26  ;;  %v5593_v46 = vand.u32 4294901760, %v5592_v21  ;;  %v17137_v38 = vsub.f32 %v5478_v41, %v17131_v39  ;;  %v15933_v41 = vld [vmem:[%s18853_s3] sm:$0xff] }
 0xc2e   : > { %v14759_v24 = vpop.f32.mrf.mxu0 }
 0xc2f   : > { %v4848_v58 = vadd.f32 %v4847_v19, %v4774_v48  ;;  %v5479_v19 = vld [vmem:[%s18855_s5 + $0x8] sm:$0xff] }
 0xc30   : > { %v4921_v47 = vpop.f32.mrf.mxu0  ;;  %v17123_v36 = vand.u32 4294901760, %v5479_v19 }
 0xc31   : > { %v4922_v29 = vadd.f32 %v4921_v47, %v4848_v58  ;;  %v5612_v58 = vand.u32 4294901760, %v17137_v38 }
 0xc32   : > { %v14769_v12 = vpop.f32.mrf.mxu0 }
 0xc33   : > { %v4994_v44 = vadd.f32 %v4993_v50, %v4922_v29  ;;  %v17129_v50 = vsub.f32 %v5479_v19, %v17123_v36  ;;  %v5613_v12 = vsub.f32 %v17137_v38, %v5612_v58 }
 0xc35   : > { %v4997_v33 = vsel %vm2240_vm5, %v4994_v44, -inf  ;;  %v5605_v26 = vand.u32 4294901760, %v17129_v50  ;;  %v5614_v61 = vand.u32 4294901760, %v5613_v12  ;;  %v6000_v12 = vld [vmem:[%s18856_s6 + $0x8] sm:$0xff] }
 0xc36   : > { %4998 = vmax.xlane.f32.xlu0 %v4997_v33 }
 0xc37   : > { %v5606_v24 = vsub.f32 %v17129_v50, %v5605_v26 }
 0xc39   : > { %v5607_v29 = vand.u32 4294901760, %v5606_v24 }
 0xc4c   : > { %5008 = vrot.lane.b32.xlu0 %v16890_v28, %s15956_s28 }
 0xc50   : > { %5466 = vrot.lane.b32.xlu0 %v4540_v30, %s18931_s29 }
 0xcbf   : > { %v4999_v37 = vpop.xlane.xlu0 %4998 }
 0xcc0   : > { %v5000_v27 = vsub.f32 %v4994_v44, %v4999_v37 }
 0xcc2   : > { %v5001_v1 = vmul.f32 1.442695, %v5000_v27 }
 0xcc3   : > { %v5009_v18 = vpop.permute.xlu0 %5008 }
 0xcc4   : > { %15901 = vpow2.f32 %v5001_v1  ;;  %v5013_v23 = vsel %vm2258_vm6, %v5009_v18, 0 }
 0xcc5   : > { %v5046_v25 = vand.u32 4294901760, %v5013_v23 }
 0xcc7   : > { %v5123_v31 = vsub.f32 %v5013_v23, %v5046_v25  ;;  %14776 = vmatpush3.msra.mxu0 %v5046_v25 }
 0xcc8   : > { %14785 = vmatprep.subr.mxu0 %v15944_v14 }
 0xcc9   : > { %v5124_v35 = vand.u32 4294901760, %v5123_v31 }
 0xccb   : > { %v5125_v43 = vsub.f32 %v5123_v31, %v5124_v35 }
 0xccd   : > { %v5126_v40 = vand.u32 4294901760, %v5125_v43 }
 0xccf   : > { %14781 = vmatpush3.msra.mxu1 %v5126_v40  ;;  %v5467_v40 = vpop.permute.xlu0 %5466 }
 0xcd0   : > { %14790 = vmatprep.subr.mxu1 %v15944_v14 }
 0xcd1   : > { %v15902_v28 = vpop.eup %15901 }
 0xcd2   : > { %v5003_v7 = vsel %vm2240_vm5, %v15902_v28, 0.0 }
 0xcd3   : > { %5004 = vadd.xlane.f32.xlu1 %v5003_v7 }
 0xce4   : > { %5462 = vrot.lane.b32.xlu1 %v17013_v34, %s18930_s11 }
 0xd5c   : > { %v5005_v45 = vpop.xlane.xlu1 %5004 }
 0xd5d   : > { %15903 = vrcp.f32 %v5005_v45 }
 0xd6a   : > { %v15904_v59 = vpop.eup %15903 }
 0xd6b   : > { %v5007_v0 = vmul.f32 %v15904_v59, %v15902_v28 }
 0xd6d   : > { %v5011_v3 = vsel %vm2254_vm7, %v5007_v0, 0 }
 0xd6e   : > { %v5081_v9 = vand.u32 4294901760, %v5011_v3 }
 0xd70   : > { %v5082_v10 = vsub.f32 %v5011_v3, %v5081_v9  ;;  %14783 = vmatmul.mubr.f32.vlgmr.msra.gmra.mxu1 %v5081_v9 }
 0xd71   : > { %14791 = vmatpush3.msra.mxu1 %v5046_v25  ;;  %14792 = vmatprep.mubr.msk.f32.mxu1 %vm15945_vm2, %v15944_v14 }
 0xd72   : > { %14800 = vmatprep.subr.mxu1 %v15944_v14  ;;  %v5083_v11 = vand.u32 4294901760, %v5082_v10 }
 0xd74   : > { %14793 = vmatmul.mubr.f32.vlgmr.msra.gmra.mxu1 %v5083_v11  ;;  %v5084_v15 = vsub.f32 %v5082_v10, %v5083_v11 }
 0xd75   : > { %14801 = vmatpush3.msra.mxu1 %v5046_v25  ;;  %14802 = vmatprep.mubr.msk.f32.mxu1 %vm15945_vm2, %v15944_v14 }
 0xd76   : > { %v5085_v34 = vand.u32 4294901760, %v5084_v15  ;;  %14816 = vmatprep.subr.mxu1 %v15944_v14 }
 0xd78   : > { %14778 = vmatmul.mubr.f32.vlgmr.msra.gmra.mxu0 %v5085_v34  ;;  %14803 = vmatmul.mubr.f32.vlgmr.msra.gmra.mxu1 %v5081_v9 }
 0xd79   : > { %14786 = vmatpush3.msra.mxu0 %v5123_v31  ;;  %14787 = vmatprep.mubr.msk.f32.mxu0 %vm15945_vm2, %v15944_v14 }
 0xd7a   : > { %14795 = vmatprep.subr.mxu0 %v15944_v14  ;;  %14824 = vmatprep.mubr.msk.f32.mxu1 %vm15945_vm2, %v15944_v14 }
 0xd7b   : > { %14817 = vmatpush3.msra.mxu1 %v5593_v46  ;;  %v5973_v46 = vsub.s32 7, %v16732_v53 }
 0xd7c   : > { %14788 = vmatmul.mubr.f32.vlgmr.msra.gmra.mxu0 %v5082_v10  ;;  %14818 = vmatprep.subr.mxu1 %v15944_v14 }
 0xd7d   : > { %14796 = vmatpush3.msra.mxu0 %v5124_v35  ;;  %14797 = vmatprep.mubr.msk.f32.mxu0 %vm15945_vm2, %v15944_v14  ;;  %v5463_v35 = vpop.permute.xlu1 %5462 }
 0xd7e   : > { %14805 = vmatprep.subr.mxu0 %v15944_v14  ;;  %14819 = vmatpush3.msra.mxu1 %v5600_v62  ;;  %v5473_v43 = vsel %vm1789_vm4, %v16963_v63, %v5463_v35 }
 0xd7f   : > { %14820 = vmatprep.subr.mxu1 %v15944_v14  ;;  %v5475_v28 = vsel %vm5474_vm8, %v5473_v43, %v5467_v40 }
 0xd80   : > { %14798 = vmatmul.mubr.f32.vlgmr.msra.gmra.mxu0 %v5081_v9  ;;  %14821 = vmatpush3.msra.mxu1 %v5607_v29  ;;  %v6002_v29 = vld [vmem:[%s18856_s6 + $0x18] sm:$0xff] }
 0xd81   : > { %14813 = vmatprep.mubr.msk.f32.mxu0 %vm15945_vm2, %v15944_v14  ;;  %14806 = vmatpush3.msra.mxu0 %v17096_v22 }
 0xd82   : > { %14807 = vmatprep.subr.mxu0 %v15944_v14  ;;  %14822 = vmatprep.subr.mxu1 %v15944_v14 }
 0xd83   : > { %14808 = vmatpush3.msra.mxu0 %v17098_v60  ;;  %14823 = vmatpush3.msra.mxu1 %v5614_v61  ;;  %v17228_v61 = vand.u32 4294901760, %v6000_v12 }
 0xd84   : > { %14809 = vmatprep.subr.mxu0 %v15944_v14  ;;  %14838 = vmatprep.subr.mxu1 %v15944_v14 }
 0xd85   : > { %14810 = vmatpush3.msra.mxu0 %v17123_v36 }
 0xd86   : > { %14811 = vmatprep.subr.mxu0 %v15944_v14 }
 0xd87   : > { %14812 = vmatpush3.msra.mxu0 %v17131_v39 }
 0xd88   : > { %14827 = vmatprep.subr.mxu0 %v15944_v14 }
 0xe30   : > { %v5163_v57 = vpop.f32.mrf.mxu1 }
 0xe32   : > { %v14784_v13 = vpop.f32.mrf.mxu1 }
 0xe34   : > { %v5311_v48 = vpop.f32.mrf.mxu1 }
 0xe36   : > { %v14794_v47 = vpop.f32.mrf.mxu1 }
 0xe38   : > { %v5087_v44 = vpop.f32.mrf.mxu0  ;;  %v5457_v33 = vpop.f32.mrf.mxu1 }
 0xe39   : > { %v5164_v49 = vadd.f32 %v5163_v57, %v5087_v44  ;;  %v17224_v44 = vand.u32 4294901760, %v6002_v29 }
 0xe3a   : > { %v14779_v51 = vpop.f32.mrf.mxu0  ;;  %v14804_v52 = vpop.f32.mrf.mxu1 }
 0xe3b   : > { %v5999_v51 = vld [vmem:[%s18856_s6] sm:$0xff] }
 0xe3c   : > { %v5237_v30 = vpop.f32.mrf.mxu0  ;;  %v17233_v52 = vand.u32 4294901760, %v5999_v51 }
 0xe3d   : > { %v5238_v37 = vadd.f32 %v5237_v30, %v5164_v49  ;;  %v17236_v49 = vsub.f32 %v6002_v29, %v17224_v44 }
 0xe3e   : > { %v14789_v27 = vpop.f32.mrf.mxu0 }
 0xe3f   : > { %v5312_v1 = vadd.f32 %v5311_v48, %v5238_v37  ;;  %v17242_v37 = vsub.f32 %v6000_v12, %v17228_v61  ;;  %v17246_v27 = vsub.f32 %v5999_v51, %v17233_v52 }
 0xe40   : > { %v5385_v18 = vpop.f32.mrf.mxu0 }
 0xe41   : > { %v5386_v23 = vadd.f32 %v5385_v18, %v5312_v1  ;;  %v6117_v1 = vand.u32 4294901760, %v17236_v49 }
 0xe42   : > { %v14799_v25 = vpop.f32.mrf.mxu0 }
 0xe43   : > { %v5458_v31 = vadd.f32 %v5457_v33, %v5386_v23  ;;  %v6131_v23 = vand.u32 4294901760, %v17242_v37  ;;  %v6138_v25 = vand.u32 4294901760, %v17246_v27 }
 0xe45   : > { %5470 = vrot.lane.b32.xlu1 %v5458_v31, %s18929_s14  ;;  %v6118_v31 = vsub.f32 %v17236_v49, %v6117_v1  ;;  %v6132_v43 = vsub.f32 %v17242_v37, %v6131_v23  ;;  %s330_s14 = scalar_lea.vmem %s18859_s9, %s13645_s16 }
 0xe47   : > { %v6119_v40 = vand.u32 4294901760, %v6118_v31 }
 0xeb7   : > { %v5471_v7 = vpop.permute.xlu1 %5470 }
 0xeb8   : > { %v5477_v45 = vsel %vm5476_vm9, %v5475_v28, %v5471_v7  ;;  %v6139_v7 = vsub.f32 %v17246_v27, %v6138_v25 }
 0xeb9   : > { %v5483_v59 = vsel %vm1297_vm3, %v5477_v45, 0  ;;  %v6133_v45 = vand.u32 4294901760, %v6132_v43 }
 0xeba   : > { %v5554_v0 = vand.u32 4294901760, %v5483_v59 }
 0xebc   : > { %v5555_v3 = vsub.f32 %v5483_v59, %v5554_v0  ;;  %14825 = vmatmul.mubr.f32.vlgmr.msra.gmra.mxu1 %v5554_v0  ;;  %v6140_v59 = vand.u32 4294901760, %v6139_v7 }
 0xebd   : > { %14839 = vmatpush3.msra.mxu1 %v17096_v22  ;;  %14846 = vmatprep.mubr.msk.f32.mxu1 %vm15945_vm2, %v15944_v14 }
 0xebe   : > { %14840 = vmatprep.subr.mxu1 %v15944_v14  ;;  %v5556_v63 = vand.u32 4294901760, %v5555_v3 }
 0xebf   : > { %14841 = vmatpush3.msra.mxu1 %v17098_v60 }
 0xec0   : > { %14842 = vmatprep.subr.mxu1 %v15944_v14  ;;  %v5557_v9 = vsub.f32 %v5555_v3, %v5556_v63 }
 0xec1   : > { %14843 = vmatpush3.msra.mxu1 %v17123_v36 }
 0xec2   : > { %14844 = vmatprep.subr.mxu1 %v15944_v14  ;;  %v5558_v10 = vand.u32 4294901760, %v5557_v9  ;;  %v18935_v9 = vsub.s32 5, %v16732_v53 }
 0xec3   : > { %14845 = vmatpush3.msra.mxu1 %v17131_v39 }
 0xec4   : > { %14847 = vmatmul.mubr.f32.vlgmr.msra.gmra.mxu1 %v5556_v63  ;;  %14860 = vmatprep.subr.mxu1 %v15944_v14 }
 0xec5   : > { %14814 = vmatmul.mubr.f32.vlgmr.msra.gmra.mxu0 %v5558_v10  ;;  %14861 = vmatpush3.msra.mxu1 %v17096_v22  ;;  %v18932_v10 = vsub.s32 6, %v16732_v53 }
 0xec6   : > { %14828 = vmatpush3.msra.mxu0 %v17101_v32  ;;  %14862 = vmatprep.subr.mxu1 %v15944_v14 }
 0xec7   : > { %14829 = vmatprep.subr.mxu0 %v15944_v14  ;;  %14863 = vmatpush3.msra.mxu1 %v17098_v60 }
 0xec8   : > { %14830 = vmatpush3.msra.mxu0 %v17104_v8  ;;  %14864 = vmatprep.subr.mxu1 %v15944_v14 }
 0xec9   : > { %14831 = vmatprep.subr.mxu0 %v15944_v14  ;;  %14865 = vmatpush3.msra.mxu1 %v17123_v36 }
 0xeca   : > { %14832 = vmatpush3.msra.mxu0 %v17129_v50  ;;  %14866 = vmatprep.subr.mxu1 %v15944_v14  ;;  %v5974_v50 = vrot.slane %v15933_v41, %v5973_v46 }
 0xecb   : > { %14833 = vmatprep.subr.mxu0 %v15944_v14  ;;  %14835 = vmatprep.mubr.msk.f32.mxu0 %vm15945_vm2, %v15944_v14 }
 0xecc   : > { %14834 = vmatpush3.msra.mxu0 %v17137_v38  ;;  %14867 = vmatpush3.msra.mxu1 %v17131_v39 }
 0xecd   : > { %14868 = vmatprep.mubr.msk.f32.mxu1 %vm15945_vm2, %v15944_v14  ;;  %14836 = vmatmul.mubr.f32.vlgmr.msra.gmra.mxu0 %v5555_v3 }
 0xece   : > { %14849 = vmatprep.subr.mxu0 %v15944_v14  ;;  %14869 = vmatmul.mubr.f32.vlgmr.msra.gmra.mxu1 %v5554_v0 }
 0xecf   : > { %14850 = vmatpush3.msra.mxu0 %v5591_v42  ;;  %14857 = vmatprep.mubr.msk.f32.mxu0 %vm15945_vm2, %v15944_v14 }
 0xed0   : > { %14851 = vmatprep.subr.mxu0 %v15944_v14  ;;  %14882 = vmatprep.subr.mxu1 %v15944_v14 }
 0xed1   : > { %14852 = vmatpush3.msra.mxu0 %v5598_v20  ;;  %14890 = vmatprep.mubr.msk.f32.mxu1 %vm15945_vm2, %v15944_v14 }
 0xed2   : > { %14853 = vmatprep.subr.mxu0 %v15944_v14  ;;  %14883 = vmatpush3.msra.mxu1 %v6119_v40 }
 0xed3   : > { %14854 = vmatpush3.msra.mxu0 %v5605_v26  ;;  %14884 = vmatprep.subr.mxu1 %v15944_v14 }
 0xed4   : > { %14855 = vmatprep.subr.mxu0 %v15944_v14 }
 0xed5   : > { %14856 = vmatpush3.msra.mxu0 %v5612_v58 }
 0xed6   : > { %14858 = vmatmul.mubr.f32.vlgmr.msra.gmra.mxu0 %v5554_v0  ;;  %14871 = vmatprep.subr.mxu0 %v15944_v14 }
 0xed7   : > { %14879 = vmatprep.mubr.msk.f32.mxu0 %vm15945_vm2, %v15944_v14  ;;  %14872 = vmatpush3.msra.mxu0 %v17224_v44 }
 0xed8   : > { %14873 = vmatprep.subr.mxu0 %v15944_v14 }
 0xf7c   : > { %v5651_v11 = vpop.f32.mrf.mxu1 }
 0xf7e   : > { %v14826_v15 = vpop.f32.mrf.mxu1 }
 0xf84   : > { %v5808_v34 = vpop.f32.mrf.mxu1 }
 0xf85   : > { %v5560_v16 = vpop.f32.mrf.mxu0 }
 0xf86   : > { %v14848_v17 = vpop.f32.mrf.mxu1  ;;  %v5652_v8 = vadd.f32 %v5651_v11, %v5560_v16  ;;  %v5992_v11 = vrot.slane %v15933_v41, %v18935_v9  ;;  %v5997_v16 = vrot.slane %v15933_v41, %v18932_v10 }
 0xf87   : > { %v14815_v22 = vpop.f32.mrf.mxu0 }
 0xf8d   : > { %v5731_v60 = vpop.f32.mrf.mxu0 }
 0xf8e   : > { %v5966_v32 = vpop.f32.mrf.mxu1  ;;  %v5732_v21 = vadd.f32 %v5731_v60, %v5652_v8 }
 0xf8f   : > { %v14837_v42 = vpop.f32.mrf.mxu0 }
 0xf90   : > { %v14870_v20 = vpop.f32.mrf.mxu1  ;;  %v5809_v6 = vadd.f32 %v5808_v34, %v5732_v21 }
 0xf96   : > { %v5891_v62 = vpop.f32.mrf.mxu0 }
 0xf97   : > { %v5892_v19 = vadd.f32 %v5891_v62, %v5809_v6  ;;  %v6520_v6 = vld [vmem:[%s18857_s7 + $0x78] sm:$0xff]  ;;  %v6519_v62 = vld [vmem:[%s18857_s7 + $0x70] sm:$0xff] }
 0xf98   : > { %v14859_v36 = vpop.f32.mrf.mxu0  ;;  %v17333_v46 = vand.u32 4294901760, %v6520_v6 }
 0xf99   : > { %v5967_v57 = vadd.f32 %v5966_v32, %v5892_v19  ;;  %v17341_v36 = vand.u32 4294901760, %v6519_v62 }
 0xf9a   : > { %v17339_v19 = vsub.f32 %v6520_v6, %v17333_v46 }
 0xf9b   : > { %v5970_v39 = vadd.f32 %v5967_v57, %v16758_v55  ;;  %v6001_v55 = vld [vmem:[%s18856_s6 + $0x10] sm:$0xff]  ;;  %v6518_v57 = vld [vmem:[%s18857_s7 + $0x68] sm:$0xff] }
 0xf9c   : > { %v17226_v33 = vand.u32 4294901760, %v6001_v55  ;;  %v6615_v41 = vand.u32 4294901760, %v17339_v19 }
 0xf9d   : > { %v17209_v13 = vadd.f32 %v5974_v50, %v5970_v39  ;;  %v17350_v50 = vsub.f32 %v6519_v62, %v17341_v36  ;;  %v17352_v39 = vand.u32 4294901760, %v6518_v57 }
 0xf9e   : > { %v17239_v30 = vsub.f32 %v6001_v55, %v17226_v33  ;;  %14874 = vmatpush3.msra.mxu0 %v17226_v33 }
 0xf9f   : > { %v5976_v26 = vsel %vm1234_vm0, %v17209_v13, 0.0  ;;  %14875 = vmatprep.subr.mxu0 %v15944_v14 }
 0xfa0   : > { %5977 = vadd.xlane.f32.xlu0 %v5976_v26  ;;  %v6124_v18 = vand.u32 4294901760, %v17239_v30  ;;  %14876 = vmatpush3.msra.mxu0 %v17228_v61  ;;  %v6517_v26 = vld [vmem:[%s18857_s7 + $0x60] sm:$0xff] }
 0xfa1   : > { %14877 = vmatprep.subr.mxu0 %v15944_v14 }
 0xfa2   : > { %v6125_v35 = vsub.f32 %v17239_v30, %v6124_v18  ;;  %14878 = vmatpush3.msra.mxu0 %v17233_v52 }
 0xfa3   : > { %14893 = vmatprep.subr.mxu0 %v15944_v14 }
 0xfa4   : > { %v6126_v28 = vand.u32 4294901760, %v6125_v35  ;;  %v6513_v35 = vld [vmem:[%s18857_s7 + $0x40] sm:$0xff] }
 0xfa5   : > { %v17420_v7 = vand.u32 4294901760, %v6513_v35 }
 0xfa6   : > { %14885 = vmatpush3.msra.mxu1 %v6126_v28 }
 0xfa7   : > { %14886 = vmatprep.subr.mxu1 %v15944_v14 }
 0xfa8   : > { %14887 = vmatpush3.msra.mxu1 %v6133_v45 }
 0xfa9   : > { %14888 = vmatprep.subr.mxu1 %v15944_v14 }
 0xfaa   : > { %14889 = vmatpush3.msra.mxu1 %v6140_v59  ;;  %v6512_v59 = vld [vmem:[%s18857_s7 + $0x38] sm:$0xff] }
 0xfab   : > { %14904 = vmatprep.subr.mxu1 %v15944_v14 }
0x1029   : > { %v5978_v38 = vpop.xlane.xlu0 %5977 }
0x102a   : > { %v5979_v48 = vmul.f32 0.03125, %v5978_v38  ;;  %v6616_v38 = vsub.f32 %v17339_v19, %v6615_v41 }
0x102c   : > { %v5980_v24 = vsub.f32 %v17209_v13, %v5979_v48  ;;  %v6622_v48 = vand.u32 4294901760, %v17350_v50  ;;  %v6617_v29 = vand.u32 4294901760, %v6616_v38 }
0x102e   : > { %v5981_v58 = vmul.f32 %v5980_v24, %v5980_v24  ;;  %v6623_v55 = vsub.f32 %v17350_v50, %v6622_v48 }
0x1030   : > { %v5982_v47 = vsel %vm1234_vm0, %v5981_v58, 0.0  ;;  %v17366_v58 = vand.u32 4294901760, %v6517_v26  ;;  %v6624_v51 = vand.u32 4294901760, %v6623_v55 }
0x1031   : > { %5983 = vadd.xlane.f32.xlu1 %v5982_v47  ;;  %v6516_v47 = vld [vmem:[%s18857_s7 + $0x58] sm:$0xff] }
0x10ba   : > { %v5984_v0 = vpop.xlane.xlu1 %5983 }
0x10bb   : > { %v5985_v3 = vmul.f32 0.03125, %v5984_v0 }
0x10bd   : > { %v5986_v63 = vadd.f32 1e-06, %v5985_v3 }
0x10bf   : > { %15905 = vrsqrt.f32 %v5986_v63  ;;  %v17436_v63 = vsub.f32 %v6513_v35, %v17420_v7 }
0x10cc   : > { %v15906_v15 = vpop.eup %15905 }
0x10cd   : > { %v5988_v34 = vmul.f32 %v15906_v15, %v5980_v24  ;;  %v17364_v24 = vsub.f32 %v6518_v57, %v17352_v39  ;;  %v6507_v57 = vld [vmem:[%s18857_s7 + $0x10] sm:$0xff] }
0x10ce   : > { %v17484_v55 = vand.u32 4294901760, %v6507_v57 }
0x10cf   : > { %v5993_v17 = vmul.f32 %v5992_v11, %v5988_v34  ;;  %v6629_v12 = vand.u32 4294901760, %v17364_v24  ;;  %v17438_v11 = vand.u32 4294901760, %v6512_v59  ;;  %v6511_v34 = vld [vmem:[%s18857_s7 + $0x30] sm:$0xff] }
0x10d1   : > { %v5998_v22 = vadd.f32 %v5997_v16, %v5993_v17 }
0x10d3   : > { %v6009_v60 = vsel %vm1297_vm3, %v5998_v22, 0  ;;  %v18946_v22 = vand.u32 4294901760, %v17436_v63 }
0x10d4   : > { %v6080_v32 = vand.u32 4294901760, %v6009_v60 }
0x10d6   : > { %v6081_v8 = vsub.f32 %v6009_v60, %v6080_v32  ;;  %14891 = vmatmul.mubr.f32.vlgmr.msra.gmra.mxu1 %v6080_v32  ;;  %v17451_v60 = vsub.f32 %v6512_v59, %v17438_v11 }
0x10d7   : > { %14905 = vmatpush3.msra.mxu1 %v17224_v44  ;;  %14912 = vmatprep.mubr.msk.f32.mxu1 %vm15945_vm2, %v15944_v14 }
0x10d8   : > { %14906 = vmatprep.subr.mxu1 %v15944_v14  ;;  %v6082_v42 = vand.u32 4294901760, %v6081_v8 }
0x10d9   : > { %14907 = vmatpush3.msra.mxu1 %v17226_v33 }
0x10da   : > { %14908 = vmatprep.subr.mxu1 %v15944_v14  ;;  %v6083_v20 = vsub.f32 %v6081_v8, %v6082_v42 }
0x10db   : > { %14909 = vmatpush3.msra.mxu1 %v17228_v61 }
0x10dc   : > { %14910 = vmatprep.subr.mxu1 %v15944_v14  ;;  %v6084_v21 = vand.u32 4294901760, %v6083_v20  ;;  %v17463_v20 = vand.u32 4294901760, %v6511_v34 }
0x10dd   : > { %14911 = vmatpush3.msra.mxu1 %v17233_v52 }
0x10de   : > { %14913 = vmatmul.mubr.f32.vlgmr.msra.gmra.mxu1 %v6082_v42  ;;  %14926 = vmatprep.subr.mxu1 %v15944_v14  ;;  %v6508_v42 = vld [vmem:[%s18857_s7 + $0x18] sm:$0xff] }
0x10df   : > { %14880 = vmatmul.mubr.f32.vlgmr.msra.gmra.mxu0 %v6084_v21  ;;  %14927 = vmatpush3.msra.mxu1 %v17224_v44  ;;  %v17378_v44 = vsub.f32 %v6517_v26, %v17366_v58  ;;  %v17470_v62 = vand.u32 4294901760, %v6508_v42  ;;  %v6506_v26 = vld [vmem:[%s18857_s7 + $0x8] sm:$0xff] }
0x10e0   : > { %14894 = vmatpush3.msra.mxu0 %v17236_v49  ;;  %14928 = vmatprep.subr.mxu1 %v15944_v14 }
0x10e1   : > { %14895 = vmatprep.subr.mxu0 %v15944_v14  ;;  %14929 = vmatpush3.msra.mxu1 %v17226_v33  ;;  %v17381_v33 = vand.u32 4294901760, %v6516_v47  ;;  %v6636_v49 = vand.u32 4294901760, %v17378_v44 }
0x10e2   : > { %14896 = vmatpush3.msra.mxu0 %v17239_v30  ;;  %14930 = vmatprep.subr.mxu1 %v15944_v14 }
0x10e3   : > { %14897 = vmatprep.subr.mxu0 %v15944_v14  ;;  %14931 = vmatpush3.msra.mxu1 %v17228_v61  ;;  %v6515_v61 = vld [vmem:[%s18857_s7 + $0x50] sm:$0xff] }
0x10e4   : > { %14898 = vmatpush3.msra.mxu0 %v17242_v37  ;;  %14932 = vmatprep.subr.mxu1 %v15944_v14  ;;  %v17391_v30 = vand.u32 4294901760, %v6515_v61  ;;  %v17395_v37 = vsub.f32 %v6516_v47, %v17381_v33  ;;  %v6665_v47 = vsub.f32 %v17436_v63, %v18946_v22 }
0x10e5   : > { %14899 = vmatprep.subr.mxu0 %v15944_v14  ;;  %14901 = vmatprep.mubr.msk.f32.mxu0 %vm15945_vm2, %v15944_v14 }
0x10e6   : > { %14900 = vmatpush3.msra.mxu0 %v17246_v27  ;;  %14933 = vmatpush3.msra.mxu1 %v17233_v52  ;;  %v6630_v52 = vsub.f32 %v17364_v24, %v6629_v12  ;;  %v6514_v27 = vld [vmem:[%s18857_s7 + $0x48] sm:$0xff]  ;;  %v18949_v31 = vand.u32 4294901760, %v17395_v37 }
0x10e7   : > { %14934 = vmatprep.mubr.msk.f32.mxu1 %vm15945_vm2, %v15944_v14  ;;  %14902 = vmatmul.mubr.f32.vlgmr.msra.gmra.mxu0 %v6081_v8  ;;  %v6509_v8 = vld [vmem:[%s18857_s7 + $0x20] sm:$0xff] }
0x10e8   : > { %14915 = vmatprep.subr.mxu0 %v15944_v14  ;;  %14935 = vmatmul.mubr.f32.vlgmr.msra.gmra.mxu1 %v6080_v32  ;;  %v6644_v45 = vsub.f32 %v17395_v37, %v18949_v31  ;;  %v17467_v6 = vand.u32 4294901760, %v6509_v8 }
0x10e9   : > { %14916 = vmatpush3.msra.mxu0 %v6117_v1  ;;  %14923 = vmatprep.mubr.msk.f32.mxu0 %vm15945_vm2, %v15944_v14  ;;  %v6631_v1 = vand.u32 4294901760, %v6630_v52 }
0x10ea   : > { %14917 = vmatprep.subr.mxu0 %v15944_v14  ;;  %14972 = vmatprep.subr.mxu1 %v15944_v14  ;;  %v6645_v15 = vand.u32 4294901760, %v6644_v45  ;;  %v17493_v52 = vsub.f32 %v6509_v8, %v17467_v6  ;;  %v17509_v45 = vand.u32 4294901760, %v6506_v26 }
0x10eb   : > { %14918 = vmatpush3.msra.mxu0 %v6124_v18  ;;  %15004 = vmatprep.mubr.msk.f32.mxu1 %vm15945_vm2, %v15944_v14  ;;  %v6637_v18 = vsub.f32 %v17378_v44, %v6636_v49 }
0x10ec   : > { %14919 = vmatprep.subr.mxu0 %v15944_v14  ;;  %14973 = vmatpush3.msra.mxu1 %v6617_v29  ;;  %v18945_v29 = vand.u32 4294901760, %v17451_v60 }
0x10ed   : > { %14920 = vmatpush3.msra.mxu0 %v6131_v23  ;;  %14974 = vmatprep.subr.mxu1 %v15944_v14  ;;  %v17405_v23 = vsub.f32 %v6515_v61, %v17391_v30  ;;  %v6638_v43 = vand.u32 4294901760, %v6637_v18  ;;  %v17487_v61 = vsub.f32 %v6511_v34, %v17463_v20  ;;  %v6666_v18 = vand.u32 4294901760, %v6665_v47 }
0x10ee   : > { %14921 = vmatprep.subr.mxu0 %v15944_v14  ;;  %14975 = vmatpush3.msra.mxu1 %v6624_v51  ;;  %v6672_v35 = vsub.f32 %v17451_v60, %v18945_v29 }
0x10ef   : > { %14922 = vmatpush3.msra.mxu0 %v6138_v25  ;;  %v17407_v25 = vand.u32 4294901760, %v6514_v27  ;;  %14976 = vmatprep.subr.mxu1 %v15944_v14  ;;  %v18948_v40 = vand.u32 4294901760, %v17405_v23  ;;  %v18944_v59 = vand.u32 4294901760, %v17487_v61 }
0x10f0   : > { %14924 = vmatmul.mubr.f32.vlgmr.msra.gmra.mxu0 %v6080_v32  ;;  %14937 = vmatprep.subr.mxu0 %v15944_v14  ;;  %v6510_v32 = vld [vmem:[%s18857_s7 + $0x28] sm:$0xff] }
0x10f1   : > { %14969 = vmatprep.mubr.msk.f32.mxu0 %vm15945_vm2, %v15944_v14  ;;  %14938 = vmatpush3.msra.mxu0 %v17333_v46  ;;  %v17418_v28 = vsub.f32 %v6514_v27, %v17407_v25  ;;  %v6651_v0 = vsub.f32 %v17405_v23, %v18948_v40  ;;  %v17465_v21 = vand.u32 4294901760, %v6510_v32  ;;  %v17496_v27 = vsub.f32 %v6508_v42, %v17470_v62 }
0x10f2   : > { %14939 = vmatprep.subr.mxu0 %v15944_v14  ;;  %14977 = vmatpush3.msra.mxu1 %v6631_v1  ;;  %v6505_v1 = vld [vmem:[%s18857_s7] sm:$0xff]  ;;  %v6679_v8 = vsub.f32 %v17487_v61, %v18944_v59 }
0x10f3   : > { %14940 = vmatpush3.msra.mxu0 %v17341_v36  ;;  %14978 = vmatprep.subr.mxu1 %v15944_v14  ;;  %v18947_v3 = vand.u32 4294901760, %v17418_v28  ;;  %v6652_v16 = vand.u32 4294901760, %v6651_v0  ;;  %v17490_v51 = vsub.f32 %v6510_v32, %v17465_v21  ;;  %v18941_v34 = vand.u32 4294901760, %v17496_v27 }
0x10f4   : > { %14941 = vmatprep.subr.mxu0 %v15944_v14  ;;  %14979 = vmatpush3.msra.mxu1 %v6638_v43  ;;  %v17507_v43 = vsub.f32 %v6507_v57, %v17484_v55  ;;  %v17521_v32 = vand.u32 4294901760, %v6505_v1  ;;  %v6680_v47 = vand.u32 4294901760, %v6679_v8 }
0x10f5   : > { %14942 = vmatpush3.msra.mxu0 %v17352_v39  ;;  %14980 = vmatprep.subr.mxu1 %v15944_v14  ;;  %v6658_v17 = vsub.f32 %v17418_v28, %v18947_v3  ;;  %v18943_v0 = vand.u32 4294901760, %v17490_v51 }
0x10f6   : > { %14943 = vmatprep.subr.mxu0 %v15944_v14  ;;  %14981 = vmatpush3.msra.mxu1 %v6645_v15  ;;  %v18942_v15 = vand.u32 4294901760, %v17493_v52 }
0x10f7   : > { %14944 = vmatpush3.msra.mxu0 %v17366_v58  ;;  %14982 = vmatprep.subr.mxu1 %v15944_v14  ;;  %v6659_v38 = vand.u32 4294901760, %v6658_v17  ;;  %v17519_v17 = vsub.f32 %v6506_v26, %v17509_v45  ;;  %v6686_v42 = vsub.f32 %v17490_v51, %v18943_v0  ;;  %v17536_v26 = vsub.f32 %v6505_v1, %v17521_v32 }
0x10f8   : > { %14945 = vmatprep.subr.mxu0 %v15944_v14  ;;  %14983 = vmatpush3.msra.mxu1 %v6652_v16  ;;  %v6673_v16 = vand.u32 4294901760, %v6672_v35  ;;  %v6693_v57 = vsub.f32 %v17493_v52, %v18942_v15  ;;  %v6700_v35 = vsub.f32 %v17496_v27, %v18941_v34 }
0x10f9   : > { %14946 = vmatpush3.msra.mxu0 %v17381_v33  ;;  %14984 = vmatprep.subr.mxu1 %v15944_v14  ;;  %v18939_v10 = vand.u32 4294901760, %v17519_v17 }
0x10fa   : > { %14947 = vmatprep.subr.mxu0 %v15944_v14  ;;  %14985 = vmatpush3.msra.mxu1 %v6659_v38  ;;  %v18940_v38 = vand.u32 4294901760, %v17507_v43  ;;  %v6694_v56 = vand.u32 4294901760, %v6693_v57  ;;  %v6701_v8 = vand.u32 4294901760, %v6700_v35 }
0x10fb   : > { %14948 = vmatpush3.msra.mxu0 %v17391_v30  ;;  %14986 = vmatprep.subr.mxu1 %v15944_v14 }
0x10fc   : > { %14949 = vmatprep.subr.mxu0 %v15944_v14  ;;  %14987 = vmatpush3.msra.mxu1 %v6666_v18  ;;  %v6687_v18 = vand.u32 4294901760, %v6686_v42  ;;  %v6707_v1 = vsub.f32 %v17507_v43, %v18940_v38  ;;  %v6714_v42 = vsub.f32 %v17519_v17, %v18939_v10 }
0x10fd   : > { %14950 = vmatpush3.msra.mxu0 %v17407_v25  ;;  %14988 = vmatprep.subr.mxu1 %v15944_v14 }
0x10fe   : > { %14951 = vmatprep.subr.mxu0 %v15944_v14  ;;  %14989 = vmatpush3.msra.mxu1 %v6673_v16  ;;  %v18938_v16 = vand.u32 4294901760, %v17536_v26  ;;  %v6708_v57 = vand.u32 4294901760, %v6707_v1 }
0x10ff   : > { %14952 = vmatpush3.msra.mxu0 %v17420_v7  ;;  %14990 = vmatprep.subr.mxu1 %v15944_v14 }
0x1100   : > { %14953 = vmatprep.subr.mxu0 %v15944_v14  ;;  %14991 = vmatpush3.msra.mxu1 %v6680_v47  ;;  %v6721_v47 = vsub.f32 %v17536_v26, %v18938_v16 }
0x1101   : > { %14954 = vmatpush3.msra.mxu0 %v17438_v11  ;;  %14992 = vmatprep.subr.mxu1 %v15944_v14 }
0x1102   : > { %14955 = vmatprep.subr.mxu0 %v15944_v14  ;;  %14993 = vmatpush3.msra.mxu1 %v6687_v18  ;;  %v6715_v18 = vand.u32 4294901760, %v6714_v42 }
0x1103   : > { %14956 = vmatpush3.msra.mxu0 %v17463_v20  ;;  %14994 = vmatprep.subr.mxu1 %v15944_v14 }
0x1104   : > { %14957 = vmatprep.subr.mxu0 %v15944_v14  ;;  %14995 = vmatpush3.msra.mxu1 %v6694_v56  ;;  %v6722_v56 = vand.u32 4294901760, %v6721_v47 }
0x1105   : > { %14958 = vmatpush3.msra.mxu0 %v17465_v21  ;;  %14996 = vmatprep.subr.mxu1 %v15944_v14 }
0x1106   : > { %14959 = vmatprep.subr.mxu0 %v15944_v14  ;;  %14997 = vmatpush3.msra.mxu1 %v6701_v8 }
0x1107   : > { %14960 = vmatpush3.msra.mxu0 %v17467_v6  ;;  %14998 = vmatprep.subr.mxu1 %v15944_v14 }
0x1108   : > { %14961 = vmatprep.subr.mxu0 %v15944_v14  ;;  %14999 = vmatpush3.msra.mxu1 %v6708_v57 }
0x1109   : > { %14962 = vmatpush3.msra.mxu0 %v17470_v62  ;;  %15000 = vmatprep.subr.mxu1 %v15944_v14 }
0x110a   : > { %14963 = vmatprep.subr.mxu0 %v15944_v14  ;;  %15001 = vmatpush3.msra.mxu1 %v6715_v18 }
0x110b   : > { %14964 = vmatpush3.msra.mxu0 %v17484_v55  ;;  %15002 = vmatprep.subr.mxu1 %v15944_v14 }
0x110c   : > { %14965 = vmatprep.subr.mxu0 %v15944_v14  ;;  %15003 = vmatpush3.msra.mxu1 %v6722_v56 }
0x110d   : > { %14966 = vmatpush3.msra.mxu0 %v17509_v45  ;;  %15042 = vmatprep.subr.mxu1 %v15944_v14 }
0x110e   : > { %14967 = vmatprep.subr.mxu0 %v15944_v14 }
0x110f   : > { %14968 = vmatpush3.msra.mxu0 %v17521_v32 }
0x1110   : > { %15007 = vmatprep.subr.mxu0 %v15944_v14 }
0x1196   : > { %v6177_v35 = vpop.f32.mrf.mxu1 }
0x1198   : > { %v14892_v1 = vpop.f32.mrf.mxu1 }
0x119e   : > { %v6334_v8 = vpop.f32.mrf.mxu1 }
0x119f   : > { %v6086_v42 = vpop.f32.mrf.mxu0 }
0x11a0   : > { %v14914_v2 = vpop.f32.mrf.mxu1  ;;  %v6087_v57 = vadd.f32 %v13647_v5, %v6086_v42 }
0x11a1   : > { %v14881_v9 = vpop.f32.mrf.mxu0 }
0x11a2   : > { %v6178_v16 = vadd.f32 %v6177_v35, %v6087_v57 }
0x11a7   : > { %v6257_v47 = vpop.f32.mrf.mxu0 }
0x11a8   : > { %v6492_v4 = vpop.f32.mrf.mxu1  ;;  %v6258_v38 = vadd.f32 %v6257_v47, %v6178_v16  ;;  %v13648_v16 = vld [vmem:[%s18854_s4 + $0x28] sm:$0xff] }
0x11a9   : > { %v14903_v18 = vpop.f32.mrf.mxu0  ;;  %v17772_v35 = vand.u32 4294901760, %v13648_v16 }
0x11aa   : > { %v14936_v10 = vpop.f32.mrf.mxu1  ;;  %v6335_v56 = vadd.f32 %v6334_v8, %v6258_v38 }
0x11ab   : > { %v17785_v18 = vsub.f32 %v13648_v16, %v17772_v35 }
0x11b0   : > { %v6417_v34 = vpop.f32.mrf.mxu0 }
0x11b1   : > { %v6418_v15 = vadd.f32 %v6417_v34, %v6335_v56  ;;  %v13651_v34 = vld [vmem:[%s18854_s4 + $0x40] sm:$0xff] }
0x11b2   : > { %v14925_v0 = vpop.f32.mrf.mxu0 }
0x11b3   : > { %v6493_v1 = vadd.f32 %v6492_v4, %v6418_v15 }
0x11b5   : > { %v6497_v59 = vmul.f32 0.044715, %v6493_v1  ;;  %v6496_v40 = vmul.f32 0.5, %v6493_v1 }
0x11b7   : > { %v6498_v29 = vmul.f32 %v6497_v59, %v6493_v1 }
0x11b9   : > { %v6499_v2 = vmul.f32 %v6498_v29, %v6493_v1 }
0x11bb   : > { %v6500_v9 = vadd.f32 %v6499_v2, %v6493_v1 }
0x11bd   : > { %v6501_v22 = vmul.f32 0.7978846, %v6500_v9  ;;  %v7331_v9 = vand.u32 4294901760, %v17785_v18 }
0x11bf   : > { %15907 = vtanh.f32 %v6501_v22 }
0x11cc   : > { %v15908_v3 = vpop.eup %15907 }
0x11cd   : > { %v6503_v5 = vadd.f32 1.0, %v15908_v3 }
0x11cf   : > { %v6504_v42 = vmul.f32 %v6503_v5, %v6496_v40 }
0x11d1   : > { %v17573_v31 = vand.u32 4294901760, %v6504_v42 }
0x11d3   : > { %v17576_v10 = vsub.f32 %v6504_v42, %v17573_v31  ;;  %15005 = vmatmul.mubr.f32.vlgmr.msra.gmra.mxu1 %v17573_v31 }
0x11d4   : > { %15043 = vmatpush3.msra.mxu1 %v17333_v46  ;;  %15074 = vmatprep.mubr.msk.f32.mxu1 %vm15945_vm2, %v15944_v14 }
0x11d5   : > { %15044 = vmatprep.subr.mxu1 %v15944_v14  ;;  %v6604_v4 = vand.u32 4294901760, %v17576_v10 }
0x11d6   : > { %15045 = vmatpush3.msra.mxu1 %v17341_v36 }
0x11d7   : > { %15046 = vmatprep.subr.mxu1 %v15944_v14  ;;  %v6605_v40 = vsub.f32 %v17576_v10, %v6604_v4 }
0x11d8   : > { %15047 = vmatpush3.msra.mxu1 %v17352_v39 }
0x11d9   : > { %15048 = vmatprep.subr.mxu1 %v15944_v14  ;;  %v6606_v3 = vand.u32 4294901760, %v6605_v40 }
0x11da   : > { %15049 = vmatpush3.msra.mxu1 %v17366_v58 }
0x11db   : > { %15050 = vmatprep.subr.mxu1 %v15944_v14  ;;  %14970 = vmatmul.mubr.f32.vlgmr.msra.gmra.mxu0 %v6606_v3  ;;  %v7332_v3 = vsub.f32 %v17785_v18, %v7331_v9 }
0x11dc   : > { %15008 = vmatpush3.msra.mxu0 %v17339_v19  ;;  %15051 = vmatpush3.msra.mxu1 %v17381_v33  ;;  %v19058_v19 = vand.u32 4294901760, %v17405_v23 }
0x11dd   : > { %15009 = vmatprep.subr.mxu0 %v15944_v14  ;;  %15052 = vmatprep.subr.mxu1 %v15944_v14 }
0x11de   : > { %15010 = vmatpush3.msra.mxu0 %v17350_v50  ;;  %15053 = vmatpush3.msra.mxu1 %v17391_v30  ;;  %v19061_v50 = vand.u32 4294901760, %v17451_v60 }
0x11df   : > { %15011 = vmatprep.subr.mxu0 %v15944_v14  ;;  %15054 = vmatprep.subr.mxu1 %v15944_v14 }
0x11e0   : > { %15012 = vmatpush3.msra.mxu0 %v17364_v24  ;;  %15055 = vmatpush3.msra.mxu1 %v17407_v25  ;;  %v19064_v24 = vand.u32 4294901760, %v17493_v52 }
0x11e1   : > { %15013 = vmatprep.subr.mxu0 %v15944_v14  ;;  %15056 = vmatprep.subr.mxu1 %v15944_v14 }
0x11e2   : > { %15014 = vmatpush3.msra.mxu0 %v17378_v44  ;;  %15057 = vmatpush3.msra.mxu1 %v17420_v7  ;;  %v19067_v44 = vand.u32 4294901760, %v17519_v17 }
0x11e3   : > { %15015 = vmatprep.subr.mxu0 %v15944_v14  ;;  %15058 = vmatprep.subr.mxu1 %v15944_v14 }
0x11e4   : > { %15016 = vmatpush3.msra.mxu0 %v17395_v37  ;;  %15059 = vmatpush3.msra.mxu1 %v17438_v11 }
0x11e5   : > { %15017 = vmatprep.subr.mxu0 %v15944_v14  ;;  %15060 = vmatprep.subr.mxu1 %v15944_v14 }
0x11e6   : > { %15018 = vmatpush3.msra.mxu0 %v17405_v23  ;;  %15061 = vmatpush3.msra.mxu1 %v17463_v20 }
0x11e7   : > { %15019 = vmatprep.subr.mxu0 %v15944_v14  ;;  %15062 = vmatprep.subr.mxu1 %v15944_v14 }
0x11e8   : > { %15020 = vmatpush3.msra.mxu0 %v17418_v28  ;;  %15063 = vmatpush3.msra.mxu1 %v17465_v21 }
0x11e9   : > { %15021 = vmatprep.subr.mxu0 %v15944_v14  ;;  %15064 = vmatprep.subr.mxu1 %v15944_v14 }
0x11ea   : > { %15022 = vmatpush3.msra.mxu0 %v17436_v63  ;;  %15065 = vmatpush3.msra.mxu1 %v17467_v6 }
0x11eb   : > { %15023 = vmatprep.subr.mxu0 %v15944_v14  ;;  %15066 = vmatprep.subr.mxu1 %v15944_v14 }
0x11ec   : > { %15024 = vmatpush3.msra.mxu0 %v17451_v60  ;;  %15067 = vmatpush3.msra.mxu1 %v17470_v62 }
0x11ed   : > { %15025 = vmatprep.subr.mxu0 %v15944_v14  ;;  %15068 = vmatprep.subr.mxu1 %v15944_v14 }
0x11ee   : > { %15026 = vmatpush3.msra.mxu0 %v17487_v61  ;;  %15069 = vmatpush3.msra.mxu1 %v17484_v55 }
0x11ef   : > { %15027 = vmatprep.subr.mxu0 %v15944_v14  ;;  %15070 = vmatprep.subr.mxu1 %v15944_v14 }
0x11f0   : > { %15028 = vmatpush3.msra.mxu0 %v17490_v51  ;;  %15071 = vmatpush3.msra.mxu1 %v17509_v45 }
0x11f1   : > { %15029 = vmatprep.subr.mxu0 %v15944_v14  ;;  %15072 = vmatprep.subr.mxu1 %v15944_v14 }
0x11f2   : > { %15030 = vmatpush3.msra.mxu0 %v17493_v52  ;;  %15073 = vmatpush3.msra.mxu1 %v17521_v32 }
0x11f3   : > { %15031 = vmatprep.subr.mxu0 %v15944_v14  ;;  %15075 = vmatmul.mubr.f32.vlgmr.msra.gmra.mxu1 %v6604_v4 }
0x11f4   : > { %15112 = vmatprep.subr.mxu1 %v15944_v14  ;;  %15032 = vmatpush3.msra.mxu0 %v17496_v27 }
0x11f5   : > { %15113 = vmatpush3.msra.mxu1 %v17333_v46  ;;  %15033 = vmatprep.subr.mxu0 %v15944_v14  ;;  %v19057_v46 = vand.u32 4294901760, %v17395_v37 }
0x11f6   : > { %15114 = vmatprep.subr.mxu1 %v15944_v14  ;;  %15034 = vmatpush3.msra.mxu0 %v17507_v43 }
0x11f7   : > { %15115 = vmatpush3.msra.mxu1 %v17341_v36  ;;  %15035 = vmatprep.subr.mxu0 %v15944_v14  ;;  %v19059_v36 = vand.u32 4294901760, %v17418_v28 }
0x11f8   : > { %15116 = vmatprep.subr.mxu1 %v15944_v14  ;;  %15036 = vmatpush3.msra.mxu0 %v17519_v17  ;;  %v13649_v17 = vld [vmem:[%s18854_s4 + $0x30] sm:$0xff] }
0x11f9   : > { %15117 = vmatpush3.msra.mxu1 %v17352_v39  ;;  %15037 = vmatprep.subr.mxu0 %v15944_v14  ;;  %v19062_v39 = vand.u32 4294901760, %v17487_v61 }
0x11fa   : > { %15118 = vmatprep.subr.mxu1 %v15944_v14  ;;  %15038 = vmatpush3.msra.mxu0 %v17536_v26 }
0x11fb   : > { %15039 = vmatprep.mubr.msk.f32.mxu0 %vm15945_vm2, %v15944_v14  ;;  %15119 = vmatpush3.msra.mxu1 %v17366_v58  ;;  %v19065_v58 = vand.u32 4294901760, %v17496_v27 }
0x11fc   : > { %15040 = vmatmul.mubr.f32.vlgmr.msra.gmra.mxu0 %v17576_v10  ;;  %15077 = vmatprep.subr.mxu0 %v15944_v14 }
0x11fd   : > { %15120 = vmatprep.subr.mxu1 %v15944_v14  ;;  %15078 = vmatpush3.msra.mxu0 %v6615_v41  ;;  %v19060_v41 = vand.u32 4294901760, %v17436_v63 }
0x11fe   : > { %15121 = vmatpush3.msra.mxu1 %v17381_v33  ;;  %15079 = vmatprep.subr.mxu0 %v15944_v14  ;;  %v19068_v33 = vand.u32 4294901760, %v17536_v26  ;;  %v17767_v26 = vand.u32 4294901760, %v13649_v17 }
0x11ff   : > { %15122 = vmatprep.subr.mxu1 %v15944_v14  ;;  %15080 = vmatpush3.msra.mxu0 %v6622_v48  ;;  %v19063_v48 = vand.u32 4294901760, %v17490_v51 }
0x1200   : > { %15123 = vmatpush3.msra.mxu1 %v17391_v30  ;;  %15081 = vmatprep.subr.mxu0 %v15944_v14  ;;  %v17781_v47 = vsub.f32 %v13649_v17, %v17767_v26 }
0x1201   : > { %15124 = vmatprep.subr.mxu1 %v15944_v14  ;;  %15082 = vmatpush3.msra.mxu0 %v6629_v12  ;;  %v19066_v12 = vand.u32 4294901760, %v17507_v43 }
0x1202   : > { %15125 = vmatpush3.msra.mxu1 %v17407_v25  ;;  %15083 = vmatprep.subr.mxu0 %v15944_v14  ;;  %v7324_v2 = vand.u32 4294901760, %v17781_v47 }
0x1203   : > { %15126 = vmatprep.subr.mxu1 %v15944_v14  ;;  %15084 = vmatpush3.msra.mxu0 %v6636_v49 }
0x1204   : > { %15127 = vmatpush3.msra.mxu1 %v17420_v7  ;;  %15085 = vmatprep.subr.mxu0 %v15944_v14  ;;  %v7325_v10 = vsub.f32 %v17781_v47, %v7324_v2 }
0x1205   : > { %15128 = vmatprep.subr.mxu1 %v15944_v14  ;;  %15086 = vmatpush3.msra.mxu0 %v19057_v46 }
0x1206   : > { %15129 = vmatpush3.msra.mxu1 %v17438_v11  ;;  %15087 = vmatprep.subr.mxu0 %v15944_v14  ;;  %v7326_v46 = vand.u32 4294901760, %v7325_v10 }
0x1207   : > { %15130 = vmatprep.subr.mxu1 %v15944_v14  ;;  %15088 = vmatpush3.msra.mxu0 %v19058_v19  ;;  %v7333_v19 = vand.u32 4294901760, %v7332_v3 }
0x1208   : > { %15131 = vmatpush3.msra.mxu1 %v17463_v20  ;;  %15089 = vmatprep.subr.mxu0 %v15944_v14 }
0x1209   : > { %15132 = vmatprep.subr.mxu1 %v15944_v14  ;;  %15090 = vmatpush3.msra.mxu0 %v19059_v36 }
0x120a   : > { %15133 = vmatpush3.msra.mxu1 %v17465_v21  ;;  %15091 = vmatprep.subr.mxu0 %v15944_v14 }
0x120b   : > { %15134 = vmatprep.subr.mxu1 %v15944_v14  ;;  %15092 = vmatpush3.msra.mxu0 %v19060_v41 }
0x120c   : > { %15135 = vmatpush3.msra.mxu1 %v17467_v6  ;;  %15093 = vmatprep.subr.mxu0 %v15944_v14 }
0x120d   : > { %15136 = vmatprep.subr.mxu1 %v15944_v14  ;;  %15094 = vmatpush3.msra.mxu0 %v19061_v50 }
0x120e   : > { %15137 = vmatpush3.msra.mxu1 %v17470_v62  ;;  %15095 = vmatprep.subr.mxu0 %v15944_v14 }
0x120f   : > { %15138 = vmatprep.subr.mxu1 %v15944_v14  ;;  %15096 = vmatpush3.msra.mxu0 %v19062_v39  ;;  %v19069_v39 = vsub.s32 1, %v16732_v53 }
0x1210   : > { %15139 = vmatpush3.msra.mxu1 %v17484_v55  ;;  %15097 = vmatprep.subr.mxu0 %v15944_v14 }
0x1211   : > { %15140 = vmatprep.subr.mxu1 %v15944_v14  ;;  %15098 = vmatpush3.msra.mxu0 %v19063_v48 }
0x1212   : > { %15141 = vmatpush3.msra.mxu1 %v17509_v45  ;;  %15099 = vmatprep.subr.mxu0 %v15944_v14 }
0x1213   : > { %15142 = vmatprep.subr.mxu1 %v15944_v14  ;;  %15100 = vmatpush3.msra.mxu0 %v19064_v24 }
0x1214   : > { %15143 = vmatpush3.msra.mxu1 %v17521_v32  ;;  %15144 = vmatprep.mubr.msk.f32.mxu1 %vm15945_vm2, %v15944_v14  ;;  %v17763_v32 = vand.u32 4294901760, %v13651_v34 }
0x1215   : > { %15101 = vmatprep.subr.mxu0 %v15944_v14  ;;  %15145 = vmatmul.mubr.f32.vlgmr.msra.gmra.mxu1 %v17573_v31 }
0x1216   : > { %15102 = vmatpush3.msra.mxu0 %v19065_v58  ;;  %15109 = vmatprep.mubr.msk.f32.mxu0 %vm15945_vm2, %v15944_v14  ;;  %v17775_v8 = vsub.f32 %v13651_v34, %v17763_v32 }
0x1217   : > { %15103 = vmatprep.subr.mxu0 %v15944_v14  ;;  %15158 = vmatprep.subr.mxu1 %v15944_v14 }
0x1218   : > { %15104 = vmatpush3.msra.mxu0 %v19066_v12  ;;  %15166 = vmatprep.mubr.msk.f32.mxu1 %vm15945_vm2, %v15944_v14  ;;  %v7310_v56 = vand.u32 4294901760, %v17775_v8  ;;  %v19070_v12 = vsub.s32 2, %v16732_v53 }
0x1219   : > { %15105 = vmatprep.subr.mxu0 %v15944_v14 }
0x121a   : > { %15106 = vmatpush3.msra.mxu0 %v19067_v44  ;;  %v7311_v5 = vsub.f32 %v17775_v8, %v7310_v56 }
0x121b   : > { %15107 = vmatprep.subr.mxu0 %v15944_v14 }
0x121c   : > { %15108 = vmatpush3.msra.mxu0 %v19068_v33  ;;  %v7312_v4 = vand.u32 4294901760, %v7311_v5 }
0x121d   : > { %15110 = vmatmul.mubr.f32.vlgmr.msra.gmra.mxu0 %v17573_v31  ;;  %15147 = vmatprep.subr.mxu0 %v15944_v14  ;;  %v17743_v31 = vld [vmem:[%s18853_s3 + $0x8] sm:$0xff] }
0x121e   : > { %15155 = vmatprep.mubr.msk.f32.mxu0 %vm15945_vm2, %v15944_v14  ;;  %v7166_v61 = vrot.slane %v17743_v31, %v16735_v54  ;;  %15148 = vmatpush3.msra.mxu0 %v17763_v32  ;;  %v7184_v48 = vrot.slane %v17743_v31, %v19069_v39  ;;  %v7189_v44 = vrot.slane %v17743_v31, %v19070_v12  ;;  %v13653_v31 = vld [vmem:[%s18854_s4 + $0x48] ss:$0 sm:$0xff] }
0x121f   : > { %15149 = vmatprep.subr.mxu0 %v15944_v14  ;;  %15159 = vmatpush3.msra.mxu1 %v7312_v4 }
0x1220   : > { %15160 = vmatprep.subr.mxu1 %v15944_v14 }
0x1293   : > { %v6759_v49 = vpop.f32.mrf.mxu1 }
0x1295   : > { %v15006_v30 = vpop.f32.mrf.mxu1 }
0x129b   : > { %v6608_v37 = vpop.f32.mrf.mxu0 }
0x129c   : > { %v6760_v22 = vadd.f32 %v6759_v49, %v6608_v37 }
0x129d   : > { %v14971_v23 = vpop.f32.mrf.mxu0 }
0x12b3   : > { %v6952_v25 = vpop.f32.mrf.mxu1 }
0x12b5   : > { %v15076_v28 = vpop.f32.mrf.mxu1 }
0x12bc   : > { %v6863_v7 = vpop.f32.mrf.mxu0 }
0x12bd   : > { %v6864_v20 = vadd.f32 %v6863_v7, %v6760_v22 }
0x12be   : > { %v15041_v63 = vpop.f32.mrf.mxu0 }
0x12bf   : > { %v6953_v21 = vadd.f32 %v6952_v25, %v6864_v20 }
0x12d5   : > { %v7158_v11 = vpop.f32.mrf.mxu1 }
0x12d7   : > { %v15146_v60 = vpop.f32.mrf.mxu1 }
0x12dd   : > { %v7071_v6 = vpop.f32.mrf.mxu0 }
0x12de   : > { %v7072_v62 = vadd.f32 %v7071_v6, %v6953_v21 }
0x12df   : > { %v15111_v29 = vpop.f32.mrf.mxu0 }
0x12e0   : > { %v7159_v55 = vadd.f32 %v7158_v11, %v7072_v62 }
0x12e2   : > { %v7162_v51 = vadd.f32 %v7159_v55, %v17209_v13  ;;  %v13650_v13 = vld [vmem:[%s18854_s4 + $0x38] sm:$0xff] }
0x12e3   : > { %v17765_v38 = vand.u32 4294901760, %v13650_v13 }
0x12e4   : > { %v17748_v52 = vadd.f32 %v7166_v61, %v7162_v51 }
0x12e5   : > { %v17778_v57 = vsub.f32 %v13650_v13, %v17765_v38  ;;  %15150 = vmatpush3.msra.mxu0 %v17765_v38 }
0x12e6   : > { %v7168_v27 = vsel %vm1234_vm0, %v17748_v52, 0.0  ;;  %15151 = vmatprep.subr.mxu0 %v15944_v14 }
0x12e7   : > { %7169 = vadd.xlane.f32.xlu0 %v7168_v27  ;;  %v7317_v1 = vand.u32 4294901760, %v17778_v57  ;;  %15152 = vmatpush3.msra.mxu0 %v17767_v26 }
0x12e8   : > { %15153 = vmatprep.subr.mxu0 %v15944_v14 }
0x12e9   : > { %v7318_v42 = vsub.f32 %v17778_v57, %v7317_v1  ;;  %15154 = vmatpush3.msra.mxu0 %v17772_v35 }
0x12ea   : > { %15169 = vmatprep.subr.mxu0 %v15944_v14 }
0x12eb   : > { %v7319_v40 = vand.u32 4294901760, %v7318_v42 }
0x12ed   : > { %15161 = vmatpush3.msra.mxu1 %v7319_v40 }
0x12ee   : > { %15162 = vmatprep.subr.mxu1 %v15944_v14 }
0x12ef   : > { %15163 = vmatpush3.msra.mxu1 %v7326_v46 }
0x12f0   : > { %15164 = vmatprep.subr.mxu1 %v15944_v14 }
0x12f1   : > { %15165 = vmatpush3.msra.mxu1 %v7333_v19 }
0x12f2   : > { %15180 = vmatprep.subr.mxu1 %v15944_v14 }
0x1370   : > { %v7170_v43 = vpop.xlane.xlu0 %7169 }
0x1371   : > { %v7171_v45 = vmul.f32 0.03125, %v7170_v43 }
0x1373   : > { %v7172_v59 = vsub.f32 %v17748_v52, %v7171_v45 }
0x1375   : > { %v7173_v0 = vmul.f32 %v7172_v59, %v7172_v59 }
0x1377   : > { %v7174_v15 = vsel %vm1234_vm0, %v7173_v0, 0.0 }
0x1378   : > { %7175 = vadd.xlane.f32.xlu0 %v7174_v15 }
0x1401   : > { %v7176_v36 = vpop.xlane.xlu0 %7175 }
0x1402   : > { %v7177_v41 = vmul.f32 0.03125, %v7176_v36 }
0x1404   : > { %v7178_v50 = vadd.f32 1e-06, %v7177_v41 }
0x1406   : > { %15909 = vrsqrt.f32 %v7178_v50 }
0x1413   : > { %v15910_v24 = vpop.eup %15909 }
0x1414   : > { %v7180_v58 = vmul.f32 %v15910_v24, %v7172_v59 }
0x1416   : > { %v7185_v33 = vmul.f32 %v7184_v48, %v7180_v58 }
0x1418   : > { %v7190_v49 = vadd.f32 %v7189_v44, %v7185_v33 }
0x141a   : > { %v7202_v30 = vsel %vm1297_vm3, %v7190_v49, 0 }
0x141b   : > { %v7273_v37 = vand.u32 4294901760, %v7202_v30 }
0x141d   : > { %v7274_v23 = vsub.f32 %v7202_v30, %v7273_v37  ;;  %15167 = vmatmul.mubr.f32.vlgmr.msra.gmra.mxu1 %v7273_v37 }
0x141e   : > { %15181 = vmatpush3.msra.mxu1 %v17763_v32  ;;  %15188 = vmatprep.mubr.msk.f32.mxu1 %vm15945_vm2, %v15944_v14 }
0x141f   : > { %15182 = vmatprep.subr.mxu1 %v15944_v14  ;;  %v7275_v25 = vand.u32 4294901760, %v7274_v23 }
0x1420   : > { %15183 = vmatpush3.msra.mxu1 %v17765_v38 }
0x1421   : > { %15184 = vmatprep.subr.mxu1 %v15944_v14  ;;  %v7276_v28 = vsub.f32 %v7274_v23, %v7275_v25 }
0x1422   : > { %15185 = vmatpush3.msra.mxu1 %v17767_v26 }
0x1423   : > { %15186 = vmatprep.subr.mxu1 %v15944_v14  ;;  %v7277_v7 = vand.u32 4294901760, %v7276_v28 }
0x1424   : > { %15187 = vmatpush3.msra.mxu1 %v17772_v35 }
0x1425   : > { %15189 = vmatmul.mubr.f32.vlgmr.msra.gmra.mxu1 %v7275_v25  ;;  %15202 = vmatprep.subr.mxu1 %v15944_v14 }
0x1426   : > { %15156 = vmatmul.mubr.f32.vlgmr.msra.gmra.mxu0 %v7277_v7  ;;  %15203 = vmatpush3.msra.mxu1 %v17763_v32 }
0x1427   : > { %15170 = vmatpush3.msra.mxu0 %v17775_v8  ;;  %15204 = vmatprep.subr.mxu1 %v15944_v14 }
0x1428   : > { %15171 = vmatprep.subr.mxu0 %v15944_v14  ;;  %15205 = vmatpush3.msra.mxu1 %v17765_v38 }
0x1429   : > { %15172 = vmatpush3.msra.mxu0 %v17778_v57  ;;  %15206 = vmatprep.subr.mxu1 %v15944_v14 }
0x142a   : > { %15173 = vmatprep.subr.mxu0 %v15944_v14  ;;  %15207 = vmatpush3.msra.mxu1 %v17767_v26 }
0x142b   : > { %15174 = vmatpush3.msra.mxu0 %v17781_v47  ;;  %15208 = vmatprep.subr.mxu1 %v15944_v14 }
0x142c   : > { %15175 = vmatprep.subr.mxu0 %v15944_v14  ;;  %15177 = vmatprep.mubr.msk.f32.mxu0 %vm15945_vm2, %v15944_v14 }
0x142d   : > { %15176 = vmatpush3.msra.mxu0 %v17785_v18  ;;  %15209 = vmatpush3.msra.mxu1 %v17772_v35 }
0x142e   : > { %15210 = vmatprep.mubr.msk.f32.mxu1 %vm15945_vm2, %v15944_v14  ;;  %15178 = vmatmul.mubr.f32.vlgmr.msra.gmra.mxu0 %v7274_v23 }
0x142f   : > { %15191 = vmatprep.subr.mxu0 %v15944_v14  ;;  %15211 = vmatmul.mubr.f32.vlgmr.msra.gmra.mxu1 %v7273_v37 }
0x1430   : > { %15192 = vmatpush3.msra.mxu0 %v7310_v56  ;;  %15199 = vmatprep.mubr.msk.f32.mxu0 %vm15945_vm2, %v15944_v14 }
0x1431   : > { %15193 = vmatprep.subr.mxu0 %v15944_v14  ;;  %15218 = vmatprep.subr.mxu1 %v15944_v14 }
0x1432   : > { %15194 = vmatpush3.msra.mxu0 %v7317_v1  ;;  %15220 = vmatprep.mubr.msk.f32.mxu1 %vm15945_vm2, %v15944_v14 }
0x1433   : > { %15195 = vmatprep.subr.mxu0 %v15944_v14 }
0x1434   : > { %15196 = vmatpush3.msra.mxu0 %v7324_v2 }
0x1435   : > { %15197 = vmatprep.subr.mxu0 %v15944_v14 }
0x1436   : > { %15198 = vmatpush3.msra.mxu0 %v7331_v9 }
0x1437   : > { %15200 = vmatmul.mubr.f32.vlgmr.msra.gmra.mxu0 %v7273_v37  ;;  %15213 = vmatprep.subr.mxu0 %v15944_v14 }
0x1438   : > { %15215 = vmatprep.mubr.msk.f32.mxu0 %vm15945_vm2, %v15944_v14 }
0x14dd   : > { %v7370_v63 = vpop.f32.mrf.mxu1 }
0x14df   : > { %v15168_v11 = vpop.f32.mrf.mxu1 }
0x14e5   : > { %v7527_v22 = vpop.f32.mrf.mxu1 }
0x14e6   : > { %v7279_v60 = vpop.f32.mrf.mxu0 }
0x14e7   : > { %v15190_v20 = vpop.f32.mrf.mxu1  ;;  %v7280_v6 = vadd.f32 %v13653_v31, %v7279_v60 }
0x14e8   : > { %v15157_v21 = vpop.f32.mrf.mxu0 }
0x14e9   : > { %v7371_v55 = vadd.f32 %v7370_v63, %v7280_v6 }
0x14ee   : > { %v7450_v62 = vpop.f32.mrf.mxu0 }
0x14ef   : > { %v7685_v29 = vpop.f32.mrf.mxu1  ;;  %v7451_v27 = vadd.f32 %v7450_v62, %v7371_v55 }
0x14f0   : > { %v15179_v61 = vpop.f32.mrf.mxu0 }
0x14f1   : > { %v15212_v51 = vpop.f32.mrf.mxu1  ;;  %v7528_v43 = vadd.f32 %v7527_v22, %v7451_v27 }
0x14f7   : > { %v7610_v45 = vpop.f32.mrf.mxu0 }
0x14f8   : > { %v7611_v59 = vadd.f32 %v7610_v45, %v7528_v43 }
0x14f9   : > { %v15201_v0 = vpop.f32.mrf.mxu0 }
0x14fa   : > { %v17872_v15 = vadd.f32 %v7685_v29, %v7611_v59 }
0x14fc   : > { %7690 = vrot.lane.b32.xlu0 %v17872_v15, %s15946_s18  ;;  %v7692_v34 = vsel %vm1789_vm4, %v17872_v15, 0  ;;  %s19071_s18 = smov 16  }
0x14fd   : > { %v7762_v13 = vand.u32 4294901760, %v7692_v34 }
0x14ff   : > { %v7763_v17 = vsub.f32 %v7692_v34, %v7762_v13 }
0x1500   : > { %8608 = vrot.lane.b32.xlu0 %v17872_v15, %s15947_s19  ;;  %s19072_s19 = smov 8  }
0x1501   : > { %v7764_v32 = vand.u32 4294901760, %v7763_v17 }
0x1503   : > { %v7765_v16 = vsub.f32 %v7763_v17, %v7764_v32 }
0x1505   : > { %v7766_v57 = vand.u32 4294901760, %v7765_v16 }
0x156e   : > { %v7691_v38 = vpop.permute.xlu0 %7690 }
0x156f   : > { %v7694_v26 = vsel %vm1789_vm4, %v7691_v38, 0 }
0x1570   : > { %v7727_v35 = vand.u32 4294901760, %v7694_v26 }
0x1572   : > { %v7804_v8 = vsub.f32 %v7694_v26, %v7727_v35  ;;  %15214 = vmatpush3.xpose.msra.mxu0 %v7727_v35  ;;  %v8609_v25 = vpop.permute.xlu0 %8608 }
0x1573   : > { %15223 = vmatprep.subr.mxu0 %v15944_v14  ;;  %v8612_v63 = vsel %vm1789_vm4, %v8609_v25, 0 }
0x1574   : > { %v7805_v47 = vand.u32 4294901760, %v7804_v8  ;;  %v8645_v60 = vand.u32 4294901760, %v8612_v63 }
0x1575   : > { %15216 = vmatmul.mubr.f32.vlgmr.msra.gmra.mxu0 %v7766_v57 }
0x1576   : > { %v7806_v18 = vsub.f32 %v7804_v8, %v7805_v47  ;;  %15224 = vmatpush3.xpose.msra.mxu0 %v7804_v8  ;;  %15225 = vmatprep.mubr.msk.f32.mxu0 %vm15945_vm2, %v15944_v14  ;;  %v8722_v6 = vsub.f32 %v8612_v63, %v8645_v60 }
0x1577   : > { %15233 = vmatprep.subr.mxu0 %v15944_v14 }
0x1578   : > { %v7807_v56 = vand.u32 4294901760, %v7806_v18  ;;  %v8723_v51 = vand.u32 4294901760, %v8722_v6 }
0x1579   : > { %15226 = vmatmul.mubr.f32.vlgmr.msra.gmra.mxu0 %v7763_v17 }
0x157a   : > { %15219 = vmatpush3.xpose.msra.mxu1 %v7807_v56  ;;  %15234 = vmatpush3.xpose.msra.mxu0 %v7805_v47  ;;  %v8724_v0 = vsub.f32 %v8722_v6, %v8723_v51 }
0x157b   : > { %15235 = vmatprep.mubr.msk.f32.mxu0 %vm15945_vm2, %v15944_v14  ;;  %15228 = vmatprep.subr.mxu1 %v15944_v14 }
0x157c   : > { %15243 = vmatprep.subr.mxu0 %v15944_v14 }
0x157d   : > { %15221 = vmatmul.mubr.f32.vlgmr.msra.gmra.mxu1 %v7762_v13  ;;  %15236 = vmatmul.mubr.f32.vlgmr.msra.gmra.mxu0 %v7762_v13 }
0x157e   : > { %15229 = vmatpush3.xpose.msra.mxu1 %v7727_v35  ;;  %15230 = vmatprep.mubr.msk.f32.mxu1 %vm15945_vm2, %v15944_v14 }
0x157f   : > { %15238 = vmatprep.subr.mxu1 %v15944_v14  ;;  %15245 = vmatprep.mubr.msk.f32.mxu0 %vm15945_vm2, %v15944_v14 }
0x1581   : > { %15231 = vmatmul.mubr.f32.vlgmr.msra.gmra.mxu1 %v7764_v32  ;;  %v8725_v32 = vand.u32 4294901760, %v8724_v0 }
0x1582   : > { %15239 = vmatpush3.xpose.msra.mxu1 %v7727_v35  ;;  %15240 = vmatprep.mubr.msk.f32.mxu1 %vm15945_vm2, %v15944_v14 }
0x1583   : > { %15248 = vmatprep.subr.mxu1 %v15944_v14 }
0x1585   : > { %15241 = vmatmul.mubr.f32.vlgmr.msra.gmra.mxu1 %v7762_v13 }
0x1586   : > { %15250 = vmatprep.mubr.msk.f32.mxu1 %vm15945_vm2, %v15944_v14 }
0x1635   : > { %v7768_v1 = vpop.f32.mrf.mxu0 }
0x1637   : > { %v15217_v2 = vpop.f32.mrf.mxu0 }
0x1639   : > { %v7918_v9 = vpop.f32.mrf.mxu0 }
0x163b   : > { %v15227_v5 = vpop.f32.mrf.mxu0 }
0x163d   : > { %v7844_v42 = vpop.f32.mrf.mxu1  ;;  %v8066_v10 = vpop.f32.mrf.mxu0 }
0x163e   : > { %v7845_v4 = vadd.f32 %v7844_v42, %v7768_v1 }
0x163f   : > { %v15222_v40 = vpop.f32.mrf.mxu1  ;;  %v15237_v3 = vpop.f32.mrf.mxu0 }
0x1640   : > { %v7919_v46 = vadd.f32 %v7918_v9, %v7845_v4 }
0x1641   : > { %v7992_v19 = vpop.f32.mrf.mxu1 }
0x1642   : > { %v7993_v36 = vadd.f32 %v7992_v19, %v7919_v46 }
0x1643   : > { %v15232_v41 = vpop.f32.mrf.mxu1 }
0x1644   : > { %v8067_v50 = vadd.f32 %v8066_v10, %v7993_v36 }
0x1645   : > { %v8138_v39 = vpop.f32.mrf.mxu1 }
0x1646   : > { %v8139_v48 = vadd.f32 %v8138_v39, %v8067_v50 }
0x1647   : > { %v15242_v24 = vpop.f32.mrf.mxu1 }
0x1648   : > { %v8142_v58 = vsel %vm2240_vm5, %v8139_v48, -inf }
0x1649   : > { %8143 = vmax.xlane.f32.xlu1 %v8142_v58 }
0x16d2   : > { %v8144_v12 = vpop.xlane.xlu1 %8143 }
0x16d3   : > { %v8145_v44 = vsub.f32 %v8139_v48, %v8144_v12 }
0x16d5   : > { %v8146_v33 = vmul.f32 1.442695, %v8145_v44 }
0x16d7   : > { %15911 = vpow2.f32 %v8146_v33 }
0x16e4   : > { %v15912_v49 = vpop.eup %15911 }
0x16e5   : > { %v8148_v30 = vsel %vm2240_vm5, %v15912_v49, 0.0 }
0x16e6   : > { %8149 = vadd.xlane.f32.xlu1 %v8148_v30 }
0x16f7   : > { %8153 = vrot.lane.b32.xlu1 %v17872_v15, %s15948_s20 }
0x16fb   : > { %8606 = vrot.lane.b32.xlu1 %v17872_v15, %s15949_s21 }
0x176f   : > { %v8150_v37 = vpop.xlane.xlu1 %8149 }
0x1770   : > { %15913 = vrcp.f32 %v8150_v37 }
0x1773   : > { %v8154_v23 = vpop.permute.xlu1 %8153 }
0x1774   : > { %v8158_v28 = vsel %vm2258_vm6, %v8154_v23, 0 }
0x1775   : > { %v8191_v7 = vand.u32 4294901760, %v8158_v28 }
0x1777   : > { %v8268_v11 = vsub.f32 %v8158_v28, %v8191_v7  ;;  %15244 = vmatpush3.msra.mxu0 %v8191_v7  ;;  %v8607_v29 = vpop.permute.xlu1 %8606 }
0x1778   : > { %15253 = vmatprep.subr.mxu0 %v15944_v14  ;;  %v8610_v27 = vsel %vm1789_vm4, %v8607_v29, 0 }
0x1779   : > { %v8269_v22 = vand.u32 4294901760, %v8268_v11  ;;  %v8680_v45 = vand.u32 4294901760, %v8610_v27 }
0x177b   : > { %v8270_v20 = vsub.f32 %v8268_v11, %v8269_v22  ;;  %v8681_v13 = vsub.f32 %v8610_v27, %v8680_v45 }
0x177d   : > { %v15914_v21 = vpop.eup %15913  ;;  %v8271_v31 = vand.u32 4294901760, %v8270_v20  ;;  %v8682_v38 = vand.u32 4294901760, %v8681_v13 }
0x177e   : > { %v8152_v62 = vmul.f32 %v15914_v21, %v15912_v49 }
0x177f   : > { %15249 = vmatpush3.msra.mxu1 %v8271_v31  ;;  %v8683_v26 = vsub.f32 %v8681_v13, %v8682_v38 }
0x1780   : > { %15258 = vmatprep.subr.mxu1 %v15944_v14  ;;  %v8156_v55 = vsel %vm2254_vm7, %v8152_v62, 0 }
0x1781   : > { %v8226_v61 = vand.u32 4294901760, %v8156_v55  ;;  %v8684_v16 = vand.u32 4294901760, %v8683_v26 }
0x1783   : > { %v8227_v43 = vsub.f32 %v8156_v55, %v8226_v61  ;;  %15251 = vmatmul.mubr.f32.vlgmr.msra.gmra.mxu1 %v8226_v61 }
0x1784   : > { %15259 = vmatpush3.msra.mxu1 %v8191_v7  ;;  %15260 = vmatprep.mubr.msk.f32.mxu1 %vm15945_vm2, %v15944_v14 }
0x1785   : > { %15268 = vmatprep.subr.mxu1 %v15944_v14  ;;  %v8228_v59 = vand.u32 4294901760, %v8227_v43 }
0x1787   : > { %15261 = vmatmul.mubr.f32.vlgmr.msra.gmra.mxu1 %v8228_v59  ;;  %v8229_v34 = vsub.f32 %v8227_v43, %v8228_v59 }
0x1788   : > { %15269 = vmatpush3.msra.mxu1 %v8191_v7  ;;  %15270 = vmatprep.mubr.msk.f32.mxu1 %vm15945_vm2, %v15944_v14 }
0x1789   : > { %15278 = vmatprep.subr.mxu1 %v15944_v14  ;;  %v8230_v17 = vand.u32 4294901760, %v8229_v34 }
0x178b   : > { %15246 = vmatmul.mubr.f32.vlgmr.msra.gmra.mxu0 %v8230_v17  ;;  %15271 = vmatmul.mubr.f32.vlgmr.msra.gmra.mxu1 %v8226_v61 }
0x178c   : > { %15254 = vmatpush3.msra.mxu0 %v8268_v11  ;;  %15279 = vmatpush3.xpose.msra.mxu1 %v8725_v32 }
0x178d   : > { %15255 = vmatprep.mubr.msk.f32.mxu0 %vm15945_vm2, %v15944_v14  ;;  %15263 = vmatprep.subr.mxu0 %v15944_v14 }
0x178e   : > { %15280 = vmatprep.mubr.msk.f32.mxu1 %vm15945_vm2, %v15944_v14  ;;  %15288 = vmatprep.subr.mxu1 %v15944_v14 }
0x178f   : > { %15256 = vmatmul.mubr.f32.vlgmr.msra.gmra.mxu0 %v8227_v43  ;;  %15281 = vmatmul.mubr.f32.vlgmr.msra.gmra.mxu1 %v8680_v45 }
0x1790   : > { %15264 = vmatpush3.msra.mxu0 %v8269_v22  ;;  %15289 = vmatpush3.xpose.msra.mxu1 %v8645_v60 }
0x1791   : > { %15265 = vmatprep.mubr.msk.f32.mxu0 %vm15945_vm2, %v15944_v14  ;;  %15273 = vmatprep.subr.mxu0 %v15944_v14 }
0x1792   : > { %15290 = vmatprep.mubr.msk.f32.mxu1 %vm15945_vm2, %v15944_v14  ;;  %15298 = vmatprep.subr.mxu1 %v15944_v14 }
0x1793   : > { %15266 = vmatmul.mubr.f32.vlgmr.msra.gmra.mxu0 %v8226_v61  ;;  %15291 = vmatmul.mubr.f32.vlgmr.msra.gmra.mxu1 %v8682_v38 }
0x1794   : > { %15274 = vmatpush3.xpose.msra.mxu0 %v8645_v60  ;;  %15299 = vmatpush3.xpose.msra.mxu1 %v8645_v60 }
0x1795   : > { %15275 = vmatprep.mubr.msk.f32.mxu0 %vm15945_vm2, %v15944_v14  ;;  %15283 = vmatprep.subr.mxu0 %v15944_v14 }
0x1796   : > { %15300 = vmatprep.mubr.msk.f32.mxu1 %vm15945_vm2, %v15944_v14  ;;  %15308 = vmatprep.subr.mxu1 %v15944_v14 }
0x1797   : > { %15276 = vmatmul.mubr.f32.vlgmr.msra.gmra.mxu0 %v8684_v16  ;;  %15301 = vmatmul.mubr.f32.vlgmr.msra.gmra.mxu1 %v8680_v45 }
0x1798   : > { %15284 = vmatpush3.xpose.msra.mxu0 %v8722_v6  ;;  %15285 = vmatprep.mubr.msk.f32.mxu0 %vm15945_vm2, %v15944_v14 }
0x1799   : > { %15293 = vmatprep.subr.mxu0 %v15944_v14  ;;  %15310 = vmatprep.mubr.msk.f32.mxu1 %vm15945_vm2, %v15944_v14 }
0x179b   : > { %15286 = vmatmul.mubr.f32.vlgmr.msra.gmra.mxu0 %v8681_v13 }
0x179c   : > { %15294 = vmatpush3.xpose.msra.mxu0 %v8723_v51  ;;  %15295 = vmatprep.mubr.msk.f32.mxu0 %vm15945_vm2, %v15944_v14 }
0x179d   : > { %15303 = vmatprep.subr.mxu0 %v15944_v14 }
0x179f   : > { %15296 = vmatmul.mubr.f32.vlgmr.msra.gmra.mxu0 %v8680_v45 }
0x17a0   : > { %15305 = vmatprep.mubr.msk.f32.mxu0 %vm15945_vm2, %v15944_v14 }
0x1843   : > { %v8308_v35 = vpop.f32.mrf.mxu1 }
0x1845   : > { %v15252_v8 = vpop.f32.mrf.mxu1 }
0x1847   : > { %v8456_v57 = vpop.f32.mrf.mxu1 }
0x1849   : > { %v15262_v47 = vpop.f32.mrf.mxu1 }
0x184b   : > { %v8232_v18 = vpop.f32.mrf.mxu0  ;;  %v8602_v56 = vpop.f32.mrf.mxu1 }
0x184c   : > { %v8309_v1 = vadd.f32 %v8308_v35, %v8232_v18 }
0x184d   : > { %v15247_v2 = vpop.f32.mrf.mxu0  ;;  %v15272_v9 = vpop.f32.mrf.mxu1 }
0x184f   : > { %v8382_v5 = vpop.f32.mrf.mxu0  ;;  %v8762_v42 = vpop.f32.mrf.mxu1 }
0x1850   : > { %v8383_v10 = vadd.f32 %v8382_v5, %v8309_v1 }
0x1851   : > { %v15257_v4 = vpop.f32.mrf.mxu0  ;;  %v15282_v40 = vpop.f32.mrf.mxu1 }
0x1852   : > { %v8457_v3 = vadd.f32 %v8456_v57, %v8383_v10 }
0x1853   : > { %v8530_v46 = vpop.f32.mrf.mxu0  ;;  %v8910_v19 = vpop.f32.mrf.mxu1 }
0x1854   : > { %v8531_v36 = vadd.f32 %v8530_v46, %v8457_v3 }
0x1855   : > { %v15267_v41 = vpop.f32.mrf.mxu0  ;;  %v15292_v50 = vpop.f32.mrf.mxu1 }
0x1856   : > { %v17945_v39 = vadd.f32 %v8602_v56, %v8531_v36 }
0x1857   : > { %v8686_v48 = vpop.f32.mrf.mxu0  ;;  %v9056_v24 = vpop.f32.mrf.mxu1 }
0x1858   : > { %v8763_v44 = vadd.f32 %v8762_v42, %v8686_v48 }
0x1859   : > { %v15277_v58 = vpop.f32.mrf.mxu0  ;;  %v15302_v12 = vpop.f32.mrf.mxu1 }
0x185b   : > { %v8836_v33 = vpop.f32.mrf.mxu0 }
0x185c   : > { %v8837_v49 = vadd.f32 %v8836_v33, %v8763_v44 }
0x185d   : > { %v15287_v30 = vpop.f32.mrf.mxu0 }
0x185e   : > { %v8911_v37 = vadd.f32 %v8910_v19, %v8837_v49 }
0x185f   : > { %v8984_v23 = vpop.f32.mrf.mxu0 }
0x1860   : > { %v8985_v25 = vadd.f32 %v8984_v23, %v8911_v37 }
0x1861   : > { %v15297_v28 = vpop.f32.mrf.mxu0 }
0x1862   : > { %v9057_v7 = vadd.f32 %v9056_v24, %v8985_v25 }
0x1864   : > { %v9060_v63 = vsel %vm2240_vm5, %v9057_v7, -inf }
0x1865   : > { %9061 = vmax.xlane.f32.xlu0 %v9060_v63 }
0x187b   : > { %9071 = vrot.lane.b32.xlu0 %v17872_v15, %s15950_s22 }
0x187f   : > { %9524 = vrot.lane.b32.xlu0 %v17872_v15, %s15951_s23 }
0x18ee   : > { %v9062_v11 = vpop.xlane.xlu0 %9061 }
0x18ef   : > { %v9063_v22 = vsub.f32 %v9057_v7, %v9062_v11 }
0x18f1   : > { %v9064_v60 = vmul.f32 1.442695, %v9063_v22 }
0x18f2   : > { %v9072_v20 = vpop.permute.xlu0 %9071 }
0x18f3   : > { %15915 = vpow2.f32 %v9064_v60  ;;  %v9076_v21 = vsel %vm2258_vm6, %v9072_v20, 0 }
0x18f4   : > { %v9109_v31 = vand.u32 4294901760, %v9076_v21 }
0x18f6   : > { %v9186_v6 = vsub.f32 %v9076_v21, %v9109_v31  ;;  %15304 = vmatpush3.msra.mxu0 %v9109_v31  ;;  %v9525_v17 = vpop.permute.xlu0 %9524 }
0x18f7   : > { %15313 = vmatprep.subr.mxu0 %v15944_v14  ;;  %v9528_v26 = vsel %vm1789_vm4, %v9525_v17, 0 }
0x18f8   : > { %v9187_v62 = vand.u32 4294901760, %v9186_v6  ;;  %v9598_v8 = vand.u32 4294901760, %v9528_v26 }
0x18fa   : > { %v9188_v29 = vsub.f32 %v9186_v6, %v9187_v62  ;;  %v9599_v56 = vsub.f32 %v9528_v26, %v9598_v8 }
0x18fc   : > { %v9189_v55 = vand.u32 4294901760, %v9188_v29  ;;  %v9600_v9 = vand.u32 4294901760, %v9599_v56 }
0x18fe   : > { %15309 = vmatpush3.msra.mxu1 %v9189_v55  ;;  %v9601_v5 = vsub.f32 %v9599_v56, %v9600_v9 }
0x18ff   : > { %15318 = vmatprep.subr.mxu1 %v15944_v14 }
0x1900   : > { %v15916_v61 = vpop.eup %15915  ;;  %v9602_v42 = vand.u32 4294901760, %v9601_v5 }
0x1901   : > { %v9066_v51 = vsel %vm2240_vm5, %v15916_v61, 0.0 }
0x1902   : > { %9067 = vadd.xlane.f32.xlu1 %v9066_v51 }
0x1913   : > { %9526 = vrot.lane.b32.xlu1 %v17872_v15, %s15952_s24 }
0x198b   : > { %v9068_v27 = vpop.xlane.xlu1 %9067 }
0x198c   : > { %15917 = vrcp.f32 %v9068_v27 }
0x198f   : > { %v9527_v43 = vpop.permute.xlu1 %9526 }
0x1990   : > { %v9530_v45 = vsel %vm1789_vm4, %v9527_v43, 0 }
0x1991   : > { %v9563_v59 = vand.u32 4294901760, %v9530_v45 }
0x1993   : > { %v9640_v34 = vsub.f32 %v9530_v45, %v9563_v59 }
0x1995   : > { %v9641_v16 = vand.u32 4294901760, %v9640_v34 }
0x1997   : > { %v9642_v47 = vsub.f32 %v9640_v34, %v9641_v16 }
0x1999   : > { %v15918_v0 = vpop.eup %15917  ;;  %v9643_v2 = vand.u32 4294901760, %v9642_v47 }
0x199a   : > { %v9070_v13 = vmul.f32 %v15918_v0, %v15916_v61 }
0x199c   : > { %v9074_v32 = vsel %vm2254_vm7, %v9070_v13, 0 }
0x199d   : > { %v9144_v38 = vand.u32 4294901760, %v9074_v32 }
0x199f   : > { %v9145_v35 = vsub.f32 %v9074_v32, %v9144_v38  ;;  %15311 = vmatmul.mubr.f32.vlgmr.msra.gmra.mxu1 %v9144_v38 }
0x19a0   : > { %15319 = vmatpush3.msra.mxu1 %v9109_v31  ;;  %15320 = vmatprep.mubr.msk.f32.mxu1 %vm15945_vm2, %v15944_v14 }
0x19a1   : > { %15328 = vmatprep.subr.mxu1 %v15944_v14  ;;  %v9146_v57 = vand.u32 4294901760, %v9145_v35 }
0x19a3   : > { %15321 = vmatmul.mubr.f32.vlgmr.msra.gmra.mxu1 %v9146_v57  ;;  %v9147_v18 = vsub.f32 %v9145_v35, %v9146_v57 }
0x19a4   : > { %15329 = vmatpush3.msra.mxu1 %v9109_v31  ;;  %15330 = vmatprep.mubr.msk.f32.mxu1 %vm15945_vm2, %v15944_v14 }
0x19a5   : > { %15338 = vmatprep.subr.mxu1 %v15944_v14  ;;  %v9148_v1 = vand.u32 4294901760, %v9147_v18 }
0x19a7   : > { %15306 = vmatmul.mubr.f32.vlgmr.msra.gmra.mxu0 %v9148_v1  ;;  %15331 = vmatmul.mubr.f32.vlgmr.msra.gmra.mxu1 %v9144_v38 }
0x19a8   : > { %15314 = vmatpush3.msra.mxu0 %v9186_v6  ;;  %15339 = vmatpush3.xpose.msra.mxu1 %v9643_v2 }
0x19a9   : > { %15315 = vmatprep.mubr.msk.f32.mxu0 %vm15945_vm2, %v15944_v14  ;;  %15323 = vmatprep.subr.mxu0 %v15944_v14 }
0x19aa   : > { %15340 = vmatprep.mubr.msk.f32.mxu1 %vm15945_vm2, %v15944_v14  ;;  %15348 = vmatprep.subr.mxu1 %v15944_v14 }
0x19ab   : > { %15316 = vmatmul.mubr.f32.vlgmr.msra.gmra.mxu0 %v9145_v35  ;;  %15341 = vmatmul.mubr.f32.vlgmr.msra.gmra.mxu1 %v9598_v8 }
0x19ac   : > { %15324 = vmatpush3.msra.mxu0 %v9187_v62  ;;  %15349 = vmatpush3.xpose.msra.mxu1 %v9563_v59 }
0x19ad   : > { %15325 = vmatprep.mubr.msk.f32.mxu0 %vm15945_vm2, %v15944_v14  ;;  %15333 = vmatprep.subr.mxu0 %v15944_v14 }
0x19ae   : > { %15350 = vmatprep.mubr.msk.f32.mxu1 %vm15945_vm2, %v15944_v14  ;;  %15358 = vmatprep.subr.mxu1 %v15944_v14 }
0x19af   : > { %15326 = vmatmul.mubr.f32.vlgmr.msra.gmra.mxu0 %v9144_v38  ;;  %15351 = vmatmul.mubr.f32.vlgmr.msra.gmra.mxu1 %v9600_v9 }
0x19b0   : > { %15334 = vmatpush3.xpose.msra.mxu0 %v9563_v59  ;;  %15359 = vmatpush3.xpose.msra.mxu1 %v9563_v59 }
0x19b1   : > { %15335 = vmatprep.mubr.msk.f32.mxu0 %vm15945_vm2, %v15944_v14  ;;  %15343 = vmatprep.subr.mxu0 %v15944_v14 }
0x19b2   : > { %15360 = vmatprep.mubr.msk.f32.mxu1 %vm15945_vm2, %v15944_v14  ;;  %15368 = vmatprep.subr.mxu1 %v15944_v14 }
0x19b3   : > { %15336 = vmatmul.mubr.f32.vlgmr.msra.gmra.mxu0 %v9602_v42  ;;  %15361 = vmatmul.mubr.f32.vlgmr.msra.gmra.mxu1 %v9598_v8 }
0x19b4   : > { %15344 = vmatpush3.xpose.msra.mxu0 %v9640_v34  ;;  %15345 = vmatprep.mubr.msk.f32.mxu0 %vm15945_vm2, %v15944_v14 }
0x19b5   : > { %15353 = vmatprep.subr.mxu0 %v15944_v14  ;;  %15370 = vmatprep.mubr.msk.f32.mxu1 %vm15945_vm2, %v15944_v14 }
0x19b7   : > { %15346 = vmatmul.mubr.f32.vlgmr.msra.gmra.mxu0 %v9599_v56 }
0x19b8   : > { %15354 = vmatpush3.xpose.msra.mxu0 %v9641_v16  ;;  %15355 = vmatprep.mubr.msk.f32.mxu0 %vm15945_vm2, %v15944_v14 }
0x19b9   : > { %15363 = vmatprep.subr.mxu0 %v15944_v14 }
0x19bb   : > { %15356 = vmatmul.mubr.f32.vlgmr.msra.gmra.mxu0 %v9598_v8 }
0x19bc   : > { %15365 = vmatprep.mubr.msk.f32.mxu0 %vm15945_vm2, %v15944_v14 }
0x1a5f   : > { %v9226_v10 = vpop.f32.mrf.mxu1 }
0x1a61   : > { %v15312_v4 = vpop.f32.mrf.mxu1 }
0x1a63   : > { %v9374_v40 = vpop.f32.mrf.mxu1 }
0x1a65   : > { %v15322_v3 = vpop.f32.mrf.mxu1 }
0x1a67   : > { %v9150_v46 = vpop.f32.mrf.mxu0  ;;  %v9520_v19 = vpop.f32.mrf.mxu1 }
0x1a68   : > { %v9227_v36 = vadd.f32 %v9226_v10, %v9150_v46 }
0x1a69   : > { %v15307_v41 = vpop.f32.mrf.mxu0  ;;  %v15332_v50 = vpop.f32.mrf.mxu1 }
0x1a6b   : > { %v9300_v48 = vpop.f32.mrf.mxu0  ;;  %v9680_v24 = vpop.f32.mrf.mxu1 }
0x1a6c   : > { %v9301_v58 = vadd.f32 %v9300_v48, %v9227_v36 }
0x1a6d   : > { %v15317_v12 = vpop.f32.mrf.mxu0  ;;  %v15342_v44 = vpop.f32.mrf.mxu1 }
0x1a6e   : > { %v9375_v33 = vadd.f32 %v9374_v40, %v9301_v58 }
0x1a6f   : > { %v9448_v49 = vpop.f32.mrf.mxu0  ;;  %v9828_v30 = vpop.f32.mrf.mxu1 }
0x1a70   : > { %v9449_v37 = vadd.f32 %v9448_v49, %v9375_v33 }
0x1a71   : > { %v15327_v23 = vpop.f32.mrf.mxu0  ;;  %v15352_v25 = vpop.f32.mrf.mxu1 }
0x1a72   : > { %v17995_v28 = vadd.f32 %v9520_v19, %v9449_v37 }
0x1a73   : > { %v9604_v7 = vpop.f32.mrf.mxu0  ;;  %v9974_v63 = vpop.f32.mrf.mxu1 }
0x1a74   : > { %v9681_v60 = vadd.f32 %v9680_v24, %v9604_v7 }
0x1a75   : > { %v15337_v11 = vpop.f32.mrf.mxu0  ;;  %v15362_v22 = vpop.f32.mrf.mxu1 }
0x1a77   : > { %v9754_v20 = vpop.f32.mrf.mxu0 }
0x1a78   : > { %v9755_v21 = vadd.f32 %v9754_v20, %v9681_v60 }
0x1a79   : > { %v15347_v31 = vpop.f32.mrf.mxu0 }
0x1a7a   : > { %v9829_v6 = vadd.f32 %v9828_v30, %v9755_v21 }
0x1a7b   : > { %v9902_v62 = vpop.f32.mrf.mxu0 }
0x1a7c   : > { %v9903_v29 = vadd.f32 %v9902_v62, %v9829_v6 }
0x1a7d   : > { %v15357_v55 = vpop.f32.mrf.mxu0 }
0x1a7e   : > { %v9975_v61 = vadd.f32 %v9974_v63, %v9903_v29 }
0x1a80   : > { %v9978_v51 = vsel %vm2240_vm5, %v9975_v61, -inf }
0x1a81   : > { %9979 = vmax.xlane.f32.xlu1 %v9978_v51 }
0x1a92   : > { %10444 = vrot.lane.b32.xlu1 %v17872_v15, %s15953_s25 }
0x1a96   : > { %10442 = vrot.lane.b32.xlu1 %v17872_v15, %s15954_s26 }
0x1b0a   : > { %v9980_v27 = vpop.xlane.xlu1 %9979 }
0x1b0b   : > { %v9981_v43 = vsub.f32 %v9975_v61, %v9980_v27 }
0x1b0d   : > { %v9982_v45 = vmul.f32 1.442695, %v9981_v43 }
0x1b0e   : > { %v10445_v17 = vpop.permute.xlu1 %10444 }
0x1b0f   : > { %15919 = vpow2.f32 %v9982_v45  ;;  %v10448_v26 = vsel %vm1789_vm4, %v10445_v17, 0 }
0x1b10   : > { %v10481_v8 = vand.u32 4294901760, %v10448_v26 }
0x1b12   : > { %v10558_v56 = vsub.f32 %v10448_v26, %v10481_v8  ;;  %v10443_v2 = vpop.permute.xlu1 %10442 }
0x1b13   : > { %v10446_v10 = vsel %vm1789_vm4, %v10443_v2, 0 }
0x1b14   : > { %v10559_v42 = vand.u32 4294901760, %v10558_v56  ;;  %v10516_v40 = vand.u32 4294901760, %v10446_v10 }
0x1b16   : > { %v10560_v46 = vsub.f32 %v10558_v56, %v10559_v42  ;;  %v10517_v36 = vsub.f32 %v10446_v10, %v10516_v40 }
0x1b18   : > { %v10561_v50 = vand.u32 4294901760, %v10560_v46  ;;  %v10518_v48 = vand.u32 4294901760, %v10517_v36 }
0x1b1a   : > { %v10519_v24 = vsub.f32 %v10517_v36, %v10518_v48 }
0x1b1c   : > { %v15920_v59 = vpop.eup %15919  ;;  %v10520_v58 = vand.u32 4294901760, %v10519_v24  ;;  %v13656_v24 = vld [vmem:[%s18855_s5 + $0x30] sm:$0xff] }
0x1b1d   : > { %v9984_v0 = vsel %vm2240_vm5, %v15920_v59, 0.0 }
0x1b1e   : > { %9985 = vadd.xlane.f32.xlu0 %v9984_v0 }
0x1b34   : > { %9989 = vrot.lane.b32.xlu0 %v17872_v15, %s15955_s27 }
0x1ba7   : > { %v9986_v34 = vpop.xlane.xlu0 %9985 }
0x1ba8   : > { %15921 = vrcp.f32 %v9986_v34 }
0x1bab   : > { %v9990_v13 = vpop.permute.xlu0 %9989 }
0x1bac   : > { %v9994_v32 = vsel %vm2258_vm6, %v9990_v13, 0 }
0x1bad   : > { %v10027_v38 = vand.u32 4294901760, %v9994_v32 }
0x1baf   : > { %v10104_v16 = vsub.f32 %v9994_v32, %v10027_v38  ;;  %15364 = vmatpush3.msra.mxu0 %v10027_v38 }
0x1bb0   : > { %15373 = vmatprep.subr.mxu0 %v15944_v14 }
0x1bb1   : > { %v10105_v35 = vand.u32 4294901760, %v10104_v16 }
0x1bb3   : > { %v10106_v57 = vsub.f32 %v10104_v16, %v10105_v35 }
0x1bb5   : > { %v15922_v47 = vpop.eup %15921  ;;  %v10107_v18 = vand.u32 4294901760, %v10106_v57 }
0x1bb6   : > { %v9988_v1 = vmul.f32 %v15922_v47, %v15920_v59 }
0x1bb7   : > { %15369 = vmatpush3.msra.mxu1 %v10107_v18 }
0x1bb8   : > { %15378 = vmatprep.subr.mxu1 %v15944_v14  ;;  %v9992_v9 = vsel %vm2254_vm7, %v9988_v1, 0 }
0x1bb9   : > { %v10062_v5 = vand.u32 4294901760, %v9992_v9 }
0x1bbb   : > { %v10063_v4 = vsub.f32 %v9992_v9, %v10062_v5  ;;  %15371 = vmatmul.mubr.f32.vlgmr.msra.gmra.mxu1 %v10062_v5 }
0x1bbc   : > { %15379 = vmatpush3.msra.mxu1 %v10027_v38  ;;  %15380 = vmatprep.mubr.msk.f32.mxu1 %vm15945_vm2, %v15944_v14 }
0x1bbd   : > { %15388 = vmatprep.subr.mxu1 %v15944_v14  ;;  %v10064_v3 = vand.u32 4294901760, %v10063_v4 }
0x1bbf   : > { %15381 = vmatmul.mubr.f32.vlgmr.msra.gmra.mxu1 %v10064_v3  ;;  %v10065_v19 = vsub.f32 %v10063_v4, %v10064_v3 }
0x1bc0   : > { %15389 = vmatpush3.msra.mxu1 %v10027_v38  ;;  %15390 = vmatprep.mubr.msk.f32.mxu1 %vm15945_vm2, %v15944_v14 }
0x1bc1   : > { %15398 = vmatprep.subr.mxu1 %v15944_v14  ;;  %v10066_v41 = vand.u32 4294901760, %v10065_v19 }
0x1bc3   : > { %15366 = vmatmul.mubr.f32.vlgmr.msra.gmra.mxu0 %v10066_v41  ;;  %15391 = vmatmul.mubr.f32.vlgmr.msra.gmra.mxu1 %v10062_v5 }
0x1bc4   : > { %15374 = vmatpush3.msra.mxu0 %v10104_v16  ;;  %15399 = vmatpush3.xpose.msra.mxu1 %v10561_v50 }
0x1bc5   : > { %15375 = vmatprep.mubr.msk.f32.mxu0 %vm15945_vm2, %v15944_v14  ;;  %15383 = vmatprep.subr.mxu0 %v15944_v14 }
0x1bc6   : > { %15400 = vmatprep.mubr.msk.f32.mxu1 %vm15945_vm2, %v15944_v14  ;;  %15408 = vmatprep.subr.mxu1 %v15944_v14 }
0x1bc7   : > { %15376 = vmatmul.mubr.f32.vlgmr.msra.gmra.mxu0 %v10063_v4  ;;  %15401 = vmatmul.mubr.f32.vlgmr.msra.gmra.mxu1 %v10516_v40 }
0x1bc8   : > { %15384 = vmatpush3.msra.mxu0 %v10105_v35  ;;  %15409 = vmatpush3.xpose.msra.mxu1 %v10481_v8 }
0x1bc9   : > { %15385 = vmatprep.mubr.msk.f32.mxu0 %vm15945_vm2, %v15944_v14  ;;  %15393 = vmatprep.subr.mxu0 %v15944_v14 }
0x1bca   : > { %15410 = vmatprep.mubr.msk.f32.mxu1 %vm15945_vm2, %v15944_v14  ;;  %15418 = vmatprep.subr.mxu1 %v15944_v14 }
0x1bcb   : > { %15386 = vmatmul.mubr.f32.vlgmr.msra.gmra.mxu0 %v10062_v5  ;;  %15411 = vmatmul.mubr.f32.vlgmr.msra.gmra.mxu1 %v10518_v48  ;;  %v13657_v48 = vld [vmem:[%s18855_s5 + $0x38] sm:$0xff] }
0x1bcc   : > { %15394 = vmatpush3.xpose.msra.mxu0 %v10481_v8  ;;  %15419 = vmatpush3.xpose.msra.mxu1 %v10481_v8 }
0x1bcd   : > { %15395 = vmatprep.mubr.msk.f32.mxu0 %vm15945_vm2, %v15944_v14  ;;  %15403 = vmatprep.subr.mxu0 %v15944_v14 }
0x1bce   : > { %15420 = vmatprep.mubr.msk.f32.mxu1 %vm15945_vm2, %v15944_v14  ;;  %15428 = vmatprep.subr.mxu1 %v15944_v14 }
0x1bcf   : > { %15396 = vmatmul.mubr.f32.vlgmr.msra.gmra.mxu0 %v10520_v58  ;;  %15421 = vmatmul.mubr.f32.vlgmr.msra.gmra.mxu1 %v10516_v40  ;;  %v18078_v58 = vand.u32 4294901760, %v13657_v48 }
0x1bd0   : > { %15404 = vmatpush3.xpose.msra.mxu0 %v10558_v56  ;;  %15405 = vmatprep.mubr.msk.f32.mxu0 %vm15945_vm2, %v15944_v14 }
0x1bd1   : > { %15413 = vmatprep.subr.mxu0 %v15944_v14  ;;  %15430 = vmatprep.mubr.msk.f32.mxu1 %vm15945_vm2, %v15944_v14 }
0x1bd3   : > { %15406 = vmatmul.mubr.f32.vlgmr.msra.gmra.mxu0 %v10517_v36 }
0x1bd4   : > { %15414 = vmatpush3.xpose.msra.mxu0 %v10559_v42  ;;  %15415 = vmatprep.mubr.msk.f32.mxu0 %vm15945_vm2, %v15944_v14 }
0x1bd5   : > { %15423 = vmatprep.subr.mxu0 %v15944_v14 }
0x1bd7   : > { %15416 = vmatmul.mubr.f32.vlgmr.msra.gmra.mxu0 %v10516_v40 }
0x1bd8   : > { %15425 = vmatprep.mubr.msk.f32.mxu0 %vm15945_vm2, %v15944_v14 }
0x1c7b   : > { %v10144_v12 = vpop.f32.mrf.mxu1 }
0x1c7d   : > { %v15372_v44 = vpop.f32.mrf.mxu1 }
0x1c7e   : > { %v18083_v44 = vsub.f32 %v13657_v48, %v18078_v58 }
0x1c7f   : > { %v10292_v33 = vpop.f32.mrf.mxu1 }
0x1c81   : > { %v15382_v49 = vpop.f32.mrf.mxu1 }
0x1c82   : > { %v11489_v49 = vand.u32 4294901760, %v18083_v44 }
0x1c83   : > { %v10068_v30 = vpop.f32.mrf.mxu0  ;;  %v10438_v37 = vpop.f32.mrf.mxu1 }
0x1c84   : > { %v10145_v32 = vadd.f32 %v10144_v12, %v10068_v30  ;;  %v18080_v12 = vand.u32 4294901760, %v13656_v24 }
0x1c85   : > { %v15367_v23 = vpop.f32.mrf.mxu0  ;;  %v15392_v25 = vpop.f32.mrf.mxu1 }
0x1c87   : > { %v10218_v7 = vpop.f32.mrf.mxu0  ;;  %v10598_v63 = vpop.f32.mrf.mxu1 }
0x1c88   : > { %v10219_v38 = vadd.f32 %v10218_v7, %v10145_v32 }
0x1c89   : > { %v15377_v11 = vpop.f32.mrf.mxu0  ;;  %v15402_v22 = vpop.f32.mrf.mxu1 }
0x1c8a   : > { %v10293_v26 = vadd.f32 %v10292_v33, %v10219_v38  ;;  %v18086_v33 = vsub.f32 %v13656_v24, %v18080_v12 }
0x1c8b   : > { %v10366_v60 = vpop.f32.mrf.mxu0  ;;  %v10746_v20 = vpop.f32.mrf.mxu1 }
0x1c8c   : > { %v10367_v16 = vadd.f32 %v10366_v60, %v10293_v26  ;;  %v11496_v30 = vand.u32 4294901760, %v18086_v33  ;;  %v13654_v60 = vld [vmem:[%s18855_s5 + $0x20] sm:$0xff] }
0x1c8d   : > { %v15387_v21 = vpop.f32.mrf.mxu0  ;;  %v15412_v31 = vpop.f32.mrf.mxu1 }
0x1c8e   : > { %v10439_v35 = vadd.f32 %v10438_v37, %v10367_v16  ;;  %v11490_v37 = vsub.f32 %v18083_v44, %v11489_v49  ;;  %v11497_v23 = vsub.f32 %v18086_v33, %v11496_v30  ;;  %v18113_v21 = vand.u32 4294901760, %v13654_v60 }
0x1c8f   : > { %v10522_v6 = vpop.f32.mrf.mxu0  ;;  %v10892_v62 = vpop.f32.mrf.mxu1 }
0x1c90   : > { %v10599_v61 = vadd.f32 %v10598_v63, %v10522_v6  ;;  %v11491_v25 = vand.u32 4294901760, %v11490_v37  ;;  %v11498_v7 = vand.u32 4294901760, %v11497_v23  ;;  %v13655_v63 = vld [vmem:[%s18855_s5 + $0x28] sm:$0xff] }
0x1c91   : > { %v15397_v29 = vpop.f32.mrf.mxu0  ;;  %v15422_v55 = vpop.f32.mrf.mxu1  ;;  %v18105_v11 = vand.u32 4294901760, %v13655_v63 }
0x1c93   : > { %v10672_v51 = vpop.f32.mrf.mxu0 }
0x1c94   : > { %v10673_v27 = vadd.f32 %v10672_v51, %v10599_v61 }
0x1c95   : > { %v15407_v43 = vpop.f32.mrf.mxu0 }
0x1c96   : > { %v10747_v45 = vadd.f32 %v10746_v20, %v10673_v27  ;;  %v18111_v20 = vsub.f32 %v13655_v63, %v18105_v11 }
0x1c97   : > { %v10820_v59 = vpop.f32.mrf.mxu0 }
0x1c98   : > { %v10821_v0 = vadd.f32 %v10820_v59, %v10747_v45  ;;  %v11503_v6 = vand.u32 4294901760, %v18111_v20 }
0x1c99   : > { %v15417_v34 = vpop.f32.mrf.mxu0 }
0x1c9a   : > { %v10893_v13 = vadd.f32 %v10892_v62, %v10821_v0  ;;  %v18119_v62 = vsub.f32 %v13654_v60, %v18113_v21  ;;  %v11504_v55 = vsub.f32 %v18111_v20, %v11503_v6 }
0x1c9c   : > { %v10896_v17 = vsel %vm2240_vm5, %v10893_v13, -inf  ;;  %v11510_v61 = vand.u32 4294901760, %v18119_v62  ;;  %v11505_v27 = vand.u32 4294901760, %v11504_v55 }
0x1c9d   : > { %10897 = vmax.xlane.f32.xlu0 %v10896_v17 }
0x1c9e   : > { %v11511_v43 = vsub.f32 %v18119_v62, %v11510_v61 }
0x1ca0   : > { %v11512_v0 = vand.u32 4294901760, %v11511_v43 }
0x1cb3   : > { %10907 = vrot.lane.b32.xlu0 %v17872_v15, %s15956_s28  ;;  %s19073_s28 = smov 24  }
0x1cb7   : > { %11365 = vrot.lane.b32.xlu0 %v10439_v35, %s19071_s18 }
0x1d26   : > { %v10898_v8 = vpop.xlane.xlu0 %10897 }
0x1d27   : > { %v10899_v57 = vsub.f32 %v10893_v13, %v10898_v8 }
0x1d29   : > { %v10900_v47 = vmul.f32 1.442695, %v10899_v57 }
0x1d2a   : > { %v10908_v18 = vpop.permute.xlu0 %10907 }
0x1d2b   : > { %15923 = vpow2.f32 %v10900_v47  ;;  %v10912_v56 = vsel %vm2258_vm6, %v10908_v18, 0 }
0x1d2c   : > { %v10945_v1 = vand.u32 4294901760, %v10912_v56 }
0x1d2e   : > { %v11022_v2 = vsub.f32 %v10912_v56, %v10945_v1  ;;  %15424 = vmatpush3.msra.mxu0 %v10945_v1 }
0x1d2f   : > { %15433 = vmatprep.subr.mxu0 %v15944_v14 }
0x1d30   : > { %v11023_v9 = vand.u32 4294901760, %v11022_v2 }
0x1d32   : > { %v11024_v5 = vsub.f32 %v11022_v2, %v11023_v9 }
0x1d34   : > { %v11025_v42 = vand.u32 4294901760, %v11024_v5 }
0x1d36   : > { %15429 = vmatpush3.msra.mxu1 %v11025_v42 }
0x1d37   : > { %15438 = vmatprep.subr.mxu1 %v15944_v14 }
0x1d38   : > { %v15924_v15 = vpop.eup %15923 }
0x1d39   : > { %v10902_v10 = vsel %vm2240_vm5, %v15924_v15, 0.0 }
0x1d3a   : > { %10903 = vadd.xlane.f32.xlu1 %v10902_v10 }
0x1d4b   : > { %11361 = vrot.lane.b32.xlu1 %v17995_v28, %s19072_s19 }
0x1dc3   : > { %v10904_v4 = vpop.xlane.xlu1 %10903 }
0x1dc4   : > { %15925 = vrcp.f32 %v10904_v4 }
0x1dc7   : > { %v11362_v18 = vpop.permute.xlu1 %11361 }
0x1dc8   : > { %v11372_v56 = vsel %vm1789_vm4, %v17945_v39, %v11362_v18 }
0x1dd1   : > { %v15926_v40 = vpop.eup %15925 }
0x1dd2   : > { %v10906_v3 = vmul.f32 %v15926_v40, %v15924_v15 }
0x1dd4   : > { %v10910_v46 = vsel %vm2254_vm7, %v10906_v3, 0 }
0x1dd5   : > { %v10980_v19 = vand.u32 4294901760, %v10910_v46 }
0x1dd7   : > { %v10981_v36 = vsub.f32 %v10910_v46, %v10980_v19  ;;  %15431 = vmatmul.mubr.f32.vlgmr.msra.gmra.mxu1 %v10980_v19 }
0x1dd8   : > { %15439 = vmatpush3.msra.mxu1 %v10945_v1  ;;  %15440 = vmatprep.mubr.msk.f32.mxu1 %vm15945_vm2, %v15944_v14 }
0x1dd9   : > { %15448 = vmatprep.subr.mxu1 %v15944_v14  ;;  %v10982_v41 = vand.u32 4294901760, %v10981_v36 }
0x1ddb   : > { %15441 = vmatmul.mubr.f32.vlgmr.msra.gmra.mxu1 %v10982_v41  ;;  %v10983_v50 = vsub.f32 %v10981_v36, %v10982_v41 }
0x1ddc   : > { %15449 = vmatpush3.msra.mxu1 %v10945_v1  ;;  %15450 = vmatprep.mubr.msk.f32.mxu1 %vm15945_vm2, %v15944_v14  ;;  %v11366_v1 = vpop.permute.xlu0 %11365 }
0x1ddd   : > { %v10984_v28 = vand.u32 4294901760, %v10983_v50  ;;  %15464 = vmatprep.subr.mxu1 %v15944_v14 }
0x1ddf   : > { %15426 = vmatmul.mubr.f32.vlgmr.msra.gmra.mxu0 %v10984_v28  ;;  %15451 = vmatmul.mubr.f32.vlgmr.msra.gmra.mxu1 %v10980_v19 }
0x1de0   : > { %15434 = vmatpush3.msra.mxu0 %v11022_v2  ;;  %15435 = vmatprep.mubr.msk.f32.mxu0 %vm15945_vm2, %v15944_v14  ;;  %v11373_v2 = vsel %vm5474_vm8, %v11372_v56, %v11366_v1 }
0x1de1   : > { %15443 = vmatprep.subr.mxu0 %v15944_v14  ;;  %15472 = vmatprep.mubr.msk.f32.mxu1 %vm15945_vm2, %v15944_v14 }
0x1de2   : > { %15465 = vmatpush3.msra.mxu1 %v11491_v25  ;;  %v18189_v25 = vld [vmem:[%s18853_s3 + $0x8] sm:$0xff] }
0x1de3   : > { %15436 = vmatmul.mubr.f32.vlgmr.msra.gmra.mxu0 %v10981_v36  ;;  %15466 = vmatprep.subr.mxu1 %v15944_v14 }
0x1de4   : > { %15444 = vmatpush3.msra.mxu0 %v11023_v9  ;;  %15445 = vmatprep.mubr.msk.f32.mxu0 %vm15945_vm2, %v15944_v14 }
0x1de5   : > { %15453 = vmatprep.subr.mxu0 %v15944_v14  ;;  %15467 = vmatpush3.msra.mxu1 %v11498_v7  ;;  %v19074_v7 = vsub.s32 5, %v16732_v53 }
0x1de6   : > { %15468 = vmatprep.subr.mxu1 %v15944_v14 }
0x1de7   : > { %15446 = vmatmul.mubr.f32.vlgmr.msra.gmra.mxu0 %v10980_v19  ;;  %15469 = vmatpush3.msra.mxu1 %v11505_v27  ;;  %v11872_v63 = vrot.slane %v18189_v25, %v19074_v7  ;;  %v13659_v27 = vld [vmem:[%s18856_s6 + $0x30] sm:$0xff]  ;;  %v13676_v7 = vld [vmem:[%s18857_s7 + $0xe0] sm:$0xff] }
0x1de8   : > { %15461 = vmatprep.mubr.msk.f32.mxu0 %vm15945_vm2, %v15944_v14  ;;  %15454 = vmatpush3.msra.mxu0 %v18078_v58 }
0x1de9   : > { %15455 = vmatprep.subr.mxu0 %v15944_v14  ;;  %15470 = vmatprep.subr.mxu1 %v15944_v14 }
0x1dea   : > { %15456 = vmatpush3.msra.mxu0 %v18080_v12  ;;  %15471 = vmatpush3.msra.mxu1 %v11512_v0  ;;  %v13658_v0 = vld [vmem:[%s18856_s6 + $0x28] sm:$0xff] }
0x1deb   : > { %15457 = vmatprep.subr.mxu0 %v15944_v14  ;;  %15486 = vmatprep.subr.mxu1 %v15944_v14 }
0x1dec   : > { %15458 = vmatpush3.msra.mxu0 %v18105_v11 }
0x1ded   : > { %15459 = vmatprep.subr.mxu0 %v15944_v14 }
0x1dee   : > { %15460 = vmatpush3.msra.mxu0 %v18113_v21 }
0x1def   : > { %15475 = vmatprep.subr.mxu0 %v15944_v14 }
0x1e97   : > { %v11062_v22 = vpop.f32.mrf.mxu1 }
0x1e99   : > { %v15432_v31 = vpop.f32.mrf.mxu1 }
0x1e9b   : > { %v11210_v29 = vpop.f32.mrf.mxu1 }
0x1e9d   : > { %v15442_v51 = vpop.f32.mrf.mxu1 }
0x1e9f   : > { %v10986_v45 = vpop.f32.mrf.mxu0  ;;  %v11356_v59 = vpop.f32.mrf.mxu1 }
0x1ea0   : > { %v11063_v17 = vadd.f32 %v11062_v22, %v10986_v45 }
0x1ea1   : > { %v15427_v34 = vpop.f32.mrf.mxu0  ;;  %v15452_v13 = vpop.f32.mrf.mxu1 }
0x1ea3   : > { %v11136_v32 = vpop.f32.mrf.mxu0 }
0x1ea4   : > { %v11137_v38 = vadd.f32 %v11136_v32, %v11063_v17  ;;  %v18237_v32 = vand.u32 4294901760, %v13658_v0 }
0x1ea5   : > { %v15437_v26 = vpop.f32.mrf.mxu0 }
0x1ea6   : > { %v11211_v16 = vadd.f32 %v11210_v29, %v11137_v38  ;;  %v13661_v29 = vld [vmem:[%s18856_s6 + $0x40] sm:$0xff] }
0x1ea7   : > { %v11284_v35 = vpop.f32.mrf.mxu0  ;;  %v18204_v55 = vand.u32 4294901760, %v13661_v29 }
0x1ea8   : > { %v11285_v8 = vadd.f32 %v11284_v35, %v11211_v16  ;;  %v18246_v35 = vsub.f32 %v13658_v0, %v18237_v32 }
0x1ea9   : > { %v15447_v57 = vpop.f32.mrf.mxu0 }
0x1eaa   : > { %v11357_v47 = vadd.f32 %v11356_v59, %v11285_v8  ;;  %v18223_v59 = vand.u32 4294901760, %v13659_v27 }
0x1eac   : > { %11369 = vrot.lane.b32.xlu1 %v11357_v47, %s19073_s28  ;;  %v18235_v17 = vsub.f32 %v13659_v27, %v18223_v59  ;;  %v12037_v47 = vand.u32 4294901760, %v18246_v35 }
0x1eae   : > { %v12030_v16 = vand.u32 4294901760, %v18235_v17  ;;  %v12038_v56 = vsub.f32 %v18246_v35, %v12037_v47 }
0x1eb0   : > { %v12031_v57 = vsub.f32 %v18235_v17, %v12030_v16  ;;  %v12039_v1 = vand.u32 4294901760, %v12038_v56 }
0x1eb2   : > { %v12032_v18 = vand.u32 4294901760, %v12031_v57 }
0x1f1e   : > { %v11370_v9 = vpop.permute.xlu1 %11369 }
0x1f1f   : > { %v11374_v5 = vsel %vm5476_vm9, %v11373_v2, %v11370_v9 }
0x1f20   : > { %v11381_v42 = vsel %vm1297_vm3, %v11374_v5, 0 }
0x1f21   : > { %v11452_v15 = vand.u32 4294901760, %v11381_v42 }
0x1f23   : > { %v11453_v10 = vsub.f32 %v11381_v42, %v11452_v15  ;;  %15473 = vmatmul.mubr.f32.vlgmr.msra.gmra.mxu1 %v11452_v15  ;;  %v19075_v42 = vsub.s32 3, %v16732_v53 }
0x1f24   : > { %15487 = vmatpush3.msra.mxu1 %v18078_v58  ;;  %15494 = vmatprep.mubr.msk.f32.mxu1 %vm15945_vm2, %v15944_v14 }
0x1f25   : > { %v11454_v4 = vand.u32 4294901760, %v11453_v10  ;;  %15488 = vmatprep.subr.mxu1 %v15944_v14 }
0x1f26   : > { %15489 = vmatpush3.msra.mxu1 %v18080_v12 }
0x1f27   : > { %v11455_v39 = vsub.f32 %v11453_v10, %v11454_v4  ;;  %15490 = vmatprep.subr.mxu1 %v15944_v14 }
0x1f28   : > { %15491 = vmatpush3.msra.mxu1 %v18105_v11 }
0x1f29   : > { %v11456_v40 = vand.u32 4294901760, %v11455_v39  ;;  %15492 = vmatprep.subr.mxu1 %v15944_v14 }
0x1f2a   : > { %15493 = vmatpush3.msra.mxu1 %v18113_v21 }
0x1f2b   : > { %15495 = vmatmul.mubr.f32.vlgmr.msra.gmra.mxu1 %v11454_v4  ;;  %15508 = vmatprep.subr.mxu1 %v15944_v14  ;;  %v19076_v4 = vsub.s32 4, %v16732_v53 }
0x1f2c   : > { %15462 = vmatmul.mubr.f32.vlgmr.msra.gmra.mxu0 %v11456_v40  ;;  %15509 = vmatpush3.msra.mxu1 %v18078_v58 }
0x1f2d   : > { %15476 = vmatpush3.msra.mxu0 %v18083_v44  ;;  %15510 = vmatprep.subr.mxu1 %v15944_v14  ;;  %v11895_v39 = vrot.slane %v18189_v25, %v19076_v4 }
0x1f2e   : > { %15477 = vmatprep.subr.mxu0 %v15944_v14  ;;  %15511 = vmatpush3.msra.mxu1 %v18080_v12 }
0x1f2f   : > { %15478 = vmatpush3.msra.mxu0 %v18086_v33  ;;  %15512 = vmatprep.subr.mxu1 %v15944_v14 }
0x1f30   : > { %15479 = vmatprep.subr.mxu0 %v15944_v14  ;;  %15513 = vmatpush3.msra.mxu1 %v18105_v11 }
0x1f31   : > { %15480 = vmatpush3.msra.mxu0 %v18111_v20  ;;  %15514 = vmatprep.subr.mxu1 %v15944_v14 }
0x1f32   : > { %15481 = vmatprep.subr.mxu0 %v15944_v14  ;;  %15483 = vmatprep.mubr.msk.f32.mxu0 %vm15945_vm2, %v15944_v14 }
0x1f33   : > { %15482 = vmatpush3.msra.mxu0 %v18119_v62  ;;  %15515 = vmatpush3.msra.mxu1 %v18113_v21 }
0x1f34   : > { %15516 = vmatprep.mubr.msk.f32.mxu1 %vm15945_vm2, %v15944_v14  ;;  %15484 = vmatmul.mubr.f32.vlgmr.msra.gmra.mxu0 %v11453_v10 }
0x1f35   : > { %15497 = vmatprep.subr.mxu0 %v15944_v14  ;;  %15517 = vmatmul.mubr.f32.vlgmr.msra.gmra.mxu1 %v11452_v15 }
0x1f36   : > { %15498 = vmatpush3.msra.mxu0 %v11489_v49  ;;  %15505 = vmatprep.mubr.msk.f32.mxu0 %vm15945_vm2, %v15944_v14 }
0x1f37   : > { %15499 = vmatprep.subr.mxu0 %v15944_v14  ;;  %15530 = vmatprep.subr.mxu1 %v15944_v14 }
0x1f38   : > { %15500 = vmatpush3.msra.mxu0 %v11496_v30  ;;  %15538 = vmatprep.mubr.msk.f32.mxu1 %vm15945_vm2, %v15944_v14 }
0x1f39   : > { %15501 = vmatprep.subr.mxu0 %v15944_v14 }
0x1f3a   : > { %15502 = vmatpush3.msra.mxu0 %v11503_v6 }
0x1f3b   : > { %15503 = vmatprep.subr.mxu0 %v15944_v14 }
0x1f3c   : > { %15504 = vmatpush3.msra.mxu0 %v11510_v61  ;;  %v18210_v61 = vsub.f32 %v13661_v29, %v18204_v55 }
0x1f3d   : > { %15506 = vmatmul.mubr.f32.vlgmr.msra.gmra.mxu0 %v11452_v15  ;;  %15519 = vmatprep.subr.mxu0 %v15944_v14  ;;  %v11890_v15 = vrot.slane %v18189_v25, %v19075_v42 }
0x1f3e   : > { %15527 = vmatprep.mubr.msk.f32.mxu0 %vm15945_vm2, %v15944_v14  ;;  %15520 = vmatpush3.msra.mxu0 %v18204_v55  ;;  %v12016_v43 = vand.u32 4294901760, %v18210_v61 }
0x1f3f   : > { %15521 = vmatprep.subr.mxu0 %v15944_v14 }
0x1f40   : > { %v12017_v34 = vsub.f32 %v18210_v61, %v12016_v43 }
0x1f42   : > { %v12018_v38 = vand.u32 4294901760, %v12017_v34 }
0x1f44   : > { %15531 = vmatpush3.msra.mxu1 %v12018_v38  ;;  %v13672_v38 = vld [vmem:[%s18857_s7 + $0xc0] sm:$0xff] }
0x1f45   : > { %15532 = vmatprep.subr.mxu1 %v15944_v14 }
0x1fe3   : > { %v11549_v3 = vpop.f32.mrf.mxu1 }
0x1fe5   : > { %v15474_v46 = vpop.f32.mrf.mxu1 }
0x1feb   : > { %v11706_v19 = vpop.f32.mrf.mxu1 }
0x1fec   : > { %v11458_v36 = vpop.f32.mrf.mxu0 }
0x1fed   : > { %v15496_v41 = vpop.f32.mrf.mxu1  ;;  %v11550_v24 = vadd.f32 %v11549_v3, %v11458_v36 }
0x1fee   : > { %v15463_v50 = vpop.f32.mrf.mxu0 }
0x1ff4   : > { %v11629_v28 = vpop.f32.mrf.mxu0 }
0x1ff5   : > { %v11864_v48 = vpop.f32.mrf.mxu1  ;;  %v11630_v44 = vadd.f32 %v11629_v28, %v11550_v24  ;;  %v13679_v24 = vld [vmem:[%s18857_s7 + $0xf8] sm:$0xff] }
0x1ff6   : > { %v15485_v58 = vpop.f32.mrf.mxu0 }
0x1ff7   : > { %v15518_v12 = vpop.f32.mrf.mxu1  ;;  %v11707_v33 = vadd.f32 %v11706_v19, %v11630_v44  ;;  %v18319_v58 = vand.u32 4294901760, %v13679_v24 }
0x1ff8   : > { %v13678_v12 = vld [vmem:[%s18857_s7 + $0xf0] sm:$0xff] }
0x1ff9   : > { %v18325_v44 = vsub.f32 %v13679_v24, %v18319_v58 }
0x1ffd   : > { %v11789_v49 = vpop.f32.mrf.mxu0 }
0x1ffe   : > { %v11790_v30 = vadd.f32 %v11789_v49, %v11707_v33  ;;  %v18327_v33 = vand.u32 4294901760, %v13678_v12  ;;  %v13677_v49 = vld [vmem:[%s18857_s7 + $0xe8] sm:$0xff] }
0x1fff   : > { %v15507_v37 = vpop.f32.mrf.mxu0 }
0x2000   : > { %v11865_v23 = vadd.f32 %v11864_v48, %v11790_v30  ;;  %v12515_v30 = vand.u32 4294901760, %v18325_v44  ;;  %v18336_v37 = vsub.f32 %v13678_v12, %v18327_v33 }
0x2002   : > { %v11868_v11 = vadd.f32 %v11865_v23, %v17748_v52  ;;  %v13660_v52 = vld [vmem:[%s18856_s6 + $0x38] sm:$0xff]  ;;  %v18338_v23 = vand.u32 4294901760, %v13677_v49 }
0x2003   : > { %v18212_v51 = vand.u32 4294901760, %v13660_v52 }
0x2004   : > { %v18195_v22 = vadd.f32 %v11872_v63, %v11868_v11  ;;  %v12516_v63 = vsub.f32 %v18325_v44, %v12515_v30  ;;  %v12522_v11 = vand.u32 4294901760, %v18336_v37 }
0x2005   : > { %v18221_v45 = vsub.f32 %v13660_v52, %v18212_v51  ;;  %15522 = vmatpush3.msra.mxu0 %v18212_v51  ;;  %v13674_v52 = vld [vmem:[%s18857_s7 + $0xd0] sm:$0xff] }
0x2006   : > { %v11874_v60 = vsel %vm1234_vm0, %v18195_v22, 0.0  ;;  %15523 = vmatprep.subr.mxu0 %v15944_v14 }
0x2007   : > { %11875 = vadd.xlane.f32.xlu0 %v11874_v60  ;;  %v12023_v13 = vand.u32 4294901760, %v18221_v45  ;;  %15524 = vmatpush3.msra.mxu0 %v18223_v59  ;;  %v18350_v60 = vsub.f32 %v13677_v49, %v18338_v23  ;;  %v13667_v49 = vld [vmem:[%s18857_s7 + $0x98] sm:$0xff] }
0x2008   : > { %15525 = vmatprep.subr.mxu0 %v15944_v14 }
0x2009   : > { %v12024_v26 = vsub.f32 %v18221_v45, %v12023_v13  ;;  %15526 = vmatpush3.msra.mxu0 %v18237_v32 }
0x200a   : > { %15541 = vmatprep.subr.mxu0 %v15944_v14 }
0x200b   : > { %v12025_v8 = vand.u32 4294901760, %v12024_v26 }
0x200d   : > { %15533 = vmatpush3.msra.mxu1 %v12025_v8  ;;  %v18406_v8 = vand.u32 4294901760, %v13672_v38 }
0x200e   : > { %15534 = vmatprep.subr.mxu1 %v15944_v14 }
0x200f   : > { %15535 = vmatpush3.msra.mxu1 %v12032_v18 }
0x2010   : > { %15536 = vmatprep.subr.mxu1 %v15944_v14 }
0x2011   : > { %15537 = vmatpush3.msra.mxu1 %v12039_v1  ;;  %v18422_v1 = vsub.f32 %v13672_v38, %v18406_v8 }
0x2012   : > { %15552 = vmatprep.subr.mxu1 %v15944_v14 }
0x2090   : > { %v11876_v20 = vpop.xlane.xlu0 %11875 }
0x2091   : > { %v11877_v21 = vmul.f32 0.03125, %v11876_v20  ;;  %v18352_v20 = vand.u32 4294901760, %v13676_v7 }
0x2093   : > { %v11878_v31 = vsub.f32 %v18195_v22, %v11877_v21  ;;  %v13675_v21 = vld [vmem:[%s18857_s7 + $0xd8] sm:$0xff]  ;;  %v18364_v29 = vsub.f32 %v13676_v7, %v18352_v20  ;;  %v13666_v7 = vld [vmem:[%s18857_s7 + $0x90] sm:$0xff] }
0x2095   : > { %v11879_v6 = vmul.f32 %v11878_v31, %v11878_v31  ;;  %v18962_v27 = vand.u32 4294901760, %v18364_v29 }
0x2097   : > { %v11880_v62 = vsel %vm1234_vm0, %v11879_v6, 0.0  ;;  %v12523_v6 = vsub.f32 %v18336_v37, %v12522_v11  ;;  %v12537_v34 = vsub.f32 %v18364_v29, %v18962_v27 }
0x2098   : > { %11881 = vadd.xlane.f32.xlu1 %v11880_v62  ;;  %v12529_v62 = vand.u32 4294901760, %v18350_v60 }
0x2099   : > { %v12538_v26 = vand.u32 4294901760, %v12537_v34 }
0x2121   : > { %v11882_v2 = vpop.xlane.xlu1 %11881 }
0x2122   : > { %v11883_v9 = vmul.f32 0.03125, %v11882_v2 }
0x2124   : > { %v11884_v5 = vadd.f32 1e-06, %v11883_v9 }
0x2126   : > { %15927 = vrsqrt.f32 %v11884_v5  ;;  %v13670_v5 = vld [vmem:[%s18857_s7 + $0xb0] sm:$0xff] }
0x2133   : > { %v15928_v10 = vpop.eup %15927 }
0x2134   : > { %v11886_v40 = vmul.f32 %v15928_v10, %v11878_v31  ;;  %v12517_v31 = vand.u32 4294901760, %v12516_v63  ;;  %v18958_v10 = vand.u32 4294901760, %v18422_v1  ;;  %v13665_v63 = vld [vmem:[%s18857_s7 + $0x88] sm:$0xff] }
0x2136   : > { %v11891_v3 = vmul.f32 %v11890_v15, %v11886_v40  ;;  %v13669_v40 = vld [vmem:[%s18857_s7 + $0xa8] sm:$0xff] }
0x2138   : > { %v11896_v46 = vadd.f32 %v11895_v39, %v11891_v3  ;;  %v18440_v39 = vand.u32 4294901760, %v13670_v5 }
0x213a   : > { %v11908_v19 = vsel %vm1297_vm3, %v11896_v46, 0  ;;  %v12565_v46 = vsub.f32 %v18422_v1, %v18958_v10 }
0x213b   : > { %v11979_v36 = vand.u32 4294901760, %v11908_v19 }
0x213d   : > { %v11980_v41 = vsub.f32 %v11908_v19, %v11979_v36  ;;  %15539 = vmatmul.mubr.f32.vlgmr.msra.gmra.mxu1 %v11979_v36 }
0x213e   : > { %15553 = vmatpush3.msra.mxu1 %v18204_v55  ;;  %15560 = vmatprep.mubr.msk.f32.mxu1 %vm15945_vm2, %v15944_v14 }
0x213f   : > { %15554 = vmatprep.subr.mxu1 %v15944_v14  ;;  %v11981_v50 = vand.u32 4294901760, %v11980_v41 }
0x2140   : > { %15555 = vmatpush3.msra.mxu1 %v18212_v51 }
0x2141   : > { %15556 = vmatprep.subr.mxu1 %v15944_v14  ;;  %v11982_v28 = vsub.f32 %v11980_v41, %v11981_v50 }
0x2142   : > { %15557 = vmatpush3.msra.mxu1 %v18223_v59 }
0x2143   : > { %15558 = vmatprep.subr.mxu1 %v15944_v14  ;;  %v11983_v48 = vand.u32 4294901760, %v11982_v28  ;;  %v12566_v28 = vand.u32 4294901760, %v12565_v46 }
0x2144   : > { %15559 = vmatpush3.msra.mxu1 %v18237_v32 }
0x2145   : > { %15561 = vmatmul.mubr.f32.vlgmr.msra.gmra.mxu1 %v11981_v50  ;;  %15574 = vmatprep.subr.mxu1 %v15944_v14  ;;  %v13668_v50 = vld [vmem:[%s18857_s7 + $0xa0] sm:$0xff] }
0x2146   : > { %15528 = vmatmul.mubr.f32.vlgmr.msra.gmra.mxu0 %v11983_v48  ;;  %15575 = vmatpush3.msra.mxu1 %v18204_v55  ;;  %v18367_v55 = vand.u32 4294901760, %v13675_v21  ;;  %v18468_v12 = vand.u32 4294901760, %v13668_v50 }
0x2147   : > { %15542 = vmatpush3.msra.mxu0 %v18210_v61  ;;  %15576 = vmatprep.subr.mxu1 %v15944_v14  ;;  %v12524_v61 = vand.u32 4294901760, %v12523_v6  ;;  %v18483_v6 = vand.u32 4294901760, %v13666_v7 }
0x2148   : > { %15543 = vmatprep.subr.mxu0 %v15944_v14  ;;  %15577 = vmatpush3.msra.mxu1 %v18212_v51  ;;  %v12530_v51 = vsub.f32 %v18350_v60, %v12529_v62 }
0x2149   : > { %15544 = vmatpush3.msra.mxu0 %v18221_v45  ;;  %15578 = vmatprep.subr.mxu1 %v15944_v14  ;;  %v18381_v45 = vsub.f32 %v13675_v21, %v18367_v55 }
0x214a   : > { %15545 = vmatprep.subr.mxu0 %v15944_v14  ;;  %15579 = vmatpush3.msra.mxu1 %v18223_v59  ;;  %v13673_v59 = vld [vmem:[%s18857_s7 + $0xc8] sm:$0xff]  ;;  %v12531_v0 = vand.u32 4294901760, %v12530_v51 }
0x214b   : > { %15546 = vmatpush3.msra.mxu0 %v18235_v17  ;;  %15580 = vmatprep.subr.mxu1 %v15944_v14  ;;  %v18393_v17 = vand.u32 4294901760, %v13673_v59 }
0x214c   : > { %15547 = vmatprep.subr.mxu0 %v15944_v14  ;;  %15549 = vmatprep.mubr.msk.f32.mxu0 %vm15945_vm2, %v15944_v14 }
0x214d   : > { %15548 = vmatpush3.msra.mxu0 %v18246_v35  ;;  %15581 = vmatpush3.msra.mxu1 %v18237_v32  ;;  %v18961_v32 = vand.u32 4294901760, %v18381_v45  ;;  %v18404_v35 = vsub.f32 %v13673_v59, %v18393_v17 }
0x214e   : > { %15582 = vmatprep.mubr.msk.f32.mxu1 %vm15945_vm2, %v15944_v14  ;;  %15550 = vmatmul.mubr.f32.vlgmr.msra.gmra.mxu0 %v11980_v41  ;;  %v18455_v41 = vsub.f32 %v13670_v5, %v18440_v39 }
0x214f   : > { %15563 = vmatprep.subr.mxu0 %v15944_v14  ;;  %15583 = vmatmul.mubr.f32.vlgmr.msra.gmra.mxu1 %v11979_v36  ;;  %v12544_v57 = vsub.f32 %v18381_v45, %v18961_v32  ;;  %v18959_v56 = vand.u32 4294901760, %v18404_v35 }
0x2150   : > { %15564 = vmatpush3.msra.mxu0 %v12016_v43  ;;  %15571 = vmatprep.mubr.msk.f32.mxu0 %vm15945_vm2, %v15944_v14  ;;  %v18377_v43 = vand.u32 4294901760, %v13674_v52  ;;  %v18956_v21 = vand.u32 4294901760, %v18455_v41 }
0x2151   : > { %15565 = vmatprep.subr.mxu0 %v15944_v14  ;;  %15620 = vmatprep.subr.mxu1 %v15944_v14  ;;  %v12545_v9 = vand.u32 4294901760, %v12544_v57  ;;  %v12558_v15 = vsub.f32 %v18404_v35, %v18959_v56  ;;  %v18506_v57 = vsub.f32 %v13666_v7, %v18483_v6 }
0x2152   : > { %15566 = vmatpush3.msra.mxu0 %v12023_v13  ;;  %15652 = vmatprep.mubr.msk.f32.mxu1 %vm15945_vm2, %v15944_v14  ;;  %v18391_v13 = vsub.f32 %v13674_v52, %v18377_v43  ;;  %v18486_v52 = vand.u32 4294901760, %v13665_v63  ;;  %v12579_v38 = vsub.f32 %v18455_v41, %v18956_v21 }
0x2153   : > { %15567 = vmatprep.subr.mxu0 %v15944_v14  ;;  %15621 = vmatpush3.msra.mxu1 %v12517_v31  ;;  %v12559_v3 = vand.u32 4294901760, %v12558_v15  ;;  %v18481_v31 = vand.u32 4294901760, %v13667_v49 }
0x2154   : > { %15568 = vmatpush3.msra.mxu0 %v12030_v16  ;;  %15622 = vmatprep.subr.mxu1 %v15944_v14  ;;  %v18960_v16 = vand.u32 4294901760, %v18391_v13 }
0x2155   : > { %15569 = vmatprep.subr.mxu0 %v15944_v14  ;;  %15623 = vmatpush3.msra.mxu1 %v12524_v61  ;;  %v13664_v61 = vld [vmem:[%s18857_s7 + $0x80] sm:$0xff] }
0x2156   : > { %15570 = vmatpush3.msra.mxu0 %v12037_v47  ;;  %15624 = vmatprep.subr.mxu1 %v15944_v14  ;;  %v13671_v47 = vld [vmem:[%s18857_s7 + $0xb8] sm:$0xff]  ;;  %v12551_v18 = vsub.f32 %v18391_v13, %v18960_v16  ;;  %v18497_v34 = vand.u32 4294901760, %v13664_v61 }
0x2157   : > { %15572 = vmatmul.mubr.f32.vlgmr.msra.gmra.mxu0 %v11979_v36  ;;  %15585 = vmatprep.subr.mxu0 %v15944_v14  ;;  %v18424_v2 = vand.u32 4294901760, %v13671_v47  ;;  %v18451_v36 = vand.u32 4294901760, %v13669_v40 }
0x2158   : > { %15617 = vmatprep.mubr.msk.f32.mxu0 %vm15945_vm2, %v15944_v14  ;;  %15586 = vmatpush3.msra.mxu0 %v18319_v58  ;;  %v12552_v42 = vand.u32 4294901760, %v12551_v18  ;;  %v18518_v5 = vsub.f32 %v13664_v61, %v18497_v34 }
0x2159   : > { %15587 = vmatprep.subr.mxu0 %v15944_v14  ;;  %15625 = vmatpush3.msra.mxu1 %v12531_v0  ;;  %v18437_v4 = vsub.f32 %v13671_v47, %v18424_v2  ;;  %v18466_v24 = vsub.f32 %v13669_v40, %v18451_v36  ;;  %v18494_v0 = vsub.f32 %v13668_v50, %v18468_v12  ;;  %v18952_v40 = vand.u32 4294901760, %v18506_v57 }
0x215a   : > { %15588 = vmatpush3.msra.mxu0 %v18327_v33  ;;  %15626 = vmatprep.subr.mxu1 %v15944_v14  ;;  %v18509_v47 = vsub.f32 %v13665_v63, %v18486_v52 }
0x215b   : > { %15589 = vmatprep.subr.mxu0 %v15944_v14  ;;  %15627 = vmatpush3.msra.mxu1 %v12538_v26  ;;  %v18957_v19 = vand.u32 4294901760, %v18437_v4  ;;  %v18955_v59 = vand.u32 4294901760, %v18466_v24  ;;  %v18503_v26 = vsub.f32 %v13667_v49, %v18481_v31  ;;  %v18950_v49 = vand.u32 4294901760, %v18518_v5 }
0x215c   : > { %15590 = vmatpush3.msra.mxu0 %v18338_v23  ;;  %15628 = vmatprep.subr.mxu1 %v15944_v14 }
0x215d   : > { %15591 = vmatprep.subr.mxu0 %v15944_v14  ;;  %15629 = vmatpush3.msra.mxu1 %v12545_v9  ;;  %v12572_v48 = vsub.f32 %v18437_v4, %v18957_v19  ;;  %v12586_v18 = vsub.f32 %v18466_v24, %v18955_v59  ;;  %v18954_v9 = vand.u32 4294901760, %v18494_v0  ;;  %v18953_v15 = vand.u32 4294901760, %v18503_v26 }
0x215e   : > { %15592 = vmatpush3.msra.mxu0 %v18352_v20  ;;  %15630 = vmatprep.subr.mxu1 %v15944_v14 }
0x215f   : > { %15593 = vmatprep.subr.mxu0 %v15944_v14  ;;  %15631 = vmatpush3.msra.mxu1 %v12552_v42  ;;  %v12573_v51 = vand.u32 4294901760, %v12572_v48  ;;  %v12580_v42 = vand.u32 4294901760, %v12579_v38  ;;  %v12587_v46 = vand.u32 4294901760, %v12586_v18  ;;  %v12593_v50 = vsub.f32 %v18494_v0, %v18954_v9 }
0x2160   : > { %15594 = vmatpush3.msra.mxu0 %v18367_v55  ;;  %15632 = vmatprep.subr.mxu1 %v15944_v14  ;;  %v12607_v48 = vsub.f32 %v18506_v57, %v18952_v40  ;;  %v12621_v38 = vsub.f32 %v18518_v5, %v18950_v49 }
0x2161   : > { %15595 = vmatprep.subr.mxu0 %v15944_v14  ;;  %15633 = vmatpush3.msra.mxu1 %v12559_v3  ;;  %v18951_v3 = vand.u32 4294901760, %v18509_v47  ;;  %v12594_v7 = vand.u32 4294901760, %v12593_v50 }
0x2162   : > { %15596 = vmatpush3.msra.mxu0 %v18377_v43  ;;  %15634 = vmatprep.subr.mxu1 %v15944_v14 }
0x2163   : > { %15597 = vmatprep.subr.mxu0 %v15944_v14  ;;  %15635 = vmatpush3.msra.mxu1 %v12566_v28  ;;  %v12600_v28 = vsub.f32 %v18503_v26, %v18953_v15  ;;  %v12614_v61 = vsub.f32 %v18509_v47, %v18951_v3 }
0x2164   : > { %15598 = vmatpush3.msra.mxu0 %v18393_v17  ;;  %15636 = vmatprep.subr.mxu1 %v15944_v14 }
0x2165   : > { %15599 = vmatprep.subr.mxu0 %v15944_v14  ;;  %15637 = vmatpush3.msra.mxu1 %v12573_v51  ;;  %v12601_v63 = vand.u32 4294901760, %v12600_v28  ;;  %v12608_v51 = vand.u32 4294901760, %v12607_v48  ;;  %v12615_v18 = vand.u32 4294901760, %v12614_v61  ;;  %v13663_v61 = vld [vmem:[%s18856_s6 + $0x48] ss:$0 sm:$0xff] }
0x2166   : > { %15600 = vmatpush3.msra.mxu0 %v18406_v8  ;;  %15638 = vmatprep.subr.mxu1 %v15944_v14 }
0x2167   : > { %15601 = vmatprep.subr.mxu0 %v15944_v14  ;;  %15639 = vmatpush3.msra.mxu1 %v12580_v42  ;;  %v12622_v42 = vand.u32 4294901760, %v12621_v38 }
0x2168   : > { %15602 = vmatpush3.msra.mxu0 %v18424_v2  ;;  %15640 = vmatprep.subr.mxu1 %v15944_v14 }
0x2169   : > { %15603 = vmatprep.subr.mxu0 %v15944_v14  ;;  %15641 = vmatpush3.msra.mxu1 %v12587_v46 }
0x216a   : > { %15604 = vmatpush3.msra.mxu0 %v18440_v39  ;;  %15642 = vmatprep.subr.mxu1 %v15944_v14 }
0x216b   : > { %15605 = vmatprep.subr.mxu0 %v15944_v14  ;;  %15643 = vmatpush3.msra.mxu1 %v12594_v7 }
0x216c   : > { %15606 = vmatpush3.msra.mxu0 %v18451_v36  ;;  %15644 = vmatprep.subr.mxu1 %v15944_v14 }
0x216d   : > { %15607 = vmatprep.subr.mxu0 %v15944_v14  ;;  %15645 = vmatpush3.msra.mxu1 %v12601_v63 }
0x216e   : > { %15608 = vmatpush3.msra.mxu0 %v18468_v12  ;;  %15646 = vmatprep.subr.mxu1 %v15944_v14 }
0x216f   : > { %15609 = vmatprep.subr.mxu0 %v15944_v14  ;;  %15647 = vmatpush3.msra.mxu1 %v12608_v51 }
0x2170   : > { %15610 = vmatpush3.msra.mxu0 %v18481_v31  ;;  %15648 = vmatprep.subr.mxu1 %v15944_v14 }
0x2171   : > { %15611 = vmatprep.subr.mxu0 %v15944_v14  ;;  %15649 = vmatpush3.msra.mxu1 %v12615_v18 }
0x2172   : > { %15612 = vmatpush3.msra.mxu0 %v18483_v6  ;;  %15650 = vmatprep.subr.mxu1 %v15944_v14 }
0x2173   : > { %15613 = vmatprep.subr.mxu0 %v15944_v14  ;;  %15651 = vmatpush3.msra.mxu1 %v12622_v42 }
0x2174   : > { %15614 = vmatpush3.msra.mxu0 %v18486_v52  ;;  %15690 = vmatprep.subr.mxu1 %v15944_v14 }
0x2175   : > { %15615 = vmatprep.subr.mxu0 %v15944_v14 }
0x2176   : > { %15616 = vmatpush3.msra.mxu0 %v18497_v34 }
0x2177   : > { %15655 = vmatprep.subr.mxu0 %v15944_v14 }
0x21fd   : > { %v12076_v46 = vpop.f32.mrf.mxu1 }
0x21ff   : > { %v15540_v50 = vpop.f32.mrf.mxu1 }
0x2205   : > { %v12233_v28 = vpop.f32.mrf.mxu1 }
0x2206   : > { %v11985_v48 = vpop.f32.mrf.mxu0 }
0x2207   : > { %v15562_v7 = vpop.f32.mrf.mxu1  ;;  %v11986_v51 = vadd.f32 %v13663_v61, %v11985_v48 }
0x2208   : > { %v15529_v63 = vpop.f32.mrf.mxu0 }
0x2209   : > { %v12077_v3 = vadd.f32 %v12076_v46, %v11986_v51  ;;  %v13087_v51 = vld [vmem:[%s18858_s8] sm:$0xff] }
0x220e   : > { %v12156_v38 = vpop.f32.mrf.mxu0 }
0x220f   : > { %v12391_v49 = vpop.f32.mrf.mxu1  ;;  %v12157_v15 = vadd.f32 %v12156_v38, %v12077_v3  ;;  %v13088_v3 = vld [vmem:[%s18858_s8 + $0x8] sm:$0xff] }
0x2210   : > { %v15551_v18 = vpop.f32.mrf.mxu0 }
0x2211   : > { %v15584_v40 = vpop.f32.mrf.mxu1  ;;  %v12234_v42 = vadd.f32 %v12233_v28, %v12157_v15  ;;  %v18752_v28 = vand.u32 4294901760, %v13088_v3 }
0x2217   : > { %v12316_v9 = vpop.f32.mrf.mxu0 }
0x2218   : > { %v12317_v59 = vadd.f32 %v12316_v9, %v12234_v42  ;;  %v18764_v42 = vsub.f32 %v13088_v3, %v18752_v28 }
0x2219   : > { %v15573_v21 = vpop.f32.mrf.mxu0 }
0x221a   : > { %v12392_v50 = vadd.f32 %v12391_v49, %v12317_v59 }
0x221c   : > { %v12396_v19 = vmul.f32 0.044715, %v12392_v50  ;;  %v12395_v32 = vmul.f32 0.5, %v12392_v50 }
0x221e   : > { %v12397_v10 = vmul.f32 %v12396_v19, %v12392_v50 }
0x2220   : > { %v12398_v7 = vmul.f32 %v12397_v10, %v12392_v50 }
0x2222   : > { %v12399_v63 = vadd.f32 %v12398_v7, %v12392_v50  ;;  %v18766_v50 = vand.u32 4294901760, %v13087_v51 }
0x2224   : > { %v12400_v56 = vmul.f32 0.7978846, %v12399_v63 }
0x2226   : > { %15929 = vtanh.f32 %v12400_v56 }
0x2233   : > { %v15930_v16 = vpop.eup %15929 }
0x2234   : > { %v12402_v48 = vadd.f32 1.0, %v15930_v16 }
0x2236   : > { %v12403_v61 = vmul.f32 %v12402_v48, %v12395_v32  ;;  %v13215_v48 = vand.u32 4294901760, %v18764_v42 }
0x2238   : > { %v18559_v27 = vand.u32 4294901760, %v12403_v61 }
0x223a   : > { %v18562_v40 = vsub.f32 %v12403_v61, %v18559_v27  ;;  %15653 = vmatmul.mubr.f32.vlgmr.msra.gmra.mxu1 %v18559_v27  ;;  %v18775_v61 = vsub.f32 %v13087_v51, %v18766_v50 }
0x223b   : > { %15691 = vmatpush3.msra.mxu1 %v18319_v58  ;;  %15722 = vmatprep.mubr.msk.f32.mxu1 %vm15945_vm2, %v15944_v14 }
0x223c   : > { %15692 = vmatprep.subr.mxu1 %v15944_v14  ;;  %v12504_v56 = vand.u32 4294901760, %v18562_v40 }
0x223d   : > { %15693 = vmatpush3.msra.mxu1 %v18327_v33 }
0x223e   : > { %15694 = vmatprep.subr.mxu1 %v15944_v14  ;;  %v12505_v32 = vsub.f32 %v18562_v40, %v12504_v56 }
0x223f   : > { %15695 = vmatpush3.msra.mxu1 %v18338_v23 }
0x2240   : > { %15696 = vmatprep.subr.mxu1 %v15944_v14  ;;  %v12506_v16 = vand.u32 4294901760, %v12505_v32  ;;  %v13222_v32 = vand.u32 4294901760, %v18775_v61 }
0x2241   : > { %15697 = vmatpush3.msra.mxu1 %v18352_v20 }
0x2242   : > { %15698 = vmatprep.subr.mxu1 %v15944_v14  ;;  %15618 = vmatmul.mubr.f32.vlgmr.msra.gmra.mxu0 %v12506_v16 }
0x2243   : > { %15656 = vmatpush3.msra.mxu0 %v18325_v44  ;;  %15699 = vmatpush3.msra.mxu1 %v18367_v55  ;;  %v19078_v44 = vand.u32 4294901760, %v18381_v45 }
0x2244   : > { %15657 = vmatprep.subr.mxu0 %v15944_v14  ;;  %15700 = vmatprep.subr.mxu1 %v15944_v14 }
0x2245   : > { %15658 = vmatpush3.msra.mxu0 %v18336_v37  ;;  %15701 = vmatpush3.msra.mxu1 %v18377_v43  ;;  %v19081_v37 = vand.u32 4294901760, %v18422_v1 }
0x2246   : > { %15659 = vmatprep.subr.mxu0 %v15944_v14  ;;  %15702 = vmatprep.subr.mxu1 %v15944_v14 }
0x2247   : > { %15660 = vmatpush3.msra.mxu0 %v18350_v60  ;;  %15703 = vmatpush3.msra.mxu1 %v18393_v17  ;;  %v19084_v60 = vand.u32 4294901760, %v18466_v24 }
0x2248   : > { %15661 = vmatprep.subr.mxu0 %v15944_v14  ;;  %15704 = vmatprep.subr.mxu1 %v15944_v14 }
0x2249   : > { %15662 = vmatpush3.msra.mxu0 %v18364_v29  ;;  %15705 = vmatpush3.msra.mxu1 %v18406_v8 }
0x224a   : > { %15663 = vmatprep.subr.mxu0 %v15944_v14  ;;  %15706 = vmatprep.subr.mxu1 %v15944_v14 }
0x224b   : > { %15664 = vmatpush3.msra.mxu0 %v18381_v45  ;;  %15707 = vmatpush3.msra.mxu1 %v18424_v2 }
0x224c   : > { %15665 = vmatprep.subr.mxu0 %v15944_v14  ;;  %15708 = vmatprep.subr.mxu1 %v15944_v14 }
0x224d   : > { %15666 = vmatpush3.msra.mxu0 %v18391_v13  ;;  %15709 = vmatpush3.msra.mxu1 %v18440_v39 }
0x224e   : > { %15667 = vmatprep.subr.mxu0 %v15944_v14  ;;  %15710 = vmatprep.subr.mxu1 %v15944_v14 }
0x224f   : > { %15668 = vmatpush3.msra.mxu0 %v18404_v35  ;;  %15711 = vmatpush3.msra.mxu1 %v18451_v36 }
0x2250   : > { %15669 = vmatprep.subr.mxu0 %v15944_v14  ;;  %15712 = vmatprep.subr.mxu1 %v15944_v14 }
0x2251   : > { %15670 = vmatpush3.msra.mxu0 %v18422_v1  ;;  %15713 = vmatpush3.msra.mxu1 %v18468_v12 }
0x2252   : > { %15671 = vmatprep.subr.mxu0 %v15944_v14  ;;  %15714 = vmatprep.subr.mxu1 %v15944_v14 }
0x2253   : > { %15672 = vmatpush3.msra.mxu0 %v18437_v4  ;;  %15715 = vmatpush3.msra.mxu1 %v18481_v31 }
0x2254   : > { %15673 = vmatprep.subr.mxu0 %v15944_v14  ;;  %15716 = vmatprep.subr.mxu1 %v15944_v14 }
0x2255   : > { %15674 = vmatpush3.msra.mxu0 %v18455_v41  ;;  %15717 = vmatpush3.msra.mxu1 %v18483_v6 }
0x2256   : > { %15675 = vmatprep.subr.mxu0 %v15944_v14  ;;  %15718 = vmatprep.subr.mxu1 %v15944_v14 }
0x2257   : > { %15676 = vmatpush3.msra.mxu0 %v18466_v24  ;;  %15719 = vmatpush3.msra.mxu1 %v18486_v52 }
0x2258   : > { %15677 = vmatprep.subr.mxu0 %v15944_v14  ;;  %15720 = vmatprep.subr.mxu1 %v15944_v14 }
0x2259   : > { %15678 = vmatpush3.msra.mxu0 %v18494_v0  ;;  %15721 = vmatpush3.msra.mxu1 %v18497_v34 }
0x225a   : > { %15679 = vmatprep.subr.mxu0 %v15944_v14  ;;  %15723 = vmatmul.mubr.f32.vlgmr.msra.gmra.mxu1 %v12504_v56  ;;  %v13216_v56 = vsub.f32 %v18764_v42, %v13215_v48 }
0x225b   : > { %15760 = vmatprep.subr.mxu1 %v15944_v14  ;;  %15680 = vmatpush3.msra.mxu0 %v18503_v26 }
0x225c   : > { %15761 = vmatpush3.msra.mxu1 %v18319_v58  ;;  %15681 = vmatprep.subr.mxu0 %v15944_v14  ;;  %v19077_v58 = vand.u32 4294901760, %v18364_v29  ;;  %v19087_v29 = vand.u32 4294901760, %v18506_v57  ;;  %v13217_v16 = vand.u32 4294901760, %v13216_v56 }
0x225d   : > { %15762 = vmatprep.subr.mxu1 %v15944_v14  ;;  %15682 = vmatpush3.msra.mxu0 %v18506_v57 }
0x225e   : > { %15763 = vmatpush3.msra.mxu1 %v18327_v33  ;;  %15683 = vmatprep.subr.mxu0 %v15944_v14  ;;  %v19079_v33 = vand.u32 4294901760, %v18391_v13 }
0x225f   : > { %15764 = vmatprep.subr.mxu1 %v15944_v14  ;;  %15684 = vmatpush3.msra.mxu0 %v18509_v47 }
0x2260   : > { %15765 = vmatpush3.msra.mxu1 %v18338_v23  ;;  %15685 = vmatprep.subr.mxu0 %v15944_v14  ;;  %v19082_v23 = vand.u32 4294901760, %v18437_v4 }
0x2261   : > { %15766 = vmatprep.subr.mxu1 %v15944_v14  ;;  %15686 = vmatpush3.msra.mxu0 %v18518_v5 }
0x2262   : > { %15687 = vmatprep.mubr.msk.f32.mxu0 %vm15945_vm2, %v15944_v14  ;;  %15767 = vmatpush3.msra.mxu1 %v18352_v20  ;;  %v19085_v20 = vand.u32 4294901760, %v18494_v0 }
0x2263   : > { %15688 = vmatmul.mubr.f32.vlgmr.msra.gmra.mxu0 %v18562_v40  ;;  %15725 = vmatprep.subr.mxu0 %v15944_v14 }
0x2264   : > { %15768 = vmatprep.subr.mxu1 %v15944_v14  ;;  %15726 = vmatpush3.msra.mxu0 %v12515_v30  ;;  %v19080_v30 = vand.u32 4294901760, %v18404_v35 }
0x2265   : > { %15769 = vmatpush3.msra.mxu1 %v18367_v55  ;;  %15727 = vmatprep.subr.mxu0 %v15944_v14  ;;  %v19088_v55 = vand.u32 4294901760, %v18509_v47 }
0x2266   : > { %15770 = vmatprep.subr.mxu1 %v15944_v14  ;;  %15728 = vmatpush3.msra.mxu0 %v12522_v11  ;;  %v19083_v11 = vand.u32 4294901760, %v18455_v41 }
0x2267   : > { %15771 = vmatpush3.msra.mxu1 %v18377_v43  ;;  %15729 = vmatprep.subr.mxu0 %v15944_v14  ;;  %v19089_v43 = vand.u32 4294901760, %v18518_v5  ;;  %v13090_v5 = vld [vmem:[%s18858_s8 + $0x18] sm:$0xff] }
0x2268   : > { %15772 = vmatprep.subr.mxu1 %v15944_v14  ;;  %15730 = vmatpush3.msra.mxu0 %v12529_v62  ;;  %v19086_v62 = vand.u32 4294901760, %v18503_v26  ;;  %v18733_v15 = vand.u32 4294901760, %v13090_v5 }
0x2269   : > { %15773 = vmatpush3.msra.mxu1 %v18393_v17  ;;  %15731 = vmatprep.subr.mxu0 %v15944_v14 }
0x226a   : > { %15774 = vmatprep.subr.mxu1 %v15944_v14  ;;  %15732 = vmatpush3.msra.mxu0 %v19077_v58  ;;  %v13223_v58 = vsub.f32 %v18775_v61, %v13222_v32 }
0x226b   : > { %15775 = vmatpush3.msra.mxu1 %v18406_v8  ;;  %15733 = vmatprep.subr.mxu0 %v15944_v14 }
0x226c   : > { %15776 = vmatprep.subr.mxu1 %v15944_v14  ;;  %15734 = vmatpush3.msra.mxu0 %v19078_v44  ;;  %v13224_v44 = vand.u32 4294901760, %v13223_v58 }
0x226d   : > { %15777 = vmatpush3.msra.mxu1 %v18424_v2  ;;  %15735 = vmatprep.subr.mxu0 %v15944_v14 }
0x226e   : > { %15778 = vmatprep.subr.mxu1 %v15944_v14  ;;  %15736 = vmatpush3.msra.mxu0 %v19079_v33 }
0x226f   : > { %15779 = vmatpush3.msra.mxu1 %v18440_v39  ;;  %15737 = vmatprep.subr.mxu0 %v15944_v14 }
0x2270   : > { %15780 = vmatprep.subr.mxu1 %v15944_v14  ;;  %15738 = vmatpush3.msra.mxu0 %v19080_v30 }
0x2271   : > { %15781 = vmatpush3.msra.mxu1 %v18451_v36  ;;  %15739 = vmatprep.subr.mxu0 %v15944_v14 }
0x2272   : > { %15782 = vmatprep.subr.mxu1 %v15944_v14  ;;  %15740 = vmatpush3.msra.mxu0 %v19081_v37 }
0x2273   : > { %15783 = vmatpush3.msra.mxu1 %v18468_v12  ;;  %15741 = vmatprep.subr.mxu0 %v15944_v14 }
0x2274   : > { %15784 = vmatprep.subr.mxu1 %v15944_v14  ;;  %15742 = vmatpush3.msra.mxu0 %v19082_v23  ;;  %v15935_v23 = vld [vmem:[%s18853_s3 + $0x8] sm:$0xff] }
0x2275   : > { %15785 = vmatpush3.msra.mxu1 %v18481_v31  ;;  %15743 = vmatprep.subr.mxu0 %v15944_v14  ;;  %v19090_v31 = vsub.s32 6, %v16732_v53  ;;  %v13089_v53 = vld [vmem:[%s18858_s8 + $0x10] sm:$0xff] }
0x2276   : > { %15786 = vmatprep.subr.mxu1 %v15944_v14  ;;  %15744 = vmatpush3.msra.mxu0 %v19083_v11  ;;  %v13083_v11 = vrot.slane %v15935_v23, 7 }
0x2277   : > { %15787 = vmatpush3.msra.mxu1 %v18483_v6  ;;  %15745 = vmatprep.subr.mxu0 %v15944_v14  ;;  %v13066_v6 = vrot.slane %v18189_v25, %v19090_v31  ;;  %v18739_v25 = vsub.f32 %v13090_v5, %v18733_v15 }
0x2278   : > { %15788 = vmatprep.subr.mxu1 %v15944_v14  ;;  %15746 = vmatpush3.msra.mxu0 %v19084_v60 }
0x2279   : > { %15789 = vmatpush3.msra.mxu1 %v18486_v52  ;;  %15747 = vmatprep.subr.mxu0 %v15944_v14  ;;  %v13201_v49 = vand.u32 4294901760, %v18739_v25 }
0x227a   : > { %15790 = vmatprep.subr.mxu1 %v15944_v14  ;;  %15748 = vmatpush3.msra.mxu0 %v19085_v20 }
0x227b   : > { %15791 = vmatpush3.msra.mxu1 %v18497_v34  ;;  %15792 = vmatprep.mubr.msk.f32.mxu1 %vm15945_vm2, %v15944_v14  ;;  %v13202_v38 = vsub.f32 %v18739_v25, %v13201_v49 }
0x227c   : > { %15749 = vmatprep.subr.mxu0 %v15944_v14  ;;  %15793 = vmatmul.mubr.f32.vlgmr.msra.gmra.mxu1 %v18559_v27 }
0x227d   : > { %15750 = vmatpush3.msra.mxu0 %v19086_v62  ;;  %15757 = vmatprep.mubr.msk.f32.mxu0 %vm15945_vm2, %v15944_v14  ;;  %v13203_v7 = vand.u32 4294901760, %v13202_v38  ;;  %v333_v62 = vld [vmem:[%s18853_s3 + $0x10] sm:$0x1] }
0x227e   : > { %15751 = vmatprep.subr.mxu0 %v15944_v14  ;;  %15806 = vmatprep.subr.mxu1 %v15944_v14 }
0x227f   : > { %15752 = vmatpush3.msra.mxu0 %v19087_v29  ;;  %15814 = vmatprep.mubr.msk.f32.mxu1 %vm15945_vm2, %v15944_v14 }
0x2280   : > { %15753 = vmatprep.subr.mxu0 %v15944_v14  ;;  %15807 = vmatpush3.msra.mxu1 %v13203_v7 }
0x2281   : > { %15754 = vmatpush3.msra.mxu0 %v19088_v55  ;;  %15808 = vmatprep.subr.mxu1 %v15944_v14 }
0x2282   : > { %15755 = vmatprep.subr.mxu0 %v15944_v14 }
0x2283   : > { %15756 = vmatpush3.msra.mxu0 %v19089_v43 }
0x2284   : > { %15758 = vmatmul.mubr.f32.vlgmr.msra.gmra.mxu0 %v18559_v27  ;;  %15795 = vmatprep.subr.mxu0 %v15944_v14 }
0x2285   : > { %15803 = vmatprep.mubr.msk.f32.mxu0 %vm15945_vm2, %v15944_v14  ;;  %15796 = vmatpush3.msra.mxu0 %v18733_v15 }
0x2286   : > { %15797 = vmatprep.subr.mxu0 %v15944_v14 }
0x22fa   : > { %v12659_v45 = vpop.f32.mrf.mxu1 }
0x22fc   : > { %v15654_v13 = vpop.f32.mrf.mxu1 }
0x2302   : > { %v12508_v17 = vpop.f32.mrf.mxu0 }
0x2303   : > { %v12660_v39 = vadd.f32 %v12659_v45, %v12508_v17 }
0x2304   : > { %v15619_v35 = vpop.f32.mrf.mxu0 }
0x231a   : > { %v12852_v8 = vpop.f32.mrf.mxu1 }
0x231c   : > { %v15724_v1 = vpop.f32.mrf.mxu1 }
0x2323   : > { %v12763_v2 = vpop.f32.mrf.mxu0 }
0x2324   : > { %v12764_v36 = vadd.f32 %v12763_v2, %v12660_v39 }
0x2325   : > { %v15689_v10 = vpop.f32.mrf.mxu0 }
0x2326   : > { %v12853_v41 = vadd.f32 %v12852_v8, %v12764_v36  ;;  %v13091_v36 = vld [vmem:[%s18858_s8 + $0x20] sm:$0x1] }
0x233c   : > { %v13058_v4 = vpop.f32.mrf.mxu1 }
0x233e   : > { %v15794_v19 = vpop.f32.mrf.mxu1 }
0x2344   : > { %v12971_v24 = vpop.f32.mrf.mxu0 }
0x2345   : > { %v12972_v27 = vadd.f32 %v12971_v24, %v12853_v41 }
0x2346   : > { %v15759_v12 = vpop.f32.mrf.mxu0 }
0x2347   : > { %v13059_v21 = vadd.f32 %v13058_v4, %v12972_v27 }
0x2349   : > { %v13062_v52 = vadd.f32 %v13059_v21, %v18195_v22  ;;  %v18741_v22 = vand.u32 4294901760, %v13089_v53 }
0x234b   : > { %v13067_v59 = vadd.f32 %v13066_v6, %v13062_v52  ;;  %v18750_v46 = vsub.f32 %v13089_v53, %v18741_v22  ;;  %15798 = vmatpush3.msra.mxu0 %v18741_v22 }
0x234c   : > { %15799 = vmatprep.subr.mxu0 %v15944_v14 }
0x234d   : > { %v13069_v0 = vsel %vm13068_vm10, %v13067_v59, 0.0  ;;  %v13208_v18 = vand.u32 4294901760, %v18750_v46  ;;  %15800 = vmatpush3.msra.mxu0 %v18752_v28 }
0x234e   : > { %13070 = vadd.xlane.f32.xlu0 %v13069_v0  ;;  %15801 = vmatprep.subr.mxu0 %v15944_v14 }
0x234f   : > { %v13209_v63 = vsub.f32 %v18750_v46, %v13208_v18  ;;  %15802 = vmatpush3.msra.mxu0 %v18766_v50 }
0x2350   : > { %15817 = vmatprep.subr.mxu0 %v15944_v14 }
0x2351   : > { %v13210_v40 = vand.u32 4294901760, %v13209_v63 }
0x2353   : > { %15809 = vmatpush3.msra.mxu1 %v13210_v40 }
0x2354   : > { %15810 = vmatprep.subr.mxu1 %v15944_v14 }
0x2355   : > { %15811 = vmatpush3.msra.mxu1 %v13217_v16 }
0x2356   : > { %15812 = vmatprep.subr.mxu1 %v15944_v14 }
0x2357   : > { %15813 = vmatpush3.msra.mxu1 %v13224_v44 }
0x2358   : > { %15828 = vmatprep.subr.mxu1 %v15944_v14 }
0x23d7   : > { %v13071_v34 = vpop.xlane.xlu0 %13070 }
0x23d8   : > { %v13072_v26 = vmul.f32 0.03125, %v13071_v34 }
0x23da   : > { %v13073_v57 = vsub.f32 %v13067_v59, %v13072_v26 }
0x23dc   : > { %v13074_v47 = vmul.f32 %v13073_v57, %v13073_v57 }
0x23de   : > { %v13075_v9 = vsel %vm13068_vm10, %v13074_v47, 0.0 }
0x23df   : > { %13076 = vadd.xlane.f32.xlu0 %v13075_v9 }
0x2468   : > { %v13077_v33 = vpop.xlane.xlu0 %13076 }
0x2469   : > { %v13078_v30 = vmul.f32 0.03125, %v13077_v33 }
0x246b   : > { %v13079_v37 = vadd.f32 1e-06, %v13078_v30 }
0x246d   : > { %15931 = vrsqrt.f32 %v13079_v37 }
0x247a   : > { %v15932_v60 = vpop.eup %15931 }
0x247b   : > { %v13081_v20 = vmul.f32 %v15932_v60, %v13073_v57 }
0x247d   : > { %v13085_v29 = vmul.f32 %v13083_v11, %v13081_v20 }
0x247f   : > { %v13086_v55 = vadd.f32 %v13085_v29, %v333_v62 }
0x2481   : > { %v13093_v43 = vsel %vm1297_vm3, %v13086_v55, 0 }
0x2482   : > { %v13164_v45 = vand.u32 4294901760, %v13093_v43 }
0x2484   : > { %v13165_v13 = vsub.f32 %v13093_v43, %v13164_v45  ;;  %15815 = vmatmul.mubr.f32.vlgmr.msra.gmra.mxu1 %v13164_v45 }
0x2485   : > { %15829 = vmatpush3.msra.mxu1 %v18733_v15  ;;  %15836 = vmatprep.mubr.msk.f32.mxu1 %vm15945_vm2, %v15944_v14 }
0x2486   : > { %15830 = vmatprep.subr.mxu1 %v15944_v14  ;;  %v13166_v17 = vand.u32 4294901760, %v13165_v13 }
0x2487   : > { %15831 = vmatpush3.msra.mxu1 %v18741_v22 }
0x2488   : > { %15832 = vmatprep.subr.mxu1 %v15944_v14  ;;  %v13167_v35 = vsub.f32 %v13165_v13, %v13166_v17 }
0x2489   : > { %15833 = vmatpush3.msra.mxu1 %v18752_v28 }
0x248a   : > { %15834 = vmatprep.subr.mxu1 %v15944_v14  ;;  %v13168_v8 = vand.u32 4294901760, %v13167_v35 }
0x248b   : > { %15835 = vmatpush3.msra.mxu1 %v18766_v50 }
0x248c   : > { %15837 = vmatmul.mubr.f32.vlgmr.msra.gmra.mxu1 %v13166_v17  ;;  %15850 = vmatprep.subr.mxu1 %v15944_v14 }
0x248d   : > { %15804 = vmatmul.mubr.f32.vlgmr.msra.gmra.mxu0 %v13168_v8  ;;  %15851 = vmatpush3.msra.mxu1 %v18733_v15 }
0x248e   : > { %15818 = vmatpush3.msra.mxu0 %v18739_v25  ;;  %15852 = vmatprep.subr.mxu1 %v15944_v14 }
0x248f   : > { %15819 = vmatprep.subr.mxu0 %v15944_v14  ;;  %15853 = vmatpush3.msra.mxu1 %v18741_v22 }
0x2490   : > { %15820 = vmatpush3.msra.mxu0 %v18750_v46  ;;  %15854 = vmatprep.subr.mxu1 %v15944_v14 }
0x2491   : > { %15821 = vmatprep.subr.mxu0 %v15944_v14  ;;  %15855 = vmatpush3.msra.mxu1 %v18752_v28 }
0x2492   : > { %15822 = vmatpush3.msra.mxu0 %v18764_v42  ;;  %15856 = vmatprep.subr.mxu1 %v15944_v14 }
0x2493   : > { %15823 = vmatprep.subr.mxu0 %v15944_v14  ;;  %15825 = vmatprep.mubr.msk.f32.mxu0 %vm15945_vm2, %v15944_v14 }
0x2494   : > { %15824 = vmatpush3.msra.mxu0 %v18775_v61  ;;  %15857 = vmatpush3.msra.mxu1 %v18766_v50 }
0x2495   : > { %15858 = vmatprep.mubr.msk.f32.mxu1 %vm15945_vm2, %v15944_v14  ;;  %15826 = vmatmul.mubr.f32.vlgmr.msra.gmra.mxu0 %v13165_v13 }
0x2496   : > { %15839 = vmatprep.subr.mxu0 %v15944_v14  ;;  %15859 = vmatmul.mubr.f32.vlgmr.msra.gmra.mxu1 %v13164_v45 }
0x2497   : > { %15840 = vmatpush3.msra.mxu0 %v13201_v49  ;;  %15847 = vmatprep.mubr.msk.f32.mxu0 %vm15945_vm2, %v15944_v14 }
0x2498   : > { %15841 = vmatprep.subr.mxu0 %v15944_v14 }
0x2499   : > { %15842 = vmatpush3.msra.mxu0 %v13208_v18 }
0x249a   : > { %15843 = vmatprep.subr.mxu0 %v15944_v14 }
0x249b   : > { %15844 = vmatpush3.msra.mxu0 %v13215_v48 }
0x249c   : > { %15845 = vmatprep.subr.mxu0 %v15944_v14 }
0x249d   : > { %15846 = vmatpush3.msra.mxu0 %v13222_v32 }
0x249e   : > { %15848 = vmatmul.mubr.f32.vlgmr.msra.gmra.mxu0 %v13164_v45 }
0x2544   : > { %v13261_v1 = vpop.f32.mrf.mxu1 }
0x2546   : > { %v15816_v2 = vpop.f32.mrf.mxu1 }
0x254c   : > { %v13418_v10 = vpop.f32.mrf.mxu1 }
0x254d   : > { %v13170_v4 = vpop.f32.mrf.mxu0 }
0x254e   : > { %v15838_v39 = vpop.f32.mrf.mxu1  ;;  %v13171_v41 = vadd.f32 %v13170_v4, %v13091_v36 }
0x254f   : > { %v15805_v19 = vpop.f32.mrf.mxu0 }
0x2550   : > { %v13262_v12 = vadd.f32 %v13261_v1, %v13171_v41 }
0x2555   : > { %v13341_v24 = vpop.f32.mrf.mxu0 }
0x2556   : > { %v13576_v27 = vpop.f32.mrf.mxu1  ;;  %v13342_v31 = vadd.f32 %v13341_v24, %v13262_v12 }
0x2557   : > { %v15827_v14 = vpop.f32.mrf.mxu0 }
0x2558   : > { %v15860_v21 = vpop.f32.mrf.mxu1  ;;  %v13419_v6 = vadd.f32 %v13418_v10, %v13342_v31 }
0x255e   : > { %v13501_v52 = vpop.f32.mrf.mxu0 }
0x255f   : > { %v13502_v59 = vadd.f32 %v13501_v52, %v13419_v6 }
0x2560   : > { %v15849_v0 = vpop.f32.mrf.mxu0 }
0x2561   : > { %v13577_v34 = vadd.f32 %v13576_v27, %v13502_v59 }
0x2563   : > { %v13583_v26 = vrot.slane %v13577_v34, %v16735_v54 }
0x2565   : > { %13584 = vst [vmem:[%s330_s14] sm:$0xff] %v13583_v26 }
0x2566 PF: > { %s19_s30 = sadd.s32 1, %s15942_s30  }
0x2567   : > { %p16_p4 = scmp.ge.s32.totalorder %s19_s30, 4  }
0x2569   :  { %18 = sbr.rel (!%p16_p4) target bundleno = 1 (0x1), region = 90 }

</bundles_post_ra>
